<compile_context>
chip_gen: v6e
topology: v6e:2x2x1
jax: 0.10.0
libtpu: 0.0.40
codegen_flags: <defaults>
</compile_context>

<pallas_src>
import jax
import jax.numpy as jnp
from jax.experimental import pallas as pl
from jax.experimental.pallas import tpu as pltpu


COMPUTE_DTYPE = jnp.bfloat16            # MXU operand dtype (f32 accumulation)
VMEM_LIMIT = 32 * 1024 * 1024


# ----------------------------- Pallas kernel ------------------------------- #

def _fused_basic_block_kernel(x_ref, w1_ref, b1_ref, wh_ref, bh_ref, ww_ref,
                              bw_ref, wa_ref, s1_ref, t1_ref, wb_ref, s2_ref,
                              t2_ref, o_ref, xpad_ref, hpad_ref):
    """Entire BasicBlock forward for one batch element.

    x_ref : (1, H, W, C) f32 input tile (also the residual)
    w1/b1 : (C, mip), (1, mip)   1x1 conv + folded eval-BN of the CA branch
    wh/bh, ww/bw : (mip, C), (1, C) attention heads
    wa_ref: (9, C, Cout) bf16    CAConv 3x3 taps (kh*3+kw)
    s1/t1 : (1, Cout)            folded conv-bias + BasicBlock bn1 scale/shift
    wb_ref: (9, Cout, Cout) bf16 conv2 3x3 taps (bias=False)
    s2/t2 : (1, Cout)            folded bn2 scale/shift
    o_ref : (1, H*W, Cout) f32
    xpad_ref / hpad_ref : (H+2, W+2, C/Cout) f32 VMEM scratch (padded tiles)
    """
    H = x_ref.shape[1]
    W = x_ref.shape[2]
    C = x_ref.shape[3]
    cout = o_ref.shape[2]

    x = x_ref[0].astype(jnp.float32)                     # (H, W, C)

    # ---------------- CAConv attention branch (fused) -----------------------
    xh = jnp.mean(x, axis=1)                             # (H, C) pool over W
    xw = jnp.mean(x, axis=0)                             # (W, C) pool over H
    y = jnp.concatenate([xh, xw], axis=0)                # (H+W, C)
    y = jnp.dot(y, w1_ref[...], preferred_element_type=jnp.float32) + b1_ref[...]
    y = y * (jnp.clip(y + 3.0, 0.0, 6.0) * (1.0 / 6.0))  # h_swish
    ah = jax.nn.sigmoid(
        jnp.dot(y[:H], wh_ref[...], preferred_element_type=jnp.float32) + bh_ref[...])
    aw = jax.nn.sigmoid(
        jnp.dot(y[H:], ww_ref[...], preferred_element_type=jnp.float32) + bw_ref[...])

    # ---------------- CA apply -> zero-padded VMEM scratch ------------------
    att = x * aw[None, :, :] * ah[:, None, :]            # (H, W, C) f32
    xpad_ref[...] = jnp.zeros_like(xpad_ref)             # cheap; megacore-safe
    xpad_ref[1:H + 1, 1:W + 1, :] = att
    xp = xpad_ref[...].astype(wa_ref.dtype)              # (H+2, W+2, C) bf16

    # ---------------- conv1 (3x3, stride 1) + folded BN1 + ReLU -------------
    acc = jnp.zeros((H * W, cout), jnp.float32)          # register accumulator
    for kh in range(3):
        for kw in range(3):
            tap = xp[kh:kh + H, kw:kw + W, :].reshape(H * W, C)
            acc = acc + jnp.dot(tap, wa_ref[kh * 3 + kw],
                                preferred_element_type=jnp.float32)
    h1 = jnp.maximum(acc * s1_ref[...] + t1_ref[...], 0.0)   # (H*W, Cout) f32

    # ---------------- pad intermediate in VMEM (no HBM round trip) ----------
    hpad_ref[...] = jnp.zeros_like(hpad_ref)
    hpad_ref[1:H + 1, 1:W + 1, :] = h1.reshape(H, W, cout)
    hp = hpad_ref[...].astype(wb_ref.dtype)               # (H+2, W+2, Cout) bf16

    # ---------------- conv2 (3x3, no bias) + folded BN2 + residual + ReLU ---
    acc2 = jnp.zeros((H * W, cout), jnp.float32)
    for kh in range(3):
        for kw in range(3):
            tap = hp[kh:kh + H, kw:kw + W, :].reshape(H * W, cout)
            acc2 = acc2 + jnp.dot(tap, wb_ref[kh * 3 + kw],
                                  preferred_element_type=jnp.float32)

    out = acc2 * s2_ref[...] + t2_ref[...] + x.reshape(H * W, C)
    o_ref[0] = jnp.maximum(out, 0.0).astype(o_ref.dtype)     # single store


# ----------------------------- wrapper -------------------------------------- #

def basic_block_fused(x, w1, b1, wh, bh, ww, bw, wa, s1, t1, wb, s2, t2):
    """x: (N, H, W, C) f32 -> (N, H, W, Cout) f32, whole block in one call."""
    N, H, W, C = x.shape
    mip = w1.shape[1]
    cout = wa.shape[-1]

    out = pl.pallas_call(
        _fused_basic_block_kernel,
        grid=(N,),
        in_specs=[
            pl.BlockSpec((1, H, W, C), lambda n: (n, 0, 0, 0)),
            pl.BlockSpec((C, mip), lambda n: (0, 0)),
            pl.BlockSpec((1, mip), lambda n: (0, 0)),
            pl.BlockSpec((mip, C), lambda n: (0, 0)),
            pl.BlockSpec((1, C), lambda n: (0, 0)),
            pl.BlockSpec((mip, C), lambda n: (0, 0)),
            pl.BlockSpec((1, C), lambda n: (0, 0)),
            pl.BlockSpec((9, C, cout), lambda n: (0, 0, 0)),    # weights resident
            pl.BlockSpec((1, cout), lambda n: (0, 0)),
            pl.BlockSpec((1, cout), lambda n: (0, 0)),
            pl.BlockSpec((9, cout, cout), lambda n: (0, 0, 0)),
            pl.BlockSpec((1, cout), lambda n: (0, 0)),
            pl.BlockSpec((1, cout), lambda n: (0, 0)),
        ],
        out_specs=pl.BlockSpec((1, H * W, cout), lambda n: (n, 0, 0)),
        out_shape=jax.ShapeDtypeStruct((N, H * W, cout), jnp.float32),
        scratch_shapes=[
            pltpu.VMEM((H + 2, W + 2, C), jnp.float32),        # padded CA-applied x
            pltpu.VMEM((H + 2, W + 2, cout), jnp.float32),     # padded intermediate
        ],
        compiler_params=pltpu.CompilerParams(
            dimension_semantics=("parallel",),
            vmem_limit_bytes=VMEM_LIMIT),
    )(x, w1, b1.reshape(1, mip), wh, bh.reshape(1, C), ww, bw.reshape(1, C),
      wa.astype(COMPUTE_DTYPE), s1.reshape(1, cout), t1.reshape(1, cout),
      wb.astype(COMPUTE_DTYPE), s2.reshape(1, cout), t2.reshape(1, cout))
    return out.reshape(N, H, W, cout)


# ----------------------------- parameters ----------------------------------- #

def init_params(key, inplanes, planes, reduction=32):
    mip = max(8, inplanes // reduction)
    ks = jax.random.split(key, 24)

    def rnd(k, shape, scale=0.1):
        return jax.random.normal(k, shape, jnp.float32) * scale

    p = {}
    # CAConv(inplanes, planes, kernel_size=3, stride=1)
    p["ca_conv1_w"] = rnd(ks[0], (inplanes, mip))        # 1x1 conv (Cin, mip)
    p["ca_conv1_b"] = rnd(ks[1], (mip,))
    p["ca_bn1_gamma"] = 1.0 + rnd(ks[2], (mip,))
    p["ca_bn1_beta"] = rnd(ks[3], (mip,))
    p["ca_bn1_mean"] = rnd(ks[4], (mip,))
    p["ca_bn1_var"] = jax.random.uniform(ks[5], (mip,), jnp.float32, 0.5, 1.5)
    p["ca_convh_w"] = rnd(ks[6], (mip, inplanes))
    p["ca_convh_b"] = rnd(ks[7], (inplanes,))
    p["ca_convw_w"] = rnd(ks[8], (mip, inplanes))
    p["ca_convw_b"] = rnd(ks[9], (inplanes,))
    p["ca_conv_w"] = rnd(ks[10], (9, inplanes, planes))  # 3x3 taps (kh*3+kw, Cin, Cout)
    p["ca_conv_b"] = rnd(ks[11], (planes,))
    # BasicBlock bn1 / conv2 / bn2
    p["bn1_gamma"] = 1.0 + rnd(ks[12], (planes,))
    p["bn1_beta"] = rnd(ks[13], (planes,))
    p["bn1_mean"] = rnd(ks[14], (planes,))
    p["bn1_var"] = jax.random.uniform(ks[15], (planes,), jnp.float32, 0.5, 1.5)
    p["conv2_w"] = rnd(ks[16], (9, planes, planes))      # 3x3, bias=False
    p["bn2_gamma"] = 1.0 + rnd(ks[17], (planes,))
    p["bn2_beta"] = rnd(ks[18], (planes,))
    p["bn2_mean"] = rnd(ks[19], (planes,))
    p["bn2_var"] = jax.random.uniform(ks[20], (planes,), jnp.float32, 0.5, 1.5)
    return p


# ----------------------------- forward pass --------------------------------- #

def basic_block_forward(params, x_nchw, eps=1e-5):
    # layout: NCHW (PyTorch) -> NHWC for the kernel -> NCHW output.
    x = jnp.transpose(x_nchw, (0, 2, 3, 1)).astype(jnp.float32)

    # Fold CA-branch 1x1 conv + bn1 (eval) into (w1, b1).
    s1 = params["ca_bn1_gamma"] / jnp.sqrt(params["ca_bn1_var"] + eps)
    w1 = params["ca_conv1_w"] * s1[None, :]
    b1 = (params["ca_conv1_b"] - params["ca_bn1_mean"]) * s1 + params["ca_bn1_beta"]

    # Fold CAConv 3x3 conv bias + BasicBlock bn1 (eval) into (sb1, tb1).
    sb1 = params["bn1_gamma"] / jnp.sqrt(params["bn1_var"] + eps)
    tb1 = (params["ca_conv_b"] - params["bn1_mean"]) * sb1 + params["bn1_beta"]

    # Fold BasicBlock bn2 (eval) into (sb2, tb2).
    sb2 = params["bn2_gamma"] / jnp.sqrt(params["bn2_var"] + eps)
    tb2 = params["bn2_beta"] - params["bn2_mean"] * sb2

    out = basic_block_fused(
        x, w1, b1,
        params["ca_convh_w"], params["ca_convh_b"],
        params["ca_convw_w"], params["ca_convw_b"],
        params["ca_conv_w"], sb1, tb1,
        params["conv2_w"], sb2, tb2)

    return jnp.transpose(out, (0, 3, 1, 2))


# ----------------------------- pure-JAX reference ---------------------------- #

def reference_forward(params, x_nchw, eps=1e-5):
    x = jnp.transpose(x_nchw, (0, 2, 3, 1)).astype(jnp.float32)
    N, H, W, C = x.shape
    x_h = jnp.mean(x, axis=2)
    x_w = jnp.mean(x, axis=1)
    y = jnp.concatenate([x_h, x_w], axis=1)
    s1 = params["ca_bn1_gamma"] / jnp.sqrt(params["ca_bn1_var"] + eps)
    w1 = params["ca_conv1_w"] * s1[None, :]
    b1 = (params["ca_conv1_b"] - params["ca_bn1_mean"]) * s1 + params["ca_bn1_beta"]
    y = y @ w1 + b1
    y = y * (jnp.clip(y + 3.0, 0.0, 6.0) / 6.0)
    a_h = jax.nn.sigmoid(y[:, :H, :] @ params["ca_convh_w"] + params["ca_convh_b"])
    a_w = jax.nn.sigmoid(y[:, H:, :] @ params["ca_convw_w"] + params["ca_convw_b"])
    att = x * a_w[:, None, :, :] * a_h[:, :, None, :]

    def conv3x3_ref(z, w_taps, b):
        Nn, Hh, Ww, _ = z.shape
        zp = jnp.pad(z, ((0, 0), (1, 1), (1, 1), (0, 0)))
        acc = jnp.zeros((Nn, Hh, Ww, w_taps.shape[-1]), jnp.float32) + b
        for kh in range(3):
            for kw in range(3):
                acc = acc + zp[:, kh:kh + Hh, kw:kw + Ww, :] @ w_taps[kh * 3 + kw]
        return acc

    out = conv3x3_ref(att, params["ca_conv_w"], params["ca_conv_b"])
    s = params["bn1_gamma"] / jnp.sqrt(params["bn1_var"] + eps)
    t = params["bn1_beta"] - params["bn1_mean"] * s
    out = jnp.maximum(out * s + t, 0.0)
    out = conv3x3_ref(out, params["conv2_w"], jnp.zeros((out.shape[-1],), jnp.float32))
    s2 = params["bn2_gamma"] / jnp.sqrt(params["bn2_var"] + eps)
    t2 = params["bn2_beta"] - params["bn2_mean"] * s2
    out = jnp.maximum(out * s2 + t2 + x, 0.0)
    return jnp.transpose(out, (0, 3, 1, 2))


# ----------------------------------- main ------------------------------------ #

if __name__ == "__main__":
    key = jax.random.PRNGKey(0)
    kx, kp = jax.random.split(key)

    N, C, H, W = 2, 4, 16, 16           # BasicBlock(inplanes=4, planes=4, stride=1)
    x = jax.random.normal(kx, (N, C, H, W), jnp.float32)
    params = init_params(kp, inplanes=C, planes=C)

    out = jax.jit(basic_block_forward)(params, x)
    out = jax.block_until_ready(out)

    ref = reference_forward(params, x)
    assert out.shape == (N, C, H, W)
    err = float(jnp.max(jnp.abs(out - ref)))
    assert jnp.allclose(out, ref, rtol=2e-2, atol=2e-2), f"max abs err {err}"

    print("KERNEL_OK")
</pallas_src>

<mosaic_0001>
module attributes {stable_mosaic.version = 11 : i64} {
  func.func @_fused_basic_block_kernel(%arg0: i32, %arg1: memref<1x16x16x4xf32, #tpu.memory_space<vmem>>, %arg2: memref<4x8xf32, #tpu.memory_space<vmem>>, %arg3: memref<1x8xf32, #tpu.memory_space<vmem>>, %arg4: memref<8x4xf32, #tpu.memory_space<vmem>>, %arg5: memref<1x4xf32, #tpu.memory_space<vmem>>, %arg6: memref<8x4xf32, #tpu.memory_space<vmem>>, %arg7: memref<1x4xf32, #tpu.memory_space<vmem>>, %arg8: memref<9x4x4xbf16, #tpu.memory_space<vmem>>, %arg9: memref<1x4xf32, #tpu.memory_space<vmem>>, %arg10: memref<1x4xf32, #tpu.memory_space<vmem>>, %arg11: memref<9x4x4xbf16, #tpu.memory_space<vmem>>, %arg12: memref<1x4xf32, #tpu.memory_space<vmem>>, %arg13: memref<1x4xf32, #tpu.memory_space<vmem>>, %arg14: memref<1x256x4xf32, #tpu.memory_space<vmem>>, %arg15: memref<18x18x4xf32, #tpu.memory_space<vmem>>, %arg16: memref<18x18x4xf32, #tpu.memory_space<vmem>>) attributes {dimension_semantics = [#tpu.dimension_semantics<parallel>], iteration_bounds = array<i64: 2>, scalar_prefetch = 0 : i64, scratch_operands = 2 : i64, tpu.core_type = #tpu.core_type<tc>, window_params = [{transform_indices = @transform_0, window_bounds = array<i64: 1, 16, 16, 4>}, {pipeline_mode = #tpu.pipeline_mode<synchronous>, transform_indices = @transform_1, window_bounds = array<i64: 4, 8>}, {pipeline_mode = #tpu.pipeline_mode<synchronous>, transform_indices = @transform_2, window_bounds = array<i64: 1, 8>}, {pipeline_mode = #tpu.pipeline_mode<synchronous>, transform_indices = @transform_3, window_bounds = array<i64: 8, 4>}, {pipeline_mode = #tpu.pipeline_mode<synchronous>, transform_indices = @transform_4, window_bounds = array<i64: 1, 4>}, {pipeline_mode = #tpu.pipeline_mode<synchronous>, transform_indices = @transform_5, window_bounds = array<i64: 8, 4>}, {pipeline_mode = #tpu.pipeline_mode<synchronous>, transform_indices = @transform_6, window_bounds = array<i64: 1, 4>}, {pipeline_mode = #tpu.pipeline_mode<synchronous>, transform_indices = @transform_7, window_bounds = array<i64: 9, 4, 4>}, {pipeline_mode = #tpu.pipeline_mode<synchronous>, transform_indices = @transform_8, window_bounds = array<i64: 1, 4>}, {pipeline_mode = #tpu.pipeline_mode<synchronous>, transform_indices = @transform_9, window_bounds = array<i64: 1, 4>}, {pipeline_mode = #tpu.pipeline_mode<synchronous>, transform_indices = @transform_10, window_bounds = array<i64: 9, 4, 4>}, {pipeline_mode = #tpu.pipeline_mode<synchronous>, transform_indices = @transform_11, window_bounds = array<i64: 1, 4>}, {pipeline_mode = #tpu.pipeline_mode<synchronous>, transform_indices = @transform_12, window_bounds = array<i64: 1, 4>}, {transform_indices = @transform_13, window_bounds = array<i64: 1, 256, 4>}]} {
    %c0 = arith.constant 0 : index
    %c0_0 = arith.constant 0 : index
    %c0_1 = arith.constant 0 : index
    %c0_2 = arith.constant 0 : index
    %0 = vector.load %arg1[%c0, %c0_0, %c0_1, %c0_2] : memref<1x16x16x4xf32, #tpu.memory_space<vmem>>, vector<1x16x16x4xf32>
    %1 = vector.shape_cast %0 : vector<1x16x16x4xf32> to vector<16x16x4xf32>
    %cst = arith.constant dense<0.000000e+00> : vector<16x4xf32>
    %2 = vector.multi_reduction <add>, %1, %cst [1] : vector<16x16x4xf32> to vector<16x4xf32>
    %cst_3 = arith.constant 1.600000e+01 : f32
    %3 = vector.broadcast %cst_3 : f32 to vector<16x4xf32>
    %4 = arith.divf %2, %3 : vector<16x4xf32>
    %cst_4 = arith.constant dense<0.000000e+00> : vector<16x4xf32>
    %5 = vector.multi_reduction <add>, %1, %cst_4 [0] : vector<16x16x4xf32> to vector<16x4xf32>
    %cst_5 = arith.constant 1.600000e+01 : f32
    %6 = vector.broadcast %cst_5 : f32 to vector<16x4xf32>
    %7 = arith.divf %5, %6 : vector<16x4xf32>
    %8 = tpu.concatenate %4, %7 in 0 : vector<16x4xf32>, vector<16x4xf32> -> vector<32x4xf32>
    %c0_6 = arith.constant 0 : index
    %c0_7 = arith.constant 0 : index
    %9 = vector.load %arg2[%c0_6, %c0_7] : memref<4x8xf32, #tpu.memory_space<vmem>>, vector<4x8xf32>
    %cst_8 = arith.constant dense<0.000000e+00> : vector<32x8xf32>
    %10 = tpu.matmul %8, %9, %cst_8 {dimension_numbers = #tpu.dot_dimension_numbers<[1], [0], [0], [1], [0, 0, 1, 1], [], []>} : vector<32x4xf32>, vector<4x8xf32>, vector<32x8xf32> -> vector<32x8xf32>
    %c0_9 = arith.constant 0 : index
    %c0_10 = arith.constant 0 : index
    %11 = vector.load %arg3[%c0_9, %c0_10] : memref<1x8xf32, #tpu.memory_space<vmem>>, vector<1x8xf32>
    %12 = vector.broadcast %11 : vector<1x8xf32> to vector<32x8xf32>
    %13 = arith.addf %10, %12 : vector<32x8xf32>
    %cst_11 = arith.constant 3.000000e+00 : f32
    %14 = vector.broadcast %cst_11 : f32 to vector<32x8xf32>
    %15 = arith.addf %13, %14 : vector<32x8xf32>
    %cst_12 = arith.constant 0.000000e+00 : f32
    %cst_13 = arith.constant 6.000000e+00 : f32
    %16 = vector.broadcast %cst_12 : f32 to vector<32x8xf32>
    %17 = arith.maximumf %16, %15 : vector<32x8xf32>
    %18 = vector.broadcast %cst_13 : f32 to vector<32x8xf32>
    %19 = arith.minimumf %18, %17 : vector<32x8xf32>
    %cst_14 = arith.constant 0.166666672 : f32
    %20 = vector.broadcast %cst_14 : f32 to vector<32x8xf32>
    %21 = arith.mulf %19, %20 : vector<32x8xf32>
    %22 = arith.mulf %13, %21 : vector<32x8xf32>
    %23 = vector.extract_strided_slice %22 {offsets = [0, 0], sizes = [16, 8], strides = [1, 1]} : vector<32x8xf32> to vector<16x8xf32>
    %c0_15 = arith.constant 0 : index
    %c0_16 = arith.constant 0 : index
    %24 = vector.load %arg4[%c0_15, %c0_16] : memref<8x4xf32, #tpu.memory_space<vmem>>, vector<8x4xf32>
    %cst_17 = arith.constant dense<0.000000e+00> : vector<16x4xf32>
    %25 = tpu.matmul %23, %24, %cst_17 {dimension_numbers = #tpu.dot_dimension_numbers<[1], [0], [0], [1], [0, 0, 1, 1], [], []>} : vector<16x8xf32>, vector<8x4xf32>, vector<16x4xf32> -> vector<16x4xf32>
    %c0_18 = arith.constant 0 : index
    %c0_19 = arith.constant 0 : index
    %26 = vector.load %arg5[%c0_18, %c0_19] : memref<1x4xf32, #tpu.memory_space<vmem>>, vector<1x4xf32>
    %27 = vector.broadcast %26 : vector<1x4xf32> to vector<16x4xf32>
    %28 = arith.addf %25, %27 : vector<16x4xf32>
    %29 = arith.negf %28 : vector<16x4xf32>
    %30 = math.exp %29 : vector<16x4xf32>
    %cst_20 = arith.constant 1.000000e+00 : f32
    %31 = vector.broadcast %cst_20 : f32 to vector<16x4xf32>
    %32 = arith.addf %31, %30 : vector<16x4xf32>
    %33 = arith.divf %31, %32 : vector<16x4xf32>
    %34 = vector.extract_strided_slice %22 {offsets = [16, 0], sizes = [16, 8], strides = [1, 1]} : vector<32x8xf32> to vector<16x8xf32>
    %c0_21 = arith.constant 0 : index
    %c0_22 = arith.constant 0 : index
    %35 = vector.load %arg6[%c0_21, %c0_22] : memref<8x4xf32, #tpu.memory_space<vmem>>, vector<8x4xf32>
    %cst_23 = arith.constant dense<0.000000e+00> : vector<16x4xf32>
    %36 = tpu.matmul %34, %35, %cst_23 {dimension_numbers = #tpu.dot_dimension_numbers<[1], [0], [0], [1], [0, 0, 1, 1], [], []>} : vector<16x8xf32>, vector<8x4xf32>, vector<16x4xf32> -> vector<16x4xf32>
    %c0_24 = arith.constant 0 : index
    %c0_25 = arith.constant 0 : index
    %37 = vector.load %arg7[%c0_24, %c0_25] : memref<1x4xf32, #tpu.memory_space<vmem>>, vector<1x4xf32>
    %38 = vector.broadcast %37 : vector<1x4xf32> to vector<16x4xf32>
    %39 = arith.addf %36, %38 : vector<16x4xf32>
    %40 = arith.negf %39 : vector<16x4xf32>
    %41 = math.exp %40 : vector<16x4xf32>
    %cst_26 = arith.constant 1.000000e+00 : f32
    %42 = vector.broadcast %cst_26 : f32 to vector<16x4xf32>
    %43 = arith.addf %42, %41 : vector<16x4xf32>
    %44 = arith.divf %42, %43 : vector<16x4xf32>
    %45 = vector.shape_cast %44 : vector<16x4xf32> to vector<1x16x4xf32>
    %46 = vector.broadcast %45 : vector<1x16x4xf32> to vector<16x16x4xf32>
    %47 = arith.mulf %1, %46 : vector<16x16x4xf32>
    %48 = vector.shape_cast %33 : vector<16x4xf32> to vector<16x1x4xf32>
    %49 = vector.broadcast %48 : vector<16x1x4xf32> to vector<16x16x4xf32>
    %50 = arith.mulf %47, %49 : vector<16x16x4xf32>
    %cst_27 = arith.constant 0.000000e+00 : f32
    %51 = vector.broadcast %cst_27 : f32 to vector<18x18x4xf32>
    %c0_28 = arith.constant 0 : index
    %c0_29 = arith.constant 0 : index
    %c0_30 = arith.constant 0 : index
    %52 = vector.load %arg15[%c0_28, %c0_29, %c0_30] : memref<18x18x4xf32, #tpu.memory_space<vmem>>, vector<18x18x4xf32>
    tpu.vector_store %arg15[%c0_28, %c0_29, %c0_30], %51 {strides = array<i32>} : memref<18x18x4xf32, #tpu.memory_space<vmem>>, vector<18x18x4xf32>,
    %c1 = arith.constant 1 : index
    %c1_31 = arith.constant 1 : index
    %c0_32 = arith.constant 0 : index
    %53 = vector.load %arg15[%c1, %c1_31, %c0_32] : memref<18x18x4xf32, #tpu.memory_space<vmem>>, vector<16x16x4xf32>
    tpu.vector_store %arg15[%c1, %c1_31, %c0_32], %50 {strides = array<i32>} : memref<18x18x4xf32, #tpu.memory_space<vmem>>, vector<16x16x4xf32>,
    %c0_33 = arith.constant 0 : index
    %c0_34 = arith.constant 0 : index
    %c0_35 = arith.constant 0 : index
    %54 = vector.load %arg15[%c0_33, %c0_34, %c0_35] : memref<18x18x4xf32, #tpu.memory_space<vmem>>, vector<18x18x4xf32>
    %55 = arith.truncf %54 : vector<18x18x4xf32> to vector<18x18x4xbf16>
    %cst_36 = arith.constant 0.000000e+00 : f32
    %56 = vector.broadcast %cst_36 : f32 to vector<256x4xf32>
    %57 = vector.extract_strided_slice %55 {offsets = [0, 0, 0], sizes = [16, 16, 4], strides = [1, 1, 1]} : vector<18x18x4xbf16> to vector<16x16x4xbf16>
    %58 = vector.shape_cast %57 : vector<16x16x4xbf16> to vector<256x4xbf16>
    %c0_37 = arith.constant 0 : index
    %c0_38 = arith.constant 0 : index
    %c0_39 = arith.constant 0 : index
    %59 = vector.load %arg8[%c0_37, %c0_38, %c0_39] : memref<9x4x4xbf16, #tpu.memory_space<vmem>>, vector<1x4x4xbf16>
    %60 = vector.shape_cast %59 : vector<1x4x4xbf16> to vector<4x4xbf16>
    %cst_40 = arith.constant dense<0.000000e+00> : vector<256x4xf32>
    %61 = tpu.matmul %58, %60, %cst_40 {dimension_numbers = #tpu.dot_dimension_numbers<[1], [0], [0], [1], [0, 0, 1, 1], [], []>} : vector<256x4xbf16>, vector<4x4xbf16>, vector<256x4xf32> -> vector<256x4xf32>
    %62 = arith.addf %56, %61 : vector<256x4xf32>
    %63 = vector.extract_strided_slice %55 {offsets = [0, 1, 0], sizes = [16, 16, 4], strides = [1, 1, 1]} : vector<18x18x4xbf16> to vector<16x16x4xbf16>
    %64 = vector.shape_cast %63 : vector<16x16x4xbf16> to vector<256x4xbf16>
    %c1_41 = arith.constant 1 : index
    %c0_42 = arith.constant 0 : index
    %c0_43 = arith.constant 0 : index
    %65 = vector.load %arg8[%c1_41, %c0_42, %c0_43] : memref<9x4x4xbf16, #tpu.memory_space<vmem>>, vector<1x4x4xbf16>
    %66 = vector.shape_cast %65 : vector<1x4x4xbf16> to vector<4x4xbf16>
    %cst_44 = arith.constant dense<0.000000e+00> : vector<256x4xf32>
    %67 = tpu.matmul %64, %66, %cst_44 {dimension_numbers = #tpu.dot_dimension_numbers<[1], [0], [0], [1], [0, 0, 1, 1], [], []>} : vector<256x4xbf16>, vector<4x4xbf16>, vector<256x4xf32> -> vector<256x4xf32>
    %68 = arith.addf %62, %67 : vector<256x4xf32>
    %69 = vector.extract_strided_slice %55 {offsets = [0, 2, 0], sizes = [16, 16, 4], strides = [1, 1, 1]} : vector<18x18x4xbf16> to vector<16x16x4xbf16>
    %70 = vector.shape_cast %69 : vector<16x16x4xbf16> to vector<256x4xbf16>
    %c2 = arith.constant 2 : index
    %c0_45 = arith.constant 0 : index
    %c0_46 = arith.constant 0 : index
    %71 = vector.load %arg8[%c2, %c0_45, %c0_46] : memref<9x4x4xbf16, #tpu.memory_space<vmem>>, vector<1x4x4xbf16>
    %72 = vector.shape_cast %71 : vector<1x4x4xbf16> to vector<4x4xbf16>
    %cst_47 = arith.constant dense<0.000000e+00> : vector<256x4xf32>
    %73 = tpu.matmul %70, %72, %cst_47 {dimension_numbers = #tpu.dot_dimension_numbers<[1], [0], [0], [1], [0, 0, 1, 1], [], []>} : vector<256x4xbf16>, vector<4x4xbf16>, vector<256x4xf32> -> vector<256x4xf32>
    %74 = arith.addf %68, %73 : vector<256x4xf32>
    %75 = vector.extract_strided_slice %55 {offsets = [1, 0, 0], sizes = [16, 16, 4], strides = [1, 1, 1]} : vector<18x18x4xbf16> to vector<16x16x4xbf16>
    %76 = vector.shape_cast %75 : vector<16x16x4xbf16> to vector<256x4xbf16>
    %c3 = arith.constant 3 : index
    %c0_48 = arith.constant 0 : index
    %c0_49 = arith.constant 0 : index
    %77 = vector.load %arg8[%c3, %c0_48, %c0_49] : memref<9x4x4xbf16, #tpu.memory_space<vmem>>, vector<1x4x4xbf16>
    %78 = vector.shape_cast %77 : vector<1x4x4xbf16> to vector<4x4xbf16>
    %cst_50 = arith.constant dense<0.000000e+00> : vector<256x4xf32>
    %79 = tpu.matmul %76, %78, %cst_50 {dimension_numbers = #tpu.dot_dimension_numbers<[1], [0], [0], [1], [0, 0, 1, 1], [], []>} : vector<256x4xbf16>, vector<4x4xbf16>, vector<256x4xf32> -> vector<256x4xf32>
    %80 = arith.addf %74, %79 : vector<256x4xf32>
    %81 = vector.extract_strided_slice %55 {offsets = [1, 1, 0], sizes = [16, 16, 4], strides = [1, 1, 1]} : vector<18x18x4xbf16> to vector<16x16x4xbf16>
    %82 = vector.shape_cast %81 : vector<16x16x4xbf16> to vector<256x4xbf16>
    %c4 = arith.constant 4 : index
    %c0_51 = arith.constant 0 : index
    %c0_52 = arith.constant 0 : index
    %83 = vector.load %arg8[%c4, %c0_51, %c0_52] : memref<9x4x4xbf16, #tpu.memory_space<vmem>>, vector<1x4x4xbf16>
    %84 = vector.shape_cast %83 : vector<1x4x4xbf16> to vector<4x4xbf16>
    %cst_53 = arith.constant dense<0.000000e+00> : vector<256x4xf32>
    %85 = tpu.matmul %82, %84, %cst_53 {dimension_numbers = #tpu.dot_dimension_numbers<[1], [0], [0], [1], [0, 0, 1, 1], [], []>} : vector<256x4xbf16>, vector<4x4xbf16>, vector<256x4xf32> -> vector<256x4xf32>
    %86 = arith.addf %80, %85 : vector<256x4xf32>
    %87 = vector.extract_strided_slice %55 {offsets = [1, 2, 0], sizes = [16, 16, 4], strides = [1, 1, 1]} : vector<18x18x4xbf16> to vector<16x16x4xbf16>
    %88 = vector.shape_cast %87 : vector<16x16x4xbf16> to vector<256x4xbf16>
    %c5 = arith.constant 5 : index
    %c0_54 = arith.constant 0 : index
    %c0_55 = arith.constant 0 : index
    %89 = vector.load %arg8[%c5, %c0_54, %c0_55] : memref<9x4x4xbf16, #tpu.memory_space<vmem>>, vector<1x4x4xbf16>
    %90 = vector.shape_cast %89 : vector<1x4x4xbf16> to vector<4x4xbf16>
    %cst_56 = arith.constant dense<0.000000e+00> : vector<256x4xf32>
    %91 = tpu.matmul %88, %90, %cst_56 {dimension_numbers = #tpu.dot_dimension_numbers<[1], [0], [0], [1], [0, 0, 1, 1], [], []>} : vector<256x4xbf16>, vector<4x4xbf16>, vector<256x4xf32> -> vector<256x4xf32>
    %92 = arith.addf %86, %91 : vector<256x4xf32>
    %93 = vector.extract_strided_slice %55 {offsets = [2, 0, 0], sizes = [16, 16, 4], strides = [1, 1, 1]} : vector<18x18x4xbf16> to vector<16x16x4xbf16>
    %94 = vector.shape_cast %93 : vector<16x16x4xbf16> to vector<256x4xbf16>
    %c6 = arith.constant 6 : index
    %c0_57 = arith.constant 0 : index
    %c0_58 = arith.constant 0 : index
    %95 = vector.load %arg8[%c6, %c0_57, %c0_58] : memref<9x4x4xbf16, #tpu.memory_space<vmem>>, vector<1x4x4xbf16>
    %96 = vector.shape_cast %95 : vector<1x4x4xbf16> to vector<4x4xbf16>
    %cst_59 = arith.constant dense<0.000000e+00> : vector<256x4xf32>
    %97 = tpu.matmul %94, %96, %cst_59 {dimension_numbers = #tpu.dot_dimension_numbers<[1], [0], [0], [1], [0, 0, 1, 1], [], []>} : vector<256x4xbf16>, vector<4x4xbf16>, vector<256x4xf32> -> vector<256x4xf32>
    %98 = arith.addf %92, %97 : vector<256x4xf32>
    %99 = vector.extract_strided_slice %55 {offsets = [2, 1, 0], sizes = [16, 16, 4], strides = [1, 1, 1]} : vector<18x18x4xbf16> to vector<16x16x4xbf16>
    %100 = vector.shape_cast %99 : vector<16x16x4xbf16> to vector<256x4xbf16>
    %c7 = arith.constant 7 : index
    %c0_60 = arith.constant 0 : index
    %c0_61 = arith.constant 0 : index
    %101 = vector.load %arg8[%c7, %c0_60, %c0_61] : memref<9x4x4xbf16, #tpu.memory_space<vmem>>, vector<1x4x4xbf16>
    %102 = vector.shape_cast %101 : vector<1x4x4xbf16> to vector<4x4xbf16>
    %cst_62 = arith.constant dense<0.000000e+00> : vector<256x4xf32>
    %103 = tpu.matmul %100, %102, %cst_62 {dimension_numbers = #tpu.dot_dimension_numbers<[1], [0], [0], [1], [0, 0, 1, 1], [], []>} : vector<256x4xbf16>, vector<4x4xbf16>, vector<256x4xf32> -> vector<256x4xf32>
    %104 = arith.addf %98, %103 : vector<256x4xf32>
    %105 = vector.extract_strided_slice %55 {offsets = [2, 2, 0], sizes = [16, 16, 4], strides = [1, 1, 1]} : vector<18x18x4xbf16> to vector<16x16x4xbf16>
    %106 = vector.shape_cast %105 : vector<16x16x4xbf16> to vector<256x4xbf16>
    %c8 = arith.constant 8 : index
    %c0_63 = arith.constant 0 : index
    %c0_64 = arith.constant 0 : index
    %107 = vector.load %arg8[%c8, %c0_63, %c0_64] : memref<9x4x4xbf16, #tpu.memory_space<vmem>>, vector<1x4x4xbf16>
    %108 = vector.shape_cast %107 : vector<1x4x4xbf16> to vector<4x4xbf16>
    %cst_65 = arith.constant dense<0.000000e+00> : vector<256x4xf32>
    %109 = tpu.matmul %106, %108, %cst_65 {dimension_numbers = #tpu.dot_dimension_numbers<[1], [0], [0], [1], [0, 0, 1, 1], [], []>} : vector<256x4xbf16>, vector<4x4xbf16>, vector<256x4xf32> -> vector<256x4xf32>
    %110 = arith.addf %104, %109 : vector<256x4xf32>
    %c0_66 = arith.constant 0 : index
    %c0_67 = arith.constant 0 : index
    %111 = vector.load %arg9[%c0_66, %c0_67] : memref<1x4xf32, #tpu.memory_space<vmem>>, vector<1x4xf32>
    %112 = vector.broadcast %111 : vector<1x4xf32> to vector<256x4xf32>
    %113 = arith.mulf %110, %112 : vector<256x4xf32>
    %c0_68 = arith.constant 0 : index
    %c0_69 = arith.constant 0 : index
    %114 = vector.load %arg10[%c0_68, %c0_69] : memref<1x4xf32, #tpu.memory_space<vmem>>, vector<1x4xf32>
    %115 = vector.broadcast %114 : vector<1x4xf32> to vector<256x4xf32>
    %116 = arith.addf %113, %115 : vector<256x4xf32>
    %cst_70 = arith.constant 0.000000e+00 : f32
    %117 = vector.broadcast %cst_70 : f32 to vector<256x4xf32>
    %118 = arith.maximumf %116, %117 : vector<256x4xf32>
    %cst_71 = arith.constant 0.000000e+00 : f32
    %119 = vector.broadcast %cst_71 : f32 to vector<18x18x4xf32>
    %c0_72 = arith.constant 0 : index
    %c0_73 = arith.constant 0 : index
    %c0_74 = arith.constant 0 : index
    %120 = vector.load %arg16[%c0_72, %c0_73, %c0_74] : memref<18x18x4xf32, #tpu.memory_space<vmem>>, vector<18x18x4xf32>
    tpu.vector_store %arg16[%c0_72, %c0_73, %c0_74], %119 {strides = array<i32>} : memref<18x18x4xf32, #tpu.memory_space<vmem>>, vector<18x18x4xf32>,
    %121 = vector.shape_cast %118 : vector<256x4xf32> to vector<16x16x4xf32>
    %c1_75 = arith.constant 1 : index
    %c1_76 = arith.constant 1 : index
    %c0_77 = arith.constant 0 : index
    %122 = vector.load %arg16[%c1_75, %c1_76, %c0_77] : memref<18x18x4xf32, #tpu.memory_space<vmem>>, vector<16x16x4xf32>
    tpu.vector_store %arg16[%c1_75, %c1_76, %c0_77], %121 {strides = array<i32>} : memref<18x18x4xf32, #tpu.memory_space<vmem>>, vector<16x16x4xf32>,
    %c0_78 = arith.constant 0 : index
    %c0_79 = arith.constant 0 : index
    %c0_80 = arith.constant 0 : index
    %123 = vector.load %arg16[%c0_78, %c0_79, %c0_80] : memref<18x18x4xf32, #tpu.memory_space<vmem>>, vector<18x18x4xf32>
    %124 = arith.truncf %123 : vector<18x18x4xf32> to vector<18x18x4xbf16>
    %cst_81 = arith.constant 0.000000e+00 : f32
    %125 = vector.broadcast %cst_81 : f32 to vector<256x4xf32>
    %126 = vector.extract_strided_slice %124 {offsets = [0, 0, 0], sizes = [16, 16, 4], strides = [1, 1, 1]} : vector<18x18x4xbf16> to vector<16x16x4xbf16>
    %127 = vector.shape_cast %126 : vector<16x16x4xbf16> to vector<256x4xbf16>
    %c0_82 = arith.constant 0 : index
    %c0_83 = arith.constant 0 : index
    %c0_84 = arith.constant 0 : index
    %128 = vector.load %arg11[%c0_82, %c0_83, %c0_84] : memref<9x4x4xbf16, #tpu.memory_space<vmem>>, vector<1x4x4xbf16>
    %129 = vector.shape_cast %128 : vector<1x4x4xbf16> to vector<4x4xbf16>
    %cst_85 = arith.constant dense<0.000000e+00> : vector<256x4xf32>
    %130 = tpu.matmul %127, %129, %cst_85 {dimension_numbers = #tpu.dot_dimension_numbers<[1], [0], [0], [1], [0, 0, 1, 1], [], []>} : vector<256x4xbf16>, vector<4x4xbf16>, vector<256x4xf32> -> vector<256x4xf32>
    %131 = arith.addf %125, %130 : vector<256x4xf32>
    %132 = vector.extract_strided_slice %124 {offsets = [0, 1, 0], sizes = [16, 16, 4], strides = [1, 1, 1]} : vector<18x18x4xbf16> to vector<16x16x4xbf16>
    %133 = vector.shape_cast %132 : vector<16x16x4xbf16> to vector<256x4xbf16>
    %c1_86 = arith.constant 1 : index
    %c0_87 = arith.constant 0 : index
    %c0_88 = arith.constant 0 : index
    %134 = vector.load %arg11[%c1_86, %c0_87, %c0_88] : memref<9x4x4xbf16, #tpu.memory_space<vmem>>, vector<1x4x4xbf16>
    %135 = vector.shape_cast %134 : vector<1x4x4xbf16> to vector<4x4xbf16>
    %cst_89 = arith.constant dense<0.000000e+00> : vector<256x4xf32>
    %136 = tpu.matmul %133, %135, %cst_89 {dimension_numbers = #tpu.dot_dimension_numbers<[1], [0], [0], [1], [0, 0, 1, 1], [], []>} : vector<256x4xbf16>, vector<4x4xbf16>, vector<256x4xf32> -> vector<256x4xf32>
    %137 = arith.addf %131, %136 : vector<256x4xf32>
    %138 = vector.extract_strided_slice %124 {offsets = [0, 2, 0], sizes = [16, 16, 4], strides = [1, 1, 1]} : vector<18x18x4xbf16> to vector<16x16x4xbf16>
    %139 = vector.shape_cast %138 : vector<16x16x4xbf16> to vector<256x4xbf16>
    %c2_90 = arith.constant 2 : index
    %c0_91 = arith.constant 0 : index
    %c0_92 = arith.constant 0 : index
    %140 = vector.load %arg11[%c2_90, %c0_91, %c0_92] : memref<9x4x4xbf16, #tpu.memory_space<vmem>>, vector<1x4x4xbf16>
    %141 = vector.shape_cast %140 : vector<1x4x4xbf16> to vector<4x4xbf16>
    %cst_93 = arith.constant dense<0.000000e+00> : vector<256x4xf32>
    %142 = tpu.matmul %139, %141, %cst_93 {dimension_numbers = #tpu.dot_dimension_numbers<[1], [0], [0], [1], [0, 0, 1, 1], [], []>} : vector<256x4xbf16>, vector<4x4xbf16>, vector<256x4xf32> -> vector<256x4xf32>
    %143 = arith.addf %137, %142 : vector<256x4xf32>
    %144 = vector.extract_strided_slice %124 {offsets = [1, 0, 0], sizes = [16, 16, 4], strides = [1, 1, 1]} : vector<18x18x4xbf16> to vector<16x16x4xbf16>
    %145 = vector.shape_cast %144 : vector<16x16x4xbf16> to vector<256x4xbf16>
    %c3_94 = arith.constant 3 : index
    %c0_95 = arith.constant 0 : index
    %c0_96 = arith.constant 0 : index
    %146 = vector.load %arg11[%c3_94, %c0_95, %c0_96] : memref<9x4x4xbf16, #tpu.memory_space<vmem>>, vector<1x4x4xbf16>
    %147 = vector.shape_cast %146 : vector<1x4x4xbf16> to vector<4x4xbf16>
    %cst_97 = arith.constant dense<0.000000e+00> : vector<256x4xf32>
    %148 = tpu.matmul %145, %147, %cst_97 {dimension_numbers = #tpu.dot_dimension_numbers<[1], [0], [0], [1], [0, 0, 1, 1], [], []>} : vector<256x4xbf16>, vector<4x4xbf16>, vector<256x4xf32> -> vector<256x4xf32>
    %149 = arith.addf %143, %148 : vector<256x4xf32>
    %150 = vector.extract_strided_slice %124 {offsets = [1, 1, 0], sizes = [16, 16, 4], strides = [1, 1, 1]} : vector<18x18x4xbf16> to vector<16x16x4xbf16>
    %151 = vector.shape_cast %150 : vector<16x16x4xbf16> to vector<256x4xbf16>
    %c4_98 = arith.constant 4 : index
    %c0_99 = arith.constant 0 : index
    %c0_100 = arith.constant 0 : index
    %152 = vector.load %arg11[%c4_98, %c0_99, %c0_100] : memref<9x4x4xbf16, #tpu.memory_space<vmem>>, vector<1x4x4xbf16>
    %153 = vector.shape_cast %152 : vector<1x4x4xbf16> to vector<4x4xbf16>
    %cst_101 = arith.constant dense<0.000000e+00> : vector<256x4xf32>
    %154 = tpu.matmul %151, %153, %cst_101 {dimension_numbers = #tpu.dot_dimension_numbers<[1], [0], [0], [1], [0, 0, 1, 1], [], []>} : vector<256x4xbf16>, vector<4x4xbf16>, vector<256x4xf32> -> vector<256x4xf32>
    %155 = arith.addf %149, %154 : vector<256x4xf32>
    %156 = vector.extract_strided_slice %124 {offsets = [1, 2, 0], sizes = [16, 16, 4], strides = [1, 1, 1]} : vector<18x18x4xbf16> to vector<16x16x4xbf16>
    %157 = vector.shape_cast %156 : vector<16x16x4xbf16> to vector<256x4xbf16>
    %c5_102 = arith.constant 5 : index
    %c0_103 = arith.constant 0 : index
    %c0_104 = arith.constant 0 : index
    %158 = vector.load %arg11[%c5_102, %c0_103, %c0_104] : memref<9x4x4xbf16, #tpu.memory_space<vmem>>, vector<1x4x4xbf16>
    %159 = vector.shape_cast %158 : vector<1x4x4xbf16> to vector<4x4xbf16>
    %cst_105 = arith.constant dense<0.000000e+00> : vector<256x4xf32>
    %160 = tpu.matmul %157, %159, %cst_105 {dimension_numbers = #tpu.dot_dimension_numbers<[1], [0], [0], [1], [0, 0, 1, 1], [], []>} : vector<256x4xbf16>, vector<4x4xbf16>, vector<256x4xf32> -> vector<256x4xf32>
    %161 = arith.addf %155, %160 : vector<256x4xf32>
    %162 = vector.extract_strided_slice %124 {offsets = [2, 0, 0], sizes = [16, 16, 4], strides = [1, 1, 1]} : vector<18x18x4xbf16> to vector<16x16x4xbf16>
    %163 = vector.shape_cast %162 : vector<16x16x4xbf16> to vector<256x4xbf16>
    %c6_106 = arith.constant 6 : index
    %c0_107 = arith.constant 0 : index
    %c0_108 = arith.constant 0 : index
    %164 = vector.load %arg11[%c6_106, %c0_107, %c0_108] : memref<9x4x4xbf16, #tpu.memory_space<vmem>>, vector<1x4x4xbf16>
    %165 = vector.shape_cast %164 : vector<1x4x4xbf16> to vector<4x4xbf16>
    %cst_109 = arith.constant dense<0.000000e+00> : vector<256x4xf32>
    %166 = tpu.matmul %163, %165, %cst_109 {dimension_numbers = #tpu.dot_dimension_numbers<[1], [0], [0], [1], [0, 0, 1, 1], [], []>} : vector<256x4xbf16>, vector<4x4xbf16>, vector<256x4xf32> -> vector<256x4xf32>
    %167 = arith.addf %161, %166 : vector<256x4xf32>
    %168 = vector.extract_strided_slice %124 {offsets = [2, 1, 0], sizes = [16, 16, 4], strides = [1, 1, 1]} : vector<18x18x4xbf16> to vector<16x16x4xbf16>
    %169 = vector.shape_cast %168 : vector<16x16x4xbf16> to vector<256x4xbf16>
    %c7_110 = arith.constant 7 : index
    %c0_111 = arith.constant 0 : index
    %c0_112 = arith.constant 0 : index
    %170 = vector.load %arg11[%c7_110, %c0_111, %c0_112] : memref<9x4x4xbf16, #tpu.memory_space<vmem>>, vector<1x4x4xbf16>
    %171 = vector.shape_cast %170 : vector<1x4x4xbf16> to vector<4x4xbf16>
    %cst_113 = arith.constant dense<0.000000e+00> : vector<256x4xf32>
    %172 = tpu.matmul %169, %171, %cst_113 {dimension_numbers = #tpu.dot_dimension_numbers<[1], [0], [0], [1], [0, 0, 1, 1], [], []>} : vector<256x4xbf16>, vector<4x4xbf16>, vector<256x4xf32> -> vector<256x4xf32>
    %173 = arith.addf %167, %172 : vector<256x4xf32>
    %174 = vector.extract_strided_slice %124 {offsets = [2, 2, 0], sizes = [16, 16, 4], strides = [1, 1, 1]} : vector<18x18x4xbf16> to vector<16x16x4xbf16>
    %175 = vector.shape_cast %174 : vector<16x16x4xbf16> to vector<256x4xbf16>
    %c8_114 = arith.constant 8 : index
    %c0_115 = arith.constant 0 : index
    %c0_116 = arith.constant 0 : index
    %176 = vector.load %arg11[%c8_114, %c0_115, %c0_116] : memref<9x4x4xbf16, #tpu.memory_space<vmem>>, vector<1x4x4xbf16>
    %177 = vector.shape_cast %176 : vector<1x4x4xbf16> to vector<4x4xbf16>
    %cst_117 = arith.constant dense<0.000000e+00> : vector<256x4xf32>
    %178 = tpu.matmul %175, %177, %cst_117 {dimension_numbers = #tpu.dot_dimension_numbers<[1], [0], [0], [1], [0, 0, 1, 1], [], []>} : vector<256x4xbf16>, vector<4x4xbf16>, vector<256x4xf32> -> vector<256x4xf32>
    %179 = arith.addf %173, %178 : vector<256x4xf32>
    %c0_118 = arith.constant 0 : index
    %c0_119 = arith.constant 0 : index
    %180 = vector.load %arg12[%c0_118, %c0_119] : memref<1x4xf32, #tpu.memory_space<vmem>>, vector<1x4xf32>
    %181 = vector.broadcast %180 : vector<1x4xf32> to vector<256x4xf32>
    %182 = arith.mulf %179, %181 : vector<256x4xf32>
    %c0_120 = arith.constant 0 : index
    %c0_121 = arith.constant 0 : index
    %183 = vector.load %arg13[%c0_120, %c0_121] : memref<1x4xf32, #tpu.memory_space<vmem>>, vector<1x4xf32>
    %184 = vector.broadcast %183 : vector<1x4xf32> to vector<256x4xf32>
    %185 = arith.addf %182, %184 : vector<256x4xf32>
    %186 = vector.shape_cast %1 : vector<16x16x4xf32> to vector<256x4xf32>
    %187 = arith.addf %185, %186 : vector<256x4xf32>
    %cst_122 = arith.constant 0.000000e+00 : f32
    %188 = vector.broadcast %cst_122 : f32 to vector<256x4xf32>
    %189 = arith.maximumf %187, %188 : vector<256x4xf32>
    %c0_123 = arith.constant 0 : index
    %c0_124 = arith.constant 0 : index
    %c0_125 = arith.constant 0 : index
    %190 = vector.load %arg14[%c0_123, %c0_124, %c0_125] : memref<1x256x4xf32, #tpu.memory_space<vmem>>, vector<1x256x4xf32>
    %191 = vector.shape_cast %190 : vector<1x256x4xf32> to vector<256x4xf32>
    %192 = vector.shape_cast %189 : vector<256x4xf32> to vector<1x256x4xf32>
    tpu.vector_store %arg14[%c0_123, %c0_124, %c0_125], %192 {strides = array<i32>} : memref<1x256x4xf32, #tpu.memory_space<vmem>>, vector<1x256x4xf32>,
    return
  }
  func.func @transform_0(%arg0: i32) -> (i32, i32, i32, i32) {
    %c0_i32 = arith.constant 0 : i32
    %c0_i32_0 = arith.constant 0 : i32
    %c0_i32_1 = arith.constant 0 : i32
    %c0_i32_2 = arith.constant 0 : i32
    return %arg0, %c0_i32, %c0_i32_0, %c0_i32_1 : i32, i32, i32, i32
  }
  func.func @transform_1(%arg0: i32) -> (i32, i32) {
    %c0_i32 = arith.constant 0 : i32
    %c0_i32_0 = arith.constant 0 : i32
    %c0_i32_1 = arith.constant 0 : i32
    return %c0_i32, %c0_i32_0 : i32, i32
  }
  func.func @transform_2(%arg0: i32) -> (i32, i32) {
    %c0_i32 = arith.constant 0 : i32
    %c0_i32_0 = arith.constant 0 : i32
    %c0_i32_1 = arith.constant 0 : i32
    return %c0_i32, %c0_i32_0 : i32, i32
  }
  func.func @transform_3(%arg0: i32) -> (i32, i32) {
    %c0_i32 = arith.constant 0 : i32
    %c0_i32_0 = arith.constant 0 : i32
    %c0_i32_1 = arith.constant 0 : i32
    return %c0_i32, %c0_i32_0 : i32, i32
  }
  func.func @transform_4(%arg0: i32) -> (i32, i32) {
    %c0_i32 = arith.constant 0 : i32
    %c0_i32_0 = arith.constant 0 : i32
    %c0_i32_1 = arith.constant 0 : i32
    return %c0_i32, %c0_i32_0 : i32, i32
  }
  func.func @transform_5(%arg0: i32) -> (i32, i32) {
    %c0_i32 = arith.constant 0 : i32
    %c0_i32_0 = arith.constant 0 : i32
    %c0_i32_1 = arith.constant 0 : i32
    return %c0_i32, %c0_i32_0 : i32, i32
  }
  func.func @transform_6(%arg0: i32) -> (i32, i32) {
    %c0_i32 = arith.constant 0 : i32
    %c0_i32_0 = arith.constant 0 : i32
    %c0_i32_1 = arith.constant 0 : i32
    return %c0_i32, %c0_i32_0 : i32, i32
  }
  func.func @transform_7(%arg0: i32) -> (i32, i32, i32) {
    %c0_i32 = arith.constant 0 : i32
    %c0_i32_0 = arith.constant 0 : i32
    %c0_i32_1 = arith.constant 0 : i32
    %c0_i32_2 = arith.constant 0 : i32
    return %c0_i32, %c0_i32_0, %c0_i32_1 : i32, i32, i32
  }
  func.func @transform_8(%arg0: i32) -> (i32, i32) {
    %c0_i32 = arith.constant 0 : i32
    %c0_i32_0 = arith.constant 0 : i32
    %c0_i32_1 = arith.constant 0 : i32
    return %c0_i32, %c0_i32_0 : i32, i32
  }
  func.func @transform_9(%arg0: i32) -> (i32, i32) {
    %c0_i32 = arith.constant 0 : i32
    %c0_i32_0 = arith.constant 0 : i32
    %c0_i32_1 = arith.constant 0 : i32
    return %c0_i32, %c0_i32_0 : i32, i32
  }
  func.func @transform_10(%arg0: i32) -> (i32, i32, i32) {
    %c0_i32 = arith.constant 0 : i32
    %c0_i32_0 = arith.constant 0 : i32
    %c0_i32_1 = arith.constant 0 : i32
    %c0_i32_2 = arith.constant 0 : i32
    return %c0_i32, %c0_i32_0, %c0_i32_1 : i32, i32, i32
  }
  func.func @transform_11(%arg0: i32) -> (i32, i32) {
    %c0_i32 = arith.constant 0 : i32
    %c0_i32_0 = arith.constant 0 : i32
    %c0_i32_1 = arith.constant 0 : i32
    return %c0_i32, %c0_i32_0 : i32, i32
  }
  func.func @transform_12(%arg0: i32) -> (i32, i32) {
    %c0_i32 = arith.constant 0 : i32
    %c0_i32_0 = arith.constant 0 : i32
    %c0_i32_1 = arith.constant 0 : i32
    return %c0_i32, %c0_i32_0 : i32, i32
  }
  func.func @transform_13(%arg0: i32) -> (i32, i32, i32) {
    %c0_i32 = arith.constant 0 : i32
    %c0_i32_0 = arith.constant 0 : i32
    %c0_i32_1 = arith.constant 0 : i32
    return %arg0, %c0_i32, %c0_i32_0 : i32, i32, i32
  }
}

</mosaic_0001>

<bundles_post_ra>
// kernel: basic_block_forward.1
= control target key start
LH: loop header
LB: loop body
LE: loop exit
PB: predicated region body
PF: predicated region fallthrough
CT: control target
= control target key end

     0   :  { %s7758_s25 = smov 0   ;;  %s11226_s0 = inlined_call_operand.vmem [shape: f32[2,16,16,4], index: 0, kind: input, shape index: {}]   ;;  %s11227_s1 = inlined_call_operand.vmem [shape: f32[4,8], index: 1, kind: input, shape index: {}]   ;;  %s11228_s2 = inlined_call_operand.vmem [shape: f32[1,8], index: 2, kind: input, shape index: {}]   ;;  %s11229_s3 = inlined_call_operand.vmem [shape: f32[8,4], index: 3, kind: input, shape index: {}]   ;;  %s11230_s4 = inlined_call_operand.vmem [shape: f32[1,4], index: 4, kind: input, shape index: {}]   ;;  %s11231_s5 = inlined_call_operand.vmem [shape: f32[8,4], index: 5, kind: input, shape index: {}]   ;;  %s11232_s6 = inlined_call_operand.vmem [shape: f32[1,4], index: 6, kind: input, shape index: {}]   ;;  %s11233_s7 = inlined_call_operand.vmem [shape: bf16[9,4,4], index: 7, kind: input, shape index: {}]   ;;  %s11234_s8 = inlined_call_operand.vmem [shape: f32[1,4], index: 8, kind: input, shape index: {}]   ;;  %s11235_s9 = inlined_call_operand.vmem [shape: f32[1,4], index: 9, kind: input, shape index: {}]   ;;  %s11236_s10 = inlined_call_operand.vmem [shape: bf16[9,4,4], index: 10, kind: input, shape index: {}]   ;;  %s11237_s11 = inlined_call_operand.vmem [shape: f32[1,4], index: 11, kind: input, shape index: {}]   ;;  %s11238_s12 = inlined_call_operand.vmem [shape: f32[1,4], index: 12, kind: input, shape index: {}]   ;;  %s11239_s13 = inlined_call_operand.vmem [shape: f32[2,256,4], index: 13, kind: output, shape index: {}]  }
   0x1 LB: > { %s6310_s26 = sadd.s32 4294967295, %s7684_s25   ;;  %p6314_p0 = scmp.ge.s32.totalorder %s7684_s25, 1  ;;  %s7684_s25 = sphi %s7758_s25, %s23_s25  }
   0x2   : > { %p387_p1 = scmp.lt.s32.totalorder %s7684_s25, 3 }
   0x4   : > { %p388_p2 = pnand %p6314_p0, %p387_p1 }
   0x6   : > { %391 = sbr.rel (%p388_p2) target bundleno = 1545 (0x609), region = 72 }
   0xb   : > { %v705_v0 = vld [vmem:[%s11227_s1] sm:$0xf]  ;;  %vm723_vm0 = vcmask 1043456   ;;  %p431_p3 = scmp.lt.s32.totalorder %s6310_s26, 1  ;;  %vm474_vm1 = vcmask 31744   ;;  %vm684_vm2 = vcmask 1041409  }
   0xc   : > { %6964 = vmatprep.subr.msk.mxu0 %vm723_vm0, %v705_v0  ;;  %vm686_vm3 = vcmask 1042434   ;;  %vm688_vm4 = vcmask 1043459   ;;  %vm690_vm5 = vcmask 1044484   ;;  %vm692_vm6 = vcmask 1045509  }
   0xd   : > { %6965 = vmatpush3.msk.msra.mxu0 %vm723_vm0, %v705_v0  ;;  %s11539_s26 = smov (!%p431_p3, %s6310_s26), 1  ;;  %vm694_vm7 = vcmask 1046534   ;;  %vm696_vm8 = vcmask 1047559   ;;  %vm840_vm9 = vcmask 64512   ;;  %vm1701_vm10 = vcmask 1041408  }
   0xe   : > { %s6645_s29 = sshll.u32 %s11539_s26, 8  ;;  %vm1281_vm11 = vcmask 25600   ;;  %vm1458_vm12 = vsmask.f32 7424  ;;  %vm2094_vm13 = vcmask 1046528  }
   0xf   : > { %s7777_s15 = scalar_lea.vmem %s11226_s0, %s6645_s29  ;;  %s10958_s20 = scalar_lea.vmem %s11239_s13, %s6645_s29 }
  0x10   : > { %v7780_v1 = vld [vmem:[%s7777_s15] sm:$0xff]  ;;  %v7783_v2 = vld [vmem:[%s7777_s15 + $0x8] sm:$0xff]  ;;  %v7786_v3 = vld [vmem:[%s7777_s15 + $0x10] sm:$0xff] }
  0x11   : > { %v7789_v4 = vld [vmem:[%s7777_s15 + $0x18] sm:$0xff]  ;;  %v7792_v5 = vld [vmem:[%s7777_s15 + $0x20] sm:$0xff]  ;;  %v7795_v6 = vld [vmem:[%s7777_s15 + $0x28] sm:$0xff]  ;;  %v7799_v7 = vsel %vm474_vm1, %v7780_v1, 0.0  ;;  %v7803_v8 = vsel %vm474_vm1, %v7783_v2, 0.0  ;;  %v7807_v9 = vsel %vm474_vm1, %v7786_v3, 0.0 }
  0x12   : > { %v7810_v10 = vld [vmem:[%s7777_s15 + $0x30] sm:$0xff]  ;;  %v7813_v11 = vld [vmem:[%s7777_s15 + $0x38] sm:$0xff]  ;;  %v7816_v12 = vld [vmem:[%s7777_s15 + $0x40] sm:$0xff]  ;;  %v477_v13 = vadd.f32 %v7803_v8, %v7799_v7  ;;  %v7822_v14 = vsel %vm474_vm1, %v7789_v4, 0.0  ;;  %v7826_v15 = vsel %vm474_vm1, %v7792_v5, 0.0  ;;  %v7830_v16 = vsel %vm474_vm1, %v7795_v6, 0.0 }
  0x13   : > { %v7833_v17 = vld [vmem:[%s7777_s15 + $0x48] sm:$0xff]  ;;  %v7836_v18 = vld [vmem:[%s7777_s15 + $0x50] sm:$0xff]  ;;  %v7839_v19 = vld [vmem:[%s7777_s15 + $0x58] sm:$0xff]  ;;  %v486_v20 = vadd.f32 %v7822_v14, %v7807_v9  ;;  %v495_v21 = vadd.f32 %v7830_v16, %v7826_v15  ;;  %v7847_v22 = vsel %vm474_vm1, %v7810_v10, 0.0  ;;  %v7851_v23 = vsel %vm474_vm1, %v7813_v11, 0.0 }
  0x14   : > { %v7854_v24 = vld [vmem:[%s7777_s15 + $0x60] sm:$0xff]  ;;  %v478_v25 = vrot.slane %v477_v13, 4  ;;  %v504_v26 = vadd.f32 %v7851_v23, %v7847_v22  ;;  %v7860_v27 = vsel %vm474_vm1, %v7816_v12, 0.0  ;;  %v7864_v28 = vsel %vm474_vm1, %v7833_v17, 0.0  ;;  %v7867_v29 = vld [vmem:[%s7777_s15 + $0x68] sm:$0xff]  ;;  %v7870_v30 = vld [vmem:[%s7777_s15 + $0x70] sm:$0xff] }
  0x15   : > { %v487_v31 = vrot.slane %v486_v20, 4  ;;  %v496_v32 = vrot.slane %v495_v21, 4  ;;  %v513_v33 = vadd.f32 %v7864_v28, %v7860_v27  ;;  %v7876_v34 = vsel %vm474_vm1, %v7836_v18, 0.0  ;;  %v7887_v39 = vld [vmem:[%s7777_s15 + $0x78] sm:$0xff]  ;;  %v7908_v0 = vld [vmem:[%s7777_s15 + $0x80] sm:$0xff] }
  0x16   : > { %v479_v35 = vadd.f32 %v478_v25, %v477_v13  ;;  %v505_v36 = vrot.slane %v504_v26, 4  ;;  %v7880_v37 = vsel %vm474_vm1, %v7839_v19, 0.0  ;;  %v7884_v38 = vsel %vm474_vm1, %v7854_v24, 0.0 }
  0x17   : > { %v488_v40 = vadd.f32 %v487_v31, %v486_v20  ;;  %v497_v41 = vadd.f32 %v496_v32, %v495_v21  ;;  %v514_v42 = vrot.slane %v513_v33, 4  ;;  %v522_v43 = vadd.f32 %v7880_v37, %v7876_v34  ;;  %v7914_v31 = vld [vmem:[%s7777_s15 + $0x90] sm:$0xff] }
  0x18   : > { %v480_v44 = vrot.slane %v479_v35, 2  ;;  %v506_v45 = vadd.f32 %v505_v36, %v504_v26  ;;  %v7893_v46 = vsel %vm474_vm1, %v7867_v29, 0.0  ;;  %v7897_v47 = vsel %vm474_vm1, %v7870_v30, 0.0  ;;  %v7911_v26 = vld [vmem:[%s7777_s15 + $0x88] sm:$0xff]  ;;  %11248 = vst [vmem:[#allocation4_spill] sm:$0xff] %v7914_v31 }
  0x19   : > { %v489_v48 = vrot.slane %v488_v40, 2  ;;  %v498_v49 = vrot.slane %v497_v41, 2  ;;  %v515_v50 = vadd.f32 %v514_v42, %v513_v33  ;;  %v523_v51 = vrot.slane %v522_v43, 4 }
  0x1a   : > { %v481_v52 = vadd.f32 %v480_v44, %v479_v35  ;;  %v507_v53 = vrot.slane %v506_v45, 2  ;;  %v531_v54 = vadd.f32 %v7893_v46, %v7884_v38  ;;  %v7903_v55 = vsel %vm474_vm1, %v7887_v39, 0.0 }
  0x1b   : > { %v490_v56 = vadd.f32 %v489_v48, %v488_v40  ;;  %v499_v57 = vadd.f32 %v498_v49, %v497_v41  ;;  %v516_v58 = vrot.slane %v515_v50, 2  ;;  %v524_v59 = vadd.f32 %v523_v51, %v522_v43  ;;  %v7917_v40 = vld [vmem:[%s7777_s15 + $0x98] sm:$0xff] }
  0x1c   : > { %v482_v60 = vrot.slane %v481_v52, 1  ;;  %v508_v61 = vadd.f32 %v507_v53, %v506_v45  ;;  %v532_v62 = vrot.slane %v531_v54, 4  ;;  %v540_v63 = vadd.f32 %v7903_v55, %v7897_v47  ;;  %11249 = vst [vmem:[#allocation5_spill] sm:$0xff] %v7917_v40 }
  0x1d   : > { %v491_v13 = vrot.slane %v490_v56, 1  ;;  %v500_v20 = vrot.slane %v499_v57, 1  ;;  %v517_v21 = vadd.f32 %v516_v58, %v515_v50  ;;  %v525_v25 = vrot.slane %v524_v59, 2 }
  0x1e   : > { %v483_v32 = vadd.f32 %v482_v60, %v481_v52  ;;  %v509_v33 = vrot.slane %v508_v61, 1  ;;  %v533_v35 = vadd.f32 %v532_v62, %v531_v54  ;;  %v541_v36 = vrot.slane %v540_v63, 4 }
  0x1f   : > { %v492_v41 = vadd.f32 %v491_v13, %v490_v56  ;;  %v501_v42 = vadd.f32 %v500_v20, %v499_v57  ;;  %v518_v43 = vrot.slane %v517_v21, 1  ;;  %v526_v44 = vadd.f32 %v525_v25, %v524_v59 }
  0x20   : > { %v510_v45 = vadd.f32 %v509_v33, %v508_v61  ;;  %v534_v48 = vrot.slane %v533_v35, 2  ;;  %v542_v49 = vadd.f32 %v541_v36, %v540_v63  ;;  %v7921_v50 = vsel %vm474_vm1, %v7908_v0, 0.0  ;;  %v7940_v33 = vld [vmem:[%s7777_s15 + $0xa0] sm:$0xff] }
  0x21   : > { %v519_v51 = vadd.f32 %v518_v43, %v517_v21  ;;  %v527_v52 = vrot.slane %v526_v44, 1  ;;  %v7925_v53 = vsel %vm474_vm1, %v7911_v26, 0.0  ;;  %v7929_v54 = vsel %vm474_vm1, %v7914_v31, 0.0  ;;  %v7945_v31 = vld [vmem:[%s7777_s15 + $0xa8] sm:$0xff] }
  0x22   : > { %v535_v56 = vadd.f32 %v534_v48, %v533_v35  ;;  %v543_v57 = vrot.slane %v542_v49, 2  ;;  %v549_v58 = vadd.f32 %v7925_v53, %v7921_v50  ;;  %v7935_v59 = vsel %vm474_vm1, %v7917_v40, 0.0 }
  0x23   : > { %v528_v60 = vadd.f32 %v527_v52, %v526_v44  ;;  %v558_v61 = vadd.f32 %v7935_v59, %v7929_v54  ;;  %v620_v62 = vmul.f32 0.0625, %v483_v32  ;;  %v621_v63 = vmul.f32 0.0625, %v492_v41 }
  0x24   : > { %v536_v13 = vrot.slane %v535_v56, 1  ;;  %v544_v20 = vadd.f32 %v543_v57, %v542_v49  ;;  %v550_v21 = vrot.slane %v549_v58, 4  ;;  %v622_v25 = vmul.f32 0.0625, %v501_v42 }
  0x25   : > { %v559_v35 = vrot.slane %v558_v61, 4  ;;  %v623_v36 = vmul.f32 0.0625, %v510_v45  ;;  %v624_v43 = vmul.f32 0.0625, %v519_v51  ;;  %v625_v48 = vmul.f32 0.0625, %v528_v60 }
  0x26   : > { %v537_v40 = vadd.f32 %v536_v13, %v535_v56  ;;  %v545_v44 = vrot.slane %v544_v20, 1  ;;  %v551_v52 = vadd.f32 %v550_v21, %v549_v58  ;;  %v636_v32 = vadd.f32 %v7807_v9, %v7799_v7 }
  0x27   : > { %v560_v41 = vadd.f32 %v559_v35, %v558_v61  ;;  %v651_v49 = vadd.f32 %v7822_v14, %v7803_v8  ;;  %v685_v42 = vsel %vm684_vm2, %v621_v63, %v620_v62  ;;  %v7952_v45 = vsel %vm474_vm1, %v7940_v33, 0.0  ;;  %v7958_v61 = vld [vmem:[%s7777_s15 + $0xb0] sm:$0xff] }
  0x28   : > { %v546_v51 = vadd.f32 %v545_v44, %v544_v20  ;;  %v552_v56 = vrot.slane %v551_v52, 2  ;;  %v626_v57 = vmul.f32 0.0625, %v537_v40  ;;  %v637_v58 = vadd.f32 %v636_v32, %v7826_v15  ;;  %11250 = vst [vmem:[#allocation6_spill] sm:$0xff] %v7958_v61  ;;  %v7969_v20 = vld [vmem:[%s7777_s15 + $0xb8] sm:$0xff]  ;;  %v468_v32 = vld [vmem:[%s7777_s15 + $0xd0] sm:$0xff] }
  0x29   : > { %v561_v60 = vrot.slane %v560_v41, 2  ;;  %v652_v7 = vadd.f32 %v651_v49, %v7830_v16  ;;  %v687_v9 = vsel %vm686_vm3, %v622_v25, %v685_v42  ;;  %v7962_v8 = vsel %vm474_vm1, %v7945_v31, 0.0  ;;  %11251 = vst [vmem:[#allocation7_spill] sm:$0xff] %v7969_v20 }
  0x2a   : > { %v553_v14 = vadd.f32 %v552_v56, %v551_v52  ;;  %v627_v62 = vmul.f32 0.0625, %v546_v51  ;;  %v638_v40 = vadd.f32 %v637_v58, %v7847_v22  ;;  %v689_v15 = vsel %vm688_vm4, %v623_v36, %v687_v9  ;;  %v467_v52 = vld [vmem:[%s7777_s15 + $0xc8] sm:$0xff] }
  0x2b   : > { %v562_v63 = vadd.f32 %v561_v60, %v560_v41  ;;  %v653_v16 = vadd.f32 %v652_v7, %v7851_v23  ;;  %v691_v13 = vsel %vm690_vm5, %v624_v43, %v689_v15  ;;  %v567_v21 = vadd.f32 %v7962_v8, %v7952_v45  ;;  %v466_v43 = vld [vmem:[%s7777_s15 + $0xc0] sm:$0xff]  ;;  %v471_v58 = vld [vmem:[%s7777_s15 + $0xe8] sm:$0xff]  ;;  %v472_v15 = vld [vmem:[%s7777_s15 + $0xf0] sm:$0xff] }
  0x2c   : > { %v554_v25 = vrot.slane %v553_v14, 1  ;;  %v639_v35 = vadd.f32 %v638_v40, %v7860_v27  ;;  %v693_v44 = vsel %vm692_vm6, %v625_v48, %v691_v13  ;;  %v7977_v22 = vsel %vm474_vm1, %v7958_v61, 0.0 }
  0x2d   : > { %v654_v23 = vadd.f32 %v653_v16, %v7864_v28  ;;  %v695_v36 = vsel %vm694_vm7, %v626_v57, %v693_v44  ;;  %v563_v41 = vrot.slane %v562_v63, 1  ;;  %v568_v49 = vrot.slane %v567_v21, 4  ;;  %v469_v28 = vld [vmem:[%s7777_s15 + $0xd8] sm:$0xff]  ;;  %v470_v57 = vld [vmem:[%s7777_s15 + $0xe0] sm:$0xff] }
  0x2e   : > { %v640_v27 = vadd.f32 %v639_v35, %v7876_v34  ;;  %v697_v42 = vsel %vm696_vm8, %v627_v62, %v695_v36  ;;  %v555_v48 = vadd.f32 %v554_v25, %v553_v14  ;;  %v7988_v51 = vsel %vm474_vm1, %v7969_v20, 0.0 }
  0x2f   : > { %v655_v56 = vadd.f32 %v654_v23, %v7880_v37  ;;  %6966 = vmatprep.mubr.msk.f32.mxu0 %vm474_vm1, %v697_v42  ;;  %v564_v60 = vadd.f32 %v563_v41, %v562_v63  ;;  %v569_v7 = vadd.f32 %v568_v49, %v567_v21  ;;  %v576_v34 = vadd.f32 %v7988_v51, %v7977_v22  ;;  %v473_v23 = vld [vmem:[%s7777_s15 + $0xf8] sm:$0xff] }
  0x30   : > { %v641_v9 = vadd.f32 %v640_v27, %v7884_v38  ;;  %v7999_v14 = vsel %vm474_vm1, %v466_v43, 0.0  ;;  %v584_v62 = vsel %vm474_vm1, %v467_v52, 0.0  ;;  %v8003_v37 = vsel %vm474_vm1, %v468_v32, 0.0 }
  0x31   : > { %v656_v40 = vadd.f32 %v655_v56, %v7893_v46  ;;  %v570_v16 = vrot.slane %v569_v7, 2  ;;  %v577_v63 = vrot.slane %v576_v34, 4  ;;  %v585_v13 = vadd.f32 %v584_v62, %v7999_v14 }
  0x32   : > { %v642_v21 = vadd.f32 %v641_v9, %v7897_v47  ;;  %v593_v25 = vsel %vm474_vm1, %v469_v28, 0.0  ;;  %v8011_v38 = vsel %vm474_vm1, %v470_v57, 0.0  ;;  %v8014_v35 = vsel %vm474_vm1, %v471_v58, 0.0 }
  0x33   : > { %v657_v44 = vadd.f32 %v656_v40, %v7903_v55  ;;  %v571_v36 = vadd.f32 %v570_v16, %v569_v7  ;;  %v578_v46 = vadd.f32 %v577_v63, %v576_v34  ;;  %v586_v43 = vrot.slane %v585_v13, 4 }
  0x34   : > { %v643_v52 = vadd.f32 %v642_v21, %v7921_v50  ;;  %v594_v32 = vadd.f32 %v593_v25, %v8003_v37  ;;  %v603_v47 = vadd.f32 %v8014_v35, %v8011_v38  ;;  %v610_v41 = vsel %vm474_vm1, %v472_v15, 0.0 }
  0x35   : > { %v658_v49 = vadd.f32 %v657_v44, %v7925_v53  ;;  %v572_v27 = vrot.slane %v571_v36, 1  ;;  %v579_v42 = vrot.slane %v578_v46, 2  ;;  %v587_v56 = vadd.f32 %v586_v43, %v585_v13 }
  0x36   : > { %v644_v55 = vadd.f32 %v643_v52, %v7929_v54  ;;  %v595_v28 = vrot.slane %v594_v32, 4  ;;  %v604_v57 = vrot.slane %v603_v47, 4  ;;  %v611_v58 = vsel %vm474_vm1, %v473_v23, 0.0 }
  0x37   : > { %v659_v50 = vadd.f32 %v658_v49, %v7935_v59  ;;  %v573_v7 = vadd.f32 %v572_v27, %v571_v36  ;;  %v580_v34 = vadd.f32 %v579_v42, %v578_v46  ;;  %v588_v9 = vrot.slane %v587_v56, 2 }
  0x38   : > { %v596_v40 = vadd.f32 %v595_v28, %v594_v32  ;;  %v605_v16 = vadd.f32 %v604_v57, %v603_v47  ;;  %v612_v63 = vadd.f32 %v611_v58, %v610_v41  ;;  %v628_v15 = vmul.f32 0.0625, %v555_v48 }
  0x39   : > { %v581_v21 = vrot.slane %v580_v34, 1  ;;  %v589_v53 = vadd.f32 %v588_v9, %v587_v56  ;;  %v629_v44 = vmul.f32 0.0625, %v564_v60  ;;  %v630_v20 = vmul.f32 0.0625, %v573_v7 }
  0x3a   : > { %v597_v13 = vrot.slane %v596_v40, 2  ;;  %v606_v43 = vrot.slane %v605_v16, 2  ;;  %v613_v54 = vrot.slane %v612_v63, 4  ;;  %v645_v52 = vadd.f32 %v644_v55, %v7952_v45 }
  0x3b   : > { %v582_v61 = vadd.f32 %v581_v21, %v580_v34  ;;  %v590_v23 = vrot.slane %v589_v53, 1  ;;  %v698_v59 = vsel %vm684_vm2, %v629_v44, %v628_v15  ;;  %v660_v36 = vadd.f32 %v659_v50, %v7962_v8 }
  0x3c   : > { %v598_v46 = vadd.f32 %v597_v13, %v596_v40  ;;  %v607_v32 = vadd.f32 %v606_v43, %v605_v16  ;;  %v614_v47 = vadd.f32 %v613_v54, %v612_v63  ;;  %v699_v48 = vsel %vm686_vm3, %v630_v20, %v698_v59 }
  0x3d   : > { %v591_v49 = vadd.f32 %v590_v23, %v589_v53  ;;  %v631_v27 = vmul.f32 0.0625, %v582_v61  ;;  %v646_v60 = vadd.f32 %v645_v52, %v7977_v22  ;;  %v661_v42 = vadd.f32 %v660_v36, %v7988_v51 }
  0x3e   : > { %v599_v56 = vrot.slane %v598_v46, 1  ;;  %v608_v28 = vrot.slane %v607_v32, 1  ;;  %v615_v45 = vrot.slane %v614_v47, 2 }
  0x3f   : > { %v632_v55 = vmul.f32 0.0625, %v591_v49  ;;  %v700_v57 = vsel %vm688_vm4, %v631_v27, %v699_v48  ;;  %v647_v7 = vadd.f32 %v646_v60, %v7999_v14  ;;  %v662_v8 = vadd.f32 %v661_v42, %v584_v62 }
  0x40   : > { %v600_v50 = vadd.f32 %v599_v56, %v598_v46  ;;  %v609_v34 = vadd.f32 %v608_v28, %v607_v32  ;;  %v616_v9 = vadd.f32 %v615_v45, %v614_v47 }
  0x41   : > { %v701_v20 = vsel %vm690_vm5, %v632_v55, %v700_v57  ;;  %v648_v61 = vadd.f32 %v647_v7, %v8003_v37  ;;  %v663_v40 = vadd.f32 %v662_v8, %v593_v25  ;;  %v832_v25 = vld [vmem:[%s11229_s3] sm:$0xff] }
  0x42   : > { %v617_v22 = vrot.slane %v616_v9, 1  ;;  %v633_v16 = vmul.f32 0.0625, %v600_v50  ;;  %v634_v51 = vmul.f32 0.0625, %v609_v34  ;;  %6972 = vmatprep.subr.mxu1 %v832_v25 }
  0x43   : > { %v649_v63 = vadd.f32 %v648_v61, %v8011_v38  ;;  %v664_v15 = vadd.f32 %v663_v40, %v8014_v35  ;;  %6973 = vmatpush3.msra.mxu1 %v832_v25  ;;  %v934_v38 = vld [vmem:[%s11231_s5] sm:$0xff] }
  0x44   : > { %v618_v21 = vadd.f32 %v617_v22, %v616_v9  ;;  %v702_v53 = vsel %vm692_vm6, %v633_v16, %v701_v20  ;;  %6977 = vmatprep.subr.mxu1 %v934_v38  ;;  %v6319_v35 = vld [vmem:[%s11228_s2] ss:$0 sm:$0xff] }
  0x45   : > { %v703_v14 = vsel %vm694_vm7, %v634_v51, %v702_v53  ;;  %v650_v62 = vadd.f32 %v649_v63, %v610_v41  ;;  %v665_v44 = vadd.f32 %v664_v15, %v611_v58  ;;  %v1457_v16 = vld [vmem:[%s11233_s7] sm:$0x3]  ;;  %v6335_v51 = vld [vmem:[%s11233_s7 + $0x2] sm:$0x3] }
  0x46   : > { %v635_v13 = vmul.f32 0.0625, %v618_v21  ;;  %v8062_v63 = vsel %vm1701_vm10, %v1457_v16, 0  ;;  %7594 = vmatprep.subr.msk.bf16.mxu0 %vm1701_vm10, %v6335_v51  ;;  %v8066_v15 = vsel %vm1701_vm10, %v6335_v51, 0  ;;  %v7686_v21 = vmov 0.0  }
  0x47   : > { %v666_v43 = vmul.f32 0.0625, %v650_v62  ;;  %v667_v37 = vmul.f32 0.0625, %v665_v44  ;;  %1279 = vst.msk [vmem:[#allocation2] sm:$0xff] %vm474_vm1, %v7686_v21  ;;  %1280 = vst.msk [vmem:[#allocation2 + $0x8] sm:$0xff] %vm474_vm1, %v7686_v21 }
  0x48   : > { %v704_v54 = vsel %vm696_vm8, %v635_v13, %v703_v14  ;;  %1283 = vst.msk [vmem:[#allocation2 + $0x18] sm:$0xff] %vm474_vm1, %v7686_v21  ;;  %1284 = vst.msk [vmem:[#allocation2 + $0x20] sm:$0xff] %vm474_vm1, %v7686_v21 }
  0x49   : > { %6967 = vmatmul.mubr.msk.f32.vlgmr.msra.gmra.mxu0 %vm474_vm1, %v704_v54  ;;  %1286 = vst.msk [vmem:[#allocation2 + $0x30] sm:$0xff] %vm474_vm1, %v7686_v21  ;;  %1287 = vst.msk [vmem:[#allocation2 + $0x38] sm:$0xff] %vm474_vm1, %v7686_v21 }
  0x4a   : > { %6969 = vmatprep.mubr.msk.f32.mxu0 %vm474_vm1, %v666_v43  ;;  %1289 = vst.msk [vmem:[#allocation2 + $0x48] sm:$0xff] %vm474_vm1, %v7686_v21  ;;  %1290 = vst.msk [vmem:[#allocation2 + $0x50] sm:$0xff] %vm474_vm1, %v7686_v21  ;;  %6983 = vmatpush3.bf16.msra.mxu0 %v8066_v15 }
  0x4b   : > { %1292 = vst.msk [vmem:[#allocation2 + $0x60] sm:$0xff] %vm474_vm1, %v7686_v21  ;;  %1293 = vst.msk [vmem:[#allocation2 + $0x68] sm:$0xff] %vm474_vm1, %v7686_v21 }
  0x4c   : > { %1295 = vst.msk [vmem:[#allocation2 + $0x78] sm:$0xff] %vm474_vm1, %v7686_v21  ;;  %1296 = vst.msk [vmem:[#allocation2 + $0x80] sm:$0xff] %vm474_vm1, %v7686_v21 }
  0x4d   : > { %6970 = vmatmul.mubr.msk.f32.gmra.mxu0 %vm474_vm1, %v667_v37  ;;  %1298 = vst.msk [vmem:[#allocation2 + $0x90] sm:$0xff] %vm474_vm1, %v7686_v21  ;;  %1299 = vst.msk [vmem:[#allocation2 + $0x98] sm:$0xff] %vm474_vm1, %v7686_v21  ;;  %v8297_v37 = vld [vmem:[%s11233_s7 + $0x4] sm:$0x3] }
  0x4e   : > { %1301 = vst.msk [vmem:[#allocation2 + $0xa8] sm:$0xff] %vm474_vm1, %v7686_v21  ;;  %1302 = vst.msk [vmem:[#allocation2 + $0xb0] sm:$0xff] %vm474_vm1, %v7686_v21  ;;  %v1367_v53 = vld [vmem:[#allocation2] sm:$0xff]  ;;  %v1368_v14 = vld [vmem:[#allocation2 + $0x8] sm:$0xff]  ;;  %7596 = vmatprep.subr.msk.bf16.mxu0 %vm1701_vm10, %v8297_v37 }
  0x4f   : > { %1304 = vst.msk [vmem:[#allocation2 + $0xc0] sm:$0xff] %vm474_vm1, %v7686_v21  ;;  %1305 = vst.msk [vmem:[#allocation2 + $0xc8] sm:$0xff] %vm474_vm1, %v7686_v21  ;;  %v8286_v62 = vpack.c.bf16 %v1368_v14, %v1367_v53 }
  0x50   : > { %1307 = vst.msk [vmem:[#allocation2 + $0xd8] sm:$0xff] %vm474_vm1, %v7686_v21  ;;  %1308 = vst.msk [vmem:[#allocation2 + $0xe0] sm:$0xff] %vm474_vm1, %v7686_v21 }
  0x51   : > { %1310 = vst.msk [vmem:[#allocation2 + $0xf0] sm:$0xff] %vm474_vm1, %v7686_v21  ;;  %1311 = vst.msk [vmem:[#allocation2 + $0xf8] sm:$0xff] %vm474_vm1, %v7686_v21  ;;  %v1460_v13 = vshrl.u32 %v8286_v62, 16  ;;  %v1462_v43 = vshll.u32 %v8286_v62, 16 }
  0x52   : > { %1313 = vst.msk [vmem:[#allocation2 + $0x108] sm:$0xff] %vm474_vm1, %v7686_v21  ;;  %1314 = vst.msk [vmem:[#allocation2 + $0x110] sm:$0xff] %vm474_vm1, %v7686_v21 }
  0x53   : > { %1316 = vst.msk [vmem:[#allocation2 + $0x120] sm:$0xff] %vm474_vm1, %v7686_v21  ;;  %1317 = vst.msk [vmem:[#allocation2 + $0x128] sm:$0xff] %vm474_vm1, %v7686_v21  ;;  %v1464_v25 = vrot.slane %v1462_v43, 1 }
  0x54   : > { %1319 = vst.msk [vmem:[#allocation2 + $0x138] sm:$0xff] %vm474_vm1, %v7686_v21  ;;  %1320 = vst.msk [vmem:[#allocation2 + $0x140] sm:$0xff] %vm474_vm1, %v7686_v21 }
  0x55   : > { %1322 = vst.msk [vmem:[#allocation2 + $0x150] sm:$0xff] %vm474_vm1, %v7686_v21  ;;  %1323 = vst.msk [vmem:[#allocation2 + $0x158] sm:$0xff] %vm474_vm1, %v7686_v21 }
  0x56   : > { %1325 = vst.msk [vmem:[#allocation2 + $0x168] sm:$0xff] %vm474_vm1, %v7686_v21  ;;  %1326 = vst.msk [vmem:[#allocation2 + $0x170] sm:$0xff] %vm474_vm1, %v7686_v21 }
  0x57   : > { %1328 = vst.msk [vmem:[#allocation2 + $0x180] sm:$0xff] %vm474_vm1, %v7686_v21  ;;  %1329 = vst.msk [vmem:[#allocation2 + $0x188] sm:$0xff] %vm474_vm1, %v7686_v21 }
  0x58   : > { %1331 = vst.msk [vmem:[#allocation2 + $0x198] sm:$0xff] %vm474_vm1, %v7686_v21  ;;  %1332 = vst.msk [vmem:[#allocation2 + $0x1a0] sm:$0xff] %vm474_vm1, %v7686_v21 }
  0x59   : > { %3737 = vst.msk [vmem:[#allocation3] sm:$0xff] %vm474_vm1, %v7686_v21  ;;  %3738 = vst.msk [vmem:[#allocation3 + $0x8] sm:$0xff] %vm474_vm1, %v7686_v21 }
  0x5a   : > { %3740 = vst.msk [vmem:[#allocation3 + $0x18] sm:$0xff] %vm474_vm1, %v7686_v21  ;;  %3741 = vst.msk [vmem:[#allocation3 + $0x20] sm:$0xff] %vm474_vm1, %v7686_v21 }
  0x5b   : > { %3743 = vst.msk [vmem:[#allocation3 + $0x30] sm:$0xff] %vm474_vm1, %v7686_v21  ;;  %3744 = vst.msk [vmem:[#allocation3 + $0x38] sm:$0xff] %vm474_vm1, %v7686_v21 }
  0x5c   : > { %3746 = vst.msk [vmem:[#allocation3 + $0x48] sm:$0xff] %vm474_vm1, %v7686_v21  ;;  %3747 = vst.msk [vmem:[#allocation3 + $0x50] sm:$0xff] %vm474_vm1, %v7686_v21 }
  0x5d   : > { %3749 = vst.msk [vmem:[#allocation3 + $0x60] sm:$0xff] %vm474_vm1, %v7686_v21  ;;  %3750 = vst.msk [vmem:[#allocation3 + $0x68] sm:$0xff] %vm474_vm1, %v7686_v21 }
  0x5e   : > { %3752 = vst.msk [vmem:[#allocation3 + $0x78] sm:$0xff] %vm474_vm1, %v7686_v21  ;;  %3753 = vst.msk [vmem:[#allocation3 + $0x80] sm:$0xff] %vm474_vm1, %v7686_v21 }
  0x5f   : > { %3755 = vst.msk [vmem:[#allocation3 + $0x90] sm:$0xff] %vm474_vm1, %v7686_v21  ;;  %3756 = vst.msk [vmem:[#allocation3 + $0x98] sm:$0xff] %vm474_vm1, %v7686_v21 }
  0x60   : > { %3758 = vst.msk [vmem:[#allocation3 + $0xa8] sm:$0xff] %vm474_vm1, %v7686_v21  ;;  %3759 = vst.msk [vmem:[#allocation3 + $0xb0] sm:$0xff] %vm474_vm1, %v7686_v21 }
  0x61   : > { %3761 = vst.msk [vmem:[#allocation3 + $0xc0] sm:$0xff] %vm474_vm1, %v7686_v21  ;;  %3762 = vst.msk [vmem:[#allocation3 + $0xc8] sm:$0xff] %vm474_vm1, %v7686_v21 }
  0x62   : > { %3764 = vst.msk [vmem:[#allocation3 + $0xd8] sm:$0xff] %vm474_vm1, %v7686_v21  ;;  %3765 = vst.msk [vmem:[#allocation3 + $0xe0] sm:$0xff] %vm474_vm1, %v7686_v21 }
  0x63   : > { %3767 = vst.msk [vmem:[#allocation3 + $0xf0] sm:$0xff] %vm474_vm1, %v7686_v21  ;;  %3768 = vst.msk [vmem:[#allocation3 + $0xf8] sm:$0xff] %vm474_vm1, %v7686_v21 }
  0x64   : > { %3770 = vst.msk [vmem:[#allocation3 + $0x108] sm:$0xff] %vm474_vm1, %v7686_v21  ;;  %3771 = vst.msk [vmem:[#allocation3 + $0x110] sm:$0xff] %vm474_vm1, %v7686_v21 }
  0x65   : > { %3773 = vst.msk [vmem:[#allocation3 + $0x120] sm:$0xff] %vm474_vm1, %v7686_v21  ;;  %3774 = vst.msk [vmem:[#allocation3 + $0x128] sm:$0xff] %vm474_vm1, %v7686_v21 }
  0x66   : > { %3776 = vst.msk [vmem:[#allocation3 + $0x138] sm:$0xff] %vm474_vm1, %v7686_v21  ;;  %3777 = vst.msk [vmem:[#allocation3 + $0x140] sm:$0xff] %vm474_vm1, %v7686_v21 }
  0x67   : > { %3779 = vst.msk [vmem:[#allocation3 + $0x150] sm:$0xff] %vm474_vm1, %v7686_v21  ;;  %3780 = vst.msk [vmem:[#allocation3 + $0x158] sm:$0xff] %vm474_vm1, %v7686_v21 }
  0x68   : > { %3782 = vst.msk [vmem:[#allocation3 + $0x168] sm:$0xff] %vm474_vm1, %v7686_v21  ;;  %3783 = vst.msk [vmem:[#allocation3 + $0x170] sm:$0xff] %vm474_vm1, %v7686_v21 }
  0x69   : > { %3785 = vst.msk [vmem:[#allocation3 + $0x180] sm:$0xff] %vm474_vm1, %v7686_v21  ;;  %3786 = vst.msk [vmem:[#allocation3 + $0x188] sm:$0xff] %vm474_vm1, %v7686_v21 }
  0x6a   : > { %3788 = vst.msk [vmem:[#allocation3 + $0x198] sm:$0xff] %vm474_vm1, %v7686_v21  ;;  %3789 = vst.msk [vmem:[#allocation3 + $0x1a0] sm:$0xff] %vm474_vm1, %v7686_v21 }
  0x6b   : > { %1285 = vst.msk [vmem:[#allocation2 + $0x28] sm:$0x3] %vm1281_vm11, %v7686_v21  ;;  %1282 = vst.msk [vmem:[#allocation2 + $0x10] sm:$0x3] %vm1281_vm11, %v7686_v21 }
  0x6c   : > { %1288 = vst.msk [vmem:[#allocation2 + $0x40] sm:$0x3] %vm1281_vm11, %v7686_v21  ;;  %1291 = vst.msk [vmem:[#allocation2 + $0x58] sm:$0x3] %vm1281_vm11, %v7686_v21 }
  0x6d   : > { %1294 = vst.msk [vmem:[#allocation2 + $0x70] sm:$0x3] %vm1281_vm11, %v7686_v21  ;;  %1297 = vst.msk [vmem:[#allocation2 + $0x88] sm:$0x3] %vm1281_vm11, %v7686_v21 }
  0x6e   : > { %1300 = vst.msk [vmem:[#allocation2 + $0xa0] sm:$0x3] %vm1281_vm11, %v7686_v21  ;;  %1303 = vst.msk [vmem:[#allocation2 + $0xb8] sm:$0x3] %vm1281_vm11, %v7686_v21 }
  0x6f   : > { %1306 = vst.msk [vmem:[#allocation2 + $0xd0] sm:$0x3] %vm1281_vm11, %v7686_v21  ;;  %1309 = vst.msk [vmem:[#allocation2 + $0xe8] sm:$0x3] %vm1281_vm11, %v7686_v21 }
  0x70   : > { %1312 = vst.msk [vmem:[#allocation2 + $0x100] sm:$0x3] %vm1281_vm11, %v7686_v21  ;;  %1315 = vst.msk [vmem:[#allocation2 + $0x118] sm:$0x3] %vm1281_vm11, %v7686_v21 }
  0x71   : > { %1318 = vst.msk [vmem:[#allocation2 + $0x130] sm:$0x3] %vm1281_vm11, %v7686_v21  ;;  %1321 = vst.msk [vmem:[#allocation2 + $0x148] sm:$0x3] %vm1281_vm11, %v7686_v21 }
  0x72   : > { %1324 = vst.msk [vmem:[#allocation2 + $0x160] sm:$0x3] %vm1281_vm11, %v7686_v21  ;;  %1327 = vst.msk [vmem:[#allocation2 + $0x178] sm:$0x3] %vm1281_vm11, %v7686_v21  ;;  %v1369_v44 = vld [vmem:[#allocation2 + $0x10] sm:$0x3] }
  0x73   : > { %1330 = vst.msk [vmem:[#allocation2 + $0x190] sm:$0x3] %vm1281_vm11, %v7686_v21  ;;  %1333 = vst.msk [vmem:[#allocation2 + $0x1a8] sm:$0x3] %vm1281_vm11, %v7686_v21  ;;  %v8292_v54 = vpack.c.bf16 %v1369_v44, %v1369_v44 }
  0x74   : > { %3739 = vst.msk [vmem:[#allocation3 + $0x10] sm:$0x3] %vm1281_vm11, %v7686_v21  ;;  %3742 = vst.msk [vmem:[#allocation3 + $0x28] sm:$0x3] %vm1281_vm11, %v7686_v21 }
  0x75   : > { %3745 = vst.msk [vmem:[#allocation3 + $0x40] sm:$0x3] %vm1281_vm11, %v7686_v21  ;;  %3748 = vst.msk [vmem:[#allocation3 + $0x58] sm:$0x3] %vm1281_vm11, %v7686_v21 }
  0x76   : > { %3751 = vst.msk [vmem:[#allocation3 + $0x70] sm:$0x3] %vm1281_vm11, %v7686_v21  ;;  %3754 = vst.msk [vmem:[#allocation3 + $0x88] sm:$0x3] %vm1281_vm11, %v7686_v21 }
  0x77   : > { %3757 = vst.msk [vmem:[#allocation3 + $0xa0] sm:$0x3] %vm1281_vm11, %v7686_v21  ;;  %3760 = vst.msk [vmem:[#allocation3 + $0xb8] sm:$0x3] %vm1281_vm11, %v7686_v21 }
  0x78   : > { %3763 = vst.msk [vmem:[#allocation3 + $0xd0] sm:$0x3] %vm1281_vm11, %v7686_v21  ;;  %3766 = vst.msk [vmem:[#allocation3 + $0xe8] sm:$0x3] %vm1281_vm11, %v7686_v21 }
  0x79   : > { %3769 = vst.msk [vmem:[#allocation3 + $0x100] sm:$0x3] %vm1281_vm11, %v7686_v21  ;;  %3772 = vst.msk [vmem:[#allocation3 + $0x118] sm:$0x3] %vm1281_vm11, %v7686_v21 }
  0x7a   : > { %3775 = vst.msk [vmem:[#allocation3 + $0x130] sm:$0x3] %vm1281_vm11, %v7686_v21  ;;  %3778 = vst.msk [vmem:[#allocation3 + $0x148] sm:$0x3] %vm1281_vm11, %v7686_v21 }
  0x7b   : > { %3781 = vst.msk [vmem:[#allocation3 + $0x160] sm:$0x3] %vm1281_vm11, %v7686_v21  ;;  %3784 = vst.msk [vmem:[#allocation3 + $0x178] sm:$0x3] %vm1281_vm11, %v7686_v21 }
  0x7c   : > { %3787 = vst.msk [vmem:[#allocation3 + $0x190] sm:$0x3] %vm1281_vm11, %v7686_v21  ;;  %3790 = vst.msk [vmem:[#allocation3 + $0x1a8] sm:$0x3] %vm1281_vm11, %v7686_v21 }
 0x109   : > { %v6968_v41 = vpop.f32.mrf.mxu0 }
 0x10a   : > { %v799_v58 = vadd.f32 %v6968_v41, %v6319_v35 }
 0x10b   : > { %v793_v52 = vpop.f32.mrf.mxu0 }
 0x10c   : > { %v813_v23 = vadd.f32 3.0, %v799_v58  ;;  %v794_v59 = vadd.f32 %v6319_v35, %v793_v52  ;;  %v8307_v52 = vld [vmem:[%s11233_s7 + $0x6] sm:$0x3] }
 0x10d   : > { %v6971_v36 = vpop.f32.mrf.mxu0 }
 0x10e   : > { %v817_v46 = vmax.f32 %v813_v23, 0.0  ;;  %v812_v32 = vadd.f32 3.0, %v794_v59  ;;  %v809_v47 = vadd.f32 %v6971_v36, %v6319_v35  ;;  %v6325_v23 = vld [vmem:[%s11230_s4] ss:$0 sm:$0xff] }
 0x10f   : > { %v803_v48 = vpop.f32.mrf.mxu0 }
 0x110   : > { %v821_v49 = vmin.f32 %v817_v46, 6.0  ;;  %v816_v27 = vmax.f32 %v812_v32, 0.0  ;;  %v815_v60 = vadd.f32 3.0, %v809_v47  ;;  %v804_v42 = vadd.f32 %v6319_v35, %v803_v48  ;;  %v6330_v32 = vld [vmem:[%s11232_s6] ss:$0 sm:$0xff] }
 0x111   : > { %v1465_v35 = vor.u32 %v1464_v25, %v1460_v13 }
 0x112   : > { %v820_v56 = vmin.f32 %v816_v27, 6.0  ;;  %v819_v28 = vmax.f32 %v815_v60, 0.0  ;;  %v814_v45 = vadd.f32 3.0, %v804_v42  ;;  %v825_v55 = vmul.f32 0.16666667, %v821_v49 }
 0x114   : > { %v823_v57 = vmin.f32 %v819_v28, 6.0  ;;  %v818_v7 = vmax.f32 %v814_v45, 0.0  ;;  %v824_v8 = vmul.f32 0.16666667, %v820_v56  ;;  %v829_v9 = vmul.f32 %v825_v55, %v799_v58 }
 0x116   : > { %v822_v50 = vmin.f32 %v818_v7, 6.0  ;;  %v828_v34 = vmul.f32 %v824_v8, %v794_v59  ;;  %v827_v20 = vmul.f32 0.16666667, %v823_v57 }
 0x118   : > { %v826_v61 = vmul.f32 0.16666667, %v822_v50  ;;  %6974 = vmatprep.mubr.msk.f32.mxu1 %vm840_vm9, %v828_v34  ;;  %v831_v22 = vmul.f32 %v827_v20, %v809_v47  ;;  %v7687_v34 = vmov 1966171168   ;;  %v1073_v20 = vlaneseq }
 0x119   : > { %6975 = vmatmul.mubr.msk.f32.vlgmr.msra.gmra.mxu1 %vm840_vm9, %v829_v9  ;;  %v1071_v9 = vunpack.c.l.s4 %v7687_v34 }
 0x11a   : > { %v830_v40 = vmul.f32 %v826_v61, %v804_v42  ;;  %6978 = vmatpush3.msra.mxu1 %v934_v38  ;;  %v1467_v38 = vshll.u32 %v8292_v54, 16 }
 0x11b   : > { %7595 = vmatprep.subr.msk.bf16.mxu1 %vm1701_vm10, %v1457_v16  ;;  %v1074_v16 = vshrl.u32 %v1073_v20, 7 }
 0x11c   : > { %6979 = vmatprep.mubr.msk.f32.mxu1 %vm840_vm9, %v830_v40  ;;  %v1469_v41 = vrot.slane %v1467_v38, 1 }
 0x11d   : > { %6980 = vmatmul.mubr.msk.f32.vlgmr.msra.gmra.mxu1 %vm840_vm9, %v831_v22  ;;  %v1072_v22 = vunpack.c.0.s8 %v1071_v9 }
 0x11e   : > { %7017 = vmatpush3.bf16.msra.mxu1 %v8062_v63  ;;  %7018 = vmatprep.mubr.msk.bf16.mxu1 %vm474_vm1, %v8286_v62  ;;  %v1470_v58 = vsel %vm1458_vm12, %v1465_v35, %v1469_v41  ;;  %v8326_v35 = vsub.s32 0, %v1074_v16 }
 0x11f   : > { %6984 = vmatprep.mubr.msk.bf16.mxu0 %vm474_vm1, %v1470_v58  ;;  %7597 = vmatprep.subr.msk.bf16.mxu1 %vm1701_vm10, %v8307_v52  ;;  %v8317_v63 = vsub.s32 %v1072_v22, %v1074_v16 }
 0x1d9   : > { %v6976_v59 = vpop.f32.mrf.mxu1 }
 0x1da   : > { %v919_v36 = vadd.f32 %v6976_v59, %v6325_v23 }
 0x1db   : > { %v913_v46 = vpop.f32.mrf.mxu1 }
 0x1dc   : > { %v6329_v47 = vmul.f32 -1.442695, %v919_v36  ;;  %v914_v48 = vadd.f32 %v6325_v23, %v913_v46 }
 0x1dd   : > { %v6981_v49 = vpop.f32.mrf.mxu1 }
 0x1de   : > { %7622 = vpow2.f32 %v6329_v47  ;;  %v6328_v27 = vmul.f32 -1.442695, %v914_v48  ;;  %v1020_v60 = vadd.f32 %v6981_v49, %v6330_v32 }
 0x1df   : > { %v1014_v42 = vpop.f32.mrf.mxu1 }
 0x1e0   : > { %7624 = vpow2.f32 %v6328_v27  ;;  %v6334_v56 = vmul.f32 -1.442695, %v1020_v60  ;;  %v1015_v28 = vadd.f32 %v6330_v32, %v1014_v42 }
 0x1e2   : > { %v6333_v45 = vmul.f32 -1.442695, %v1015_v28  ;;  %7626 = vpow2.f32 %v6334_v56 }
 0x1e4   : > { %7628 = vpow2.f32 %v6333_v45 }
 0x1eb   : > { %v7623_v55 = vpop.eup %7622 }
 0x1ec   : > { %v929_v57 = vadd.f32 1.0, %v7623_v55 }
 0x1ed   : > { %v7625_v7 = vpop.eup %7624 }
 0x1ee   : > { %7630 = vrcp.f32 %v929_v57  ;;  %v928_v8 = vadd.f32 1.0, %v7625_v7 }
 0x1ef   : > { %v7627_v50 = vpop.eup %7626 }
 0x1f0   : > { %7632 = vrcp.f32 %v928_v8  ;;  %v1030_v51 = vadd.f32 1.0, %v7627_v50 }
 0x1f1   : > { %v7629_v61 = vpop.eup %7628 }
 0x1f2   : > { %v1029_v40 = vadd.f32 1.0, %v7629_v61 }
 0x1f4   : > { %7634 = vrcp.f32 %v1029_v40 }
 0x1f5   : > { %7636 = vrcp.f32 %v1030_v51 }
 0x1fb   : > { %v8319_v15 = vpop.eup %7630 }
 0x1fc   : > { %v1125_v21 = vrot.slane %v8319_v15, %v8317_v63 }
 0x1fd   : > { %v7633_v53 = vpop.eup %7632 }
 0x1fe   : > { %v1133_v14 = vcombine.high %v1125_v21, %v1125_v21  ;;  %v1141_v44 = vrot.slane %v1125_v21, %v8317_v63  ;;  %v1069_v13 = vcombine.high %v7633_v53, %v7633_v53  ;;  %v1076_v43 = vrot.slane %v7633_v53, %v8317_v63 }
 0x200   : > { %v1155_v25 = vrot.slane %v1133_v14, %v8317_v63  ;;  %v1163_v38 = vcombine.high %v1141_v44, %v1141_v44  ;;  %v1083_v41 = vrot.slane %v1069_v13, %v8317_v63  ;;  %v1084_v58 = vcombine.high %v1076_v43, %v1076_v43 }
 0x201   : > { %v1092_v23 = vrot.slane %v1076_v43, %v8317_v63  ;;  %v8330_v36 = vpop.eup %7634  ;;  %v8334_v47 = vrot.slane %v1141_v44, %v8326_v35 }
 0x202   : > { %v1165_v59 = vcombine.high %v1155_v25, %v1155_v25  ;;  %v1085_v46 = vcombine.high %v1083_v41, %v1083_v41  ;;  %v1099_v32 = vrot.slane %v1083_v41, %v8317_v63  ;;  %v8337_v48 = vrot.slane %v1155_v25, %v8326_v35  ;;  %v8342_v27 = vpop.eup %7636 }
 0x203   : > { %v8340_v49 = vrot.slane %v1163_v38, %v8326_v35  ;;  %v1106_v60 = vrot.slane %v1084_v58, %v8317_v63  ;;  %v1114_v56 = vcombine.high %v1092_v23, %v1092_v23  ;;  %v1170_v55 = vrot.slane %v1092_v23, %v8326_v35 }
 0x204   : > { %v1113_v42 = vrot.slane %v1085_v46, %v8317_v63  ;;  %v1115_v28 = vcombine.high %v1099_v32, %v1099_v32  ;;  %v8347_v45 = vrot.slane %v1165_v59, %v8326_v35  ;;  %v1186_v57 = vrot.slane %v1099_v32, %v8326_v35 }
 0x205   : > { %v1035_v7 = vmul.f32 %v8330_v36, %v7780_v1  ;;  %v1116_v8 = vcombine.high %v1106_v60, %v1106_v60  ;;  %v1174_v34 = vrot.slane %v1106_v60, %v8326_v35  ;;  %v1178_v9 = vrot.slane %v1114_v56, %v8326_v35 }
 0x206   : > { %v1117_v50 = vcombine.high %v1113_v42, %v1113_v42  ;;  %v1190_v20 = vrot.slane %v1113_v42, %v8326_v35  ;;  %v1194_v61 = vrot.slane %v1115_v28, %v8326_v35  ;;  %v1036_v40 = vmul.f32 %v8342_v27, %v7783_v2 }
 0x207   : > { %v1247_v22 = vmul.f32 %v1170_v55, %v1035_v7  ;;  %v1182_v16 = vrot.slane %v1116_v8, %v8326_v35  ;;  %v1037_v1 = vmul.f32 %v8330_v36, %v7786_v3  ;;  %v1038_v21 = vmul.f32 %v8342_v27, %v7789_v4 }
 0x208   : > { %v1198_v51 = vrot.slane %v1117_v50, %v8326_v35  ;;  %v1248_v53 = vmul.f32 %v1170_v55, %v1036_v40  ;;  %v1039_v14 = vmul.f32 %v8330_v36, %v7792_v5  ;;  %v1040_v2 = vmul.f32 %v8342_v27, %v7795_v6  ;;  %v11254_v50 = vld [vmem:[#allocation6_spill] sm:$0xff] }
 0x209   : > { %1335 = vst.msk [vmem:[#allocation2 + $0x19] sm:$0xff] %vm474_vm1, %v1247_v22  ;;  %v1041_v44 = vmul.f32 %v8330_v36, %v7810_v10  ;;  %v1249_v13 = vmul.f32 %v1174_v34, %v1037_v1  ;;  %v1250_v43 = vmul.f32 %v1174_v34, %v1038_v21  ;;  %v1042_v3 = vmul.f32 %v8342_v27, %v7813_v11 }
 0x20a   : > { %v1043_v4 = vmul.f32 %v8330_v36, %v7816_v12  ;;  %1336 = vst.msk [vmem:[#allocation2 + $0x21] sm:$0xff] %vm474_vm1, %v1248_v53  ;;  %v1251_v25 = vmul.f32 %v1178_v9, %v1039_v14  ;;  %v1252_v38 = vmul.f32 %v1178_v9, %v1040_v2  ;;  %v1044_v5 = vmul.f32 %v8342_v27, %v7833_v17 }
 0x20b   : > { %v1253_v41 = vmul.f32 %v1182_v16, %v1041_v44  ;;  %1337 = vst.msk [vmem:[#allocation2 + $0x31] sm:$0xff] %vm474_vm1, %v1249_v13  ;;  %1338 = vst.msk [vmem:[#allocation2 + $0x39] sm:$0xff] %vm474_vm1, %v1250_v43  ;;  %v1254_v6 = vmul.f32 %v1182_v16, %v1042_v3  ;;  %v1045_v11 = vmul.f32 %v8330_v36, %v7836_v18 }
 0x20c   : > { %v1255_v10 = vmul.f32 %v1186_v57, %v1043_v4  ;;  %v1046_v12 = vmul.f32 %v8342_v27, %v7839_v19  ;;  %1339 = vst.msk [vmem:[#allocation2 + $0x49] sm:$0xff] %vm474_vm1, %v1251_v25  ;;  %1340 = vst.msk [vmem:[#allocation2 + $0x51] sm:$0xff] %vm474_vm1, %v1252_v38  ;;  %v1256_v58 = vmul.f32 %v1186_v57, %v1044_v5 }
 0x20d   : > { %1341 = vst.msk [vmem:[#allocation2 + $0x61] sm:$0xff] %vm474_vm1, %v1253_v41  ;;  %v1047_v17 = vmul.f32 %v8330_v36, %v7854_v24  ;;  %v1048_v23 = vmul.f32 %v8342_v27, %v7867_v29  ;;  %v1049_v59 = vmul.f32 %v8330_v36, %v7870_v30  ;;  %1342 = vst.msk [vmem:[#allocation2 + $0x69] sm:$0xff] %vm474_vm1, %v1254_v6 }
 0x20e   : > { %1343 = vst.msk [vmem:[#allocation2 + $0x79] sm:$0xff] %vm474_vm1, %v1255_v10  ;;  %v1257_v18 = vmul.f32 %v1190_v20, %v1045_v11  ;;  %v1258_v19 = vmul.f32 %v1190_v20, %v1046_v12  ;;  %v1050_v46 = vmul.f32 %v8342_v27, %v7887_v39  ;;  %v1051_v32 = vmul.f32 %v8330_v36, %v7908_v0  ;;  %v11252_v39 = vld [vmem:[#allocation4_spill] sm:$0xff]  ;;  %v11253_v0 = vld [vmem:[#allocation5_spill] sm:$0xff] }
 0x20f   : > { %1344 = vst.msk [vmem:[#allocation2 + $0x81] sm:$0xff] %vm474_vm1, %v1256_v58  ;;  %v1259_v24 = vmul.f32 %v1194_v61, %v1047_v17  ;;  %v1260_v60 = vmul.f32 %v1194_v61, %v1048_v23  ;;  %v1261_v29 = vmul.f32 %v1198_v51, %v1049_v59  ;;  %v1052_v30 = vmul.f32 %v8342_v27, %v7911_v26 }
 0x210   : > { %v1370_v42 = vld [vmem:[#allocation2 + $0x18] sm:$0xff]  ;;  %1345 = vst.msk [vmem:[#allocation2 + $0x91] sm:$0xff] %vm474_vm1, %v1257_v18  ;;  %1346 = vst.msk [vmem:[#allocation2 + $0x99] sm:$0xff] %vm474_vm1, %v1258_v19  ;;  %v1262_v56 = vmul.f32 %v1198_v51, %v1050_v46  ;;  %v1263_v28 = vmul.f32 %v8334_v47, %v1051_v32  ;;  %v1053_v55 = vmul.f32 %v8330_v36, %v11252_v39  ;;  %v2194_v17 = vsel %vm1701_vm10, %v8297_v37, 0 }
 0x211   : > { %v1054_v57 = vmul.f32 %v8342_v27, %v11253_v0  ;;  %1347 = vst.msk [vmem:[#allocation2 + $0xa9] sm:$0xff] %vm474_vm1, %v1259_v24  ;;  %1348 = vst.msk [vmem:[#allocation2 + $0xb1] sm:$0xff] %vm474_vm1, %v1260_v60  ;;  %v1264_v26 = vmul.f32 %v8334_v47, %v1052_v30  ;;  %v1055_v7 = vmul.f32 %v8330_v36, %v7940_v33  ;;  %v1371_v9 = vld [vmem:[#allocation2 + $0x20] sm:$0xff]  ;;  %v1372_v20 = vld [vmem:[#allocation2 + $0x28] sm:$0x3]  ;;  %v2395_v33 = vsel %vm1701_vm10, %v8307_v52, 0 }
 0x212   : > { %1349 = vst.msk [vmem:[#allocation2 + $0xc1] sm:$0xff] %vm474_vm1, %v1261_v29  ;;  %v1056_v8 = vmul.f32 %v8342_v27, %v7945_v31  ;;  %v1057_v34 = vmul.f32 %v8330_v36, %v11254_v50  ;;  %1350 = vst.msk [vmem:[#allocation2 + $0xc9] sm:$0xff] %vm474_vm1, %v1262_v56  ;;  %v1265_v61 = vmul.f32 %v8337_v48, %v1053_v55  ;;  %v11255_v47 = vld [vmem:[#allocation7_spill] sm:$0xff]  ;;  %v8431_v31 = vld [vmem:[%s11233_s7 + $0xa] sm:$0x3] }
 0x213   : > { %1351 = vst.msk [vmem:[#allocation2 + $0xd9] sm:$0xff] %vm474_vm1, %v1263_v28  ;;  %v1266_v40 = vmul.f32 %v8337_v48, %v1054_v57  ;;  %v1058_v22 = vmul.f32 %v8342_v27, %v11255_v47  ;;  %v8433_v16 = vpack.c.bf16 %v1371_v9, %v1370_v42  ;;  %v1373_v51 = vld [vmem:[#allocation2 + $0x30] sm:$0xff]  ;;  %v1374_v1 = vld [vmem:[#allocation2 + $0x38] sm:$0xff]  ;;  %v8435_v21 = vpack.c.bf16 %v1372_v20, %v1372_v20  ;;  %v1375_v53 = vld [vmem:[#allocation2 + $0x40] sm:$0x3] }
 0x214   : > { %1352 = vst.msk [vmem:[#allocation2 + $0xe1] sm:$0xff] %vm474_vm1, %v1264_v26  ;;  %v1267_v48 = vmul.f32 %v8340_v49, %v1055_v7  ;;  %v1268_v14 = vmul.f32 %v8340_v49, %v1056_v8  ;;  %v8440_v2 = vpack.c.bf16 %v1374_v1, %v1373_v51  ;;  %v8442_v52 = vpack.c.bf16 %v1375_v53, %v1375_v53  ;;  %v1376_v44 = vld [vmem:[#allocation2 + $0x48] sm:$0xff]  ;;  %v1377_v13 = vld [vmem:[#allocation2 + $0x50] sm:$0xff]  ;;  %v1379_v43 = vld [vmem:[#allocation2 + $0x60] sm:$0xff] }
 0x215   : > { %1353 = vst.msk [vmem:[#allocation2 + $0xf1] sm:$0xff] %vm474_vm1, %v1265_v61  ;;  %1354 = vst.msk [vmem:[#allocation2 + $0xf9] sm:$0xff] %vm474_vm1, %v1266_v40  ;;  %v1269_v3 = vmul.f32 %v8347_v45, %v1057_v34  ;;  %v1270_v4 = vmul.f32 %v8347_v45, %v1058_v22  ;;  %7019 = vmatmul.mubr.msk.bf16.vlgmr.msra.gmra.mxu1 %vm474_vm1, %v8433_v16  ;;  %v1474_v49 = vshll.u32 %v8433_v16, 16  ;;  %v1479_v25 = vshll.u32 %v8435_v21, 16  ;;  %v1380_v41 = vld [vmem:[#allocation2 + $0x68] sm:$0xff]  ;;  %v1382_v19 = vld [vmem:[#allocation2 + $0x78] sm:$0xff] }
 0x216   : > { %v8452_v38 = vpack.c.bf16 %v1377_v13, %v1376_v44  ;;  %1355 = vst.msk [vmem:[#allocation2 + $0x109] sm:$0xff] %vm474_vm1, %v1267_v48  ;;  %1356 = vst.msk [vmem:[#allocation2 + $0x111] sm:$0xff] %vm474_vm1, %v1268_v14  ;;  %7022 = vmatprep.mubr.msk.bf16.mxu1 %vm474_vm1, %v8440_v2  ;;  %v1486_v5 = vshll.u32 %v8440_v2, 16  ;;  %v1491_v45 = vshll.u32 %v8442_v52, 16  ;;  %v8460_v6 = vpack.c.bf16 %v1380_v41, %v1379_v43  ;;  %v1378_v10 = vld [vmem:[#allocation2 + $0x58] sm:$0x3] }
 0x217   : > { %1357 = vst.msk [vmem:[#allocation2 + $0x121] sm:$0xff] %vm474_vm1, %v1269_v3  ;;  %1358 = vst.msk [vmem:[#allocation2 + $0x129] sm:$0xff] %vm474_vm1, %v1270_v4  ;;  %7085 = vmatpush3.bf16.msra.mxu1 %v2395_v33  ;;  %v1472_v11 = vshrl.u32 %v8433_v16, 16  ;;  %v1476_v12 = vrot.slane %v1474_v49, 1  ;;  %v1381_v58 = vld [vmem:[#allocation2 + $0x70] sm:$0x3]  ;;  %v8471_v60 = vpack.c.bf16 %v1378_v10, %v1378_v10  ;;  %v1118_v56 = vcombine.high %v8319_v15, %v8319_v15 }
 0x218   : > { %7599 = vmatprep.subr.msk.bf16.mxu1 %vm1701_vm10, %v8431_v31  ;;  %v1484_v23 = vshrl.u32 %v8440_v2, 16  ;;  %v1488_v59 = vrot.slane %v1486_v5, 1  ;;  %v1498_v18 = vshll.u32 %v8452_v38, 16  ;;  %v1383_v46 = vld [vmem:[#allocation2 + $0x80] sm:$0xff]  ;;  %v1481_v24 = vrot.slane %v1479_v25, 1  ;;  %v1385_v30 = vld [vmem:[#allocation2 + $0x90] sm:$0xff] }
 0x219   : > { %v1477_v32 = vor.u32 %v1476_v12, %v1472_v11  ;;  %v1510_v29 = vshll.u32 %v8460_v6, 16  ;;  %v1386_v42 = vld [vmem:[#allocation2 + $0x98] sm:$0xff]  ;;  %v1493_v37 = vrot.slane %v1491_v45, 1  ;;  %v8476_v39 = vpack.c.bf16 %v1381_v58, %v1381_v58  ;;  %v8486_v26 = vld [vmem:[%s11233_s7 + $0x8] sm:$0x3]  ;;  %v1389_v1 = vld [vmem:[#allocation2 + $0xb0] sm:$0xff] }
 0x21a   : > { %v1489_v28 = vor.u32 %v1488_v59, %v1484_v23  ;;  %v1500_v0 = vrot.slane %v1498_v18, 1  ;;  %v8481_v57 = vpack.c.bf16 %v1383_v46, %v1382_v19  ;;  %v8493_v8 = vpack.c.bf16 %v1386_v42, %v1385_v30  ;;  %v1384_v40 = vld [vmem:[#allocation2 + $0x88] sm:$0x3]  ;;  %v1387_v33 = vld [vmem:[#allocation2 + $0xa0] sm:$0x3] }
 0x21b   : > { %v8479_v55 = vsel %vm1458_vm12, %v1477_v32, %v1481_v24  ;;  %v1512_v7 = vrot.slane %v1510_v29, 1  ;;  %v1496_v50 = vshrl.u32 %v8452_v38, 16  ;;  %v1503_v34 = vshll.u32 %v8471_v60, 16  ;;  %v1388_v51 = vld [vmem:[#allocation2 + $0xa8] sm:$0xff]  ;;  %v1391_v13 = vld [vmem:[#allocation2 + $0xc0] sm:$0xff] }
 0x21c   : > { %6985 = vmatmul.mubr.msk.bf16.vlgmr.msra.gmra.mxu0 %vm474_vm1, %v8479_v55  ;;  %v8491_v15 = vsel %vm1458_vm12, %v1489_v28, %v1493_v37  ;;  %v1132_v9 = vrot.slane %v1118_v56, %v8317_v63  ;;  %v1508_v20 = vshrl.u32 %v8460_v6, 16  ;;  %v1515_v61 = vshll.u32 %v8476_v39, 16  ;;  %v1392_v43 = vld [vmem:[#allocation2 + $0xc8] sm:$0xff]  ;;  %v1390_v41 = vld [vmem:[#allocation2 + $0xb8] sm:$0x3]  ;;  %v1395_v28 = vld [vmem:[#allocation2 + $0xe0] sm:$0xff] }
 0x21d   : > { %7051 = vmatpush3.bf16.msra.mxu0 %v2194_v17  ;;  %6988 = vmatprep.mubr.msk.bf16.mxu0 %vm474_vm1, %v8491_v15  ;;  %v1501_v47 = vor.u32 %v1500_v0, %v1496_v50  ;;  %v1522_v22 = vshll.u32 %v8481_v57, 16  ;;  %v1534_v48 = vshll.u32 %v8493_v8, 16  ;;  %v1505_v14 = vrot.slane %v1503_v34, 1  ;;  %v1393_v24 = vld [vmem:[#allocation2 + $0xd0] sm:$0x3]  ;;  %v1394_v56 = vld [vmem:[#allocation2 + $0xd8] sm:$0xff] }
 0x21e   : > { %7023 = vmatmul.mubr.msk.bf16.gmra.mxu1 %vm474_vm1, %v8452_v38  ;;  %7598 = vmatprep.subr.msk.bf16.mxu0 %vm1701_vm10, %v8486_v26  ;;  %v1513_v53 = vor.u32 %v1512_v7, %v1508_v20  ;;  %v8510_v44 = vpack.c.bf16 %v1384_v40, %v1384_v40  ;;  %v1134_v3 = vcombine.high %v1132_v9, %v1132_v9  ;;  %v1517_v4 = vrot.slane %v1515_v61, 1  ;;  %v1397_v50 = vld [vmem:[#allocation2 + $0xf0] sm:$0xff]  ;;  %v1398_v34 = vld [vmem:[#allocation2 + $0xf8] sm:$0xff] }
 0x21f   : > { %7026 = vmatprep.mubr.msk.bf16.mxu1 %vm474_vm1, %v8460_v6  ;;  %v8512_v49 = vpack.c.bf16 %v1387_v33, %v1387_v33  ;;  %v8514_v25 = vpack.c.bf16 %v1389_v1, %v1388_v51  ;;  %v1148_v5 = vrot.slane %v1132_v9, %v8317_v63  ;;  %v8518_v45 = vsel %vm1458_vm12, %v1501_v47, %v1505_v14  ;;  %v7638_v9 = vld [vmem:[%s7777_s15 + $0xc0] sm:$0xff] }
 0x220   : > { %v1524_v10 = vrot.slane %v1522_v22, 1  ;;  %v8523_v11 = vsel %vm1458_vm12, %v1513_v53, %v1517_v4  ;;  %v1536_v12 = vrot.slane %v1534_v48, 1  ;;  %v8525_v58 = vpack.c.bf16 %v1392_v43, %v1391_v13  ;;  %v1396_v48 = vld [vmem:[#allocation2 + $0xe8] sm:$0x3] }
 0x221   : > { %v1520_v17 = vshrl.u32 %v8481_v57, 16  ;;  %v1527_v23 = vshll.u32 %v8510_v44, 16  ;;  %v8531_v59 = vpack.c.bf16 %v1390_v41, %v1390_v41  ;;  %v8534_v18 = vrot.slane %v1134_v3, %v8317_v63  ;;  %v7639_v3 = vld [vmem:[%s7777_s15 + $0xc8] sm:$0xff] }
 0x222   : > { %v1532_v19 = vshrl.u32 %v8493_v8, 16  ;;  %v1539_v46 = vshll.u32 %v8512_v49, 16  ;;  %v1546_v32 = vshll.u32 %v8514_v25, 16  ;;  %v1164_v29 = vcombine.high %v1148_v5, %v1148_v5 }
 0x223   : > { %v1525_v30 = vor.u32 %v1524_v10, %v1520_v17  ;;  %v1558_v63 = vshll.u32 %v8525_v58, 16  ;;  %v1529_v37 = vrot.slane %v1527_v23, 1  ;;  %v1551_v0 = vshll.u32 %v8531_v59, 16 }
 0x224   : > { %6989 = vmatmul.mubr.msk.bf16.gmra.mxu0 %vm474_vm1, %v8518_v45  ;;  %v1537_v42 = vor.u32 %v1536_v12, %v1532_v19  ;;  %v8545_v7 = vpack.c.bf16 %v1393_v24, %v1393_v24  ;;  %v1059_v20 = vmul.f32 %v7638_v9, %v8330_v36  ;;  %v1218_v61 = vrot.slane %v1148_v5, %v8326_v35  ;;  %v1401_v9 = vld [vmem:[#allocation2 + $0x110] sm:$0xff] }
 0x225   : > { %6992 = vmatprep.mubr.msk.bf16.mxu0 %vm474_vm1, %v8523_v11  ;;  %v1222_v40 = vrot.slane %v8534_v18, %v8326_v35  ;;  %v1541_v47 = vrot.slane %v1539_v46, 1  ;;  %v1548_v22 = vrot.slane %v1546_v32, 1  ;;  %v1226_v33 = vrot.slane %v1164_v29, %v8326_v35  ;;  %v7640_v46 = vld [vmem:[%s7777_s15 + $0xd0] sm:$0xff]  ;;  %v1399_v29 = vld [vmem:[#allocation2 + $0x100] sm:$0x3] }
 0x226   : > { %7027 = vmatmul.mubr.msk.bf16.gmra.mxu1 %vm474_vm1, %v8481_v57  ;;  %v8554_v51 = vsel %vm1458_vm12, %v1525_v30, %v1529_v37  ;;  %v1544_v1 = vshrl.u32 %v8514_v25, 16  ;;  %v8557_v53 = vpack.c.bf16 %v1395_v28, %v1394_v56  ;;  %v1560_v13 = vrot.slane %v1558_v63, 1  ;;  %v7641_v30 = vld [vmem:[%s7777_s15 + $0xd8] sm:$0xff]  ;;  %v7642_v63 = vld [vmem:[%s7777_s15 + $0xe0] sm:$0xff]  ;;  %v7643_v28 = vld [vmem:[%s7777_s15 + $0xe8] sm:$0xff] }
 0x227   : > { %7030 = vmatprep.mubr.msk.bf16.mxu1 %vm474_vm1, %v8493_v8  ;;  %v8562_v14 = vsel %vm1458_vm12, %v1537_v42, %v1541_v47  ;;  %v8564_v43 = vpack.c.bf16 %v1398_v34, %v1397_v50  ;;  %v1060_v4 = vmul.f32 %v7639_v3, %v8342_v27  ;;  %v1553_v41 = vrot.slane %v1551_v0, 1  ;;  %v1400_v34 = vld [vmem:[#allocation2 + $0x108] sm:$0xff]  ;;  %v1403_v47 = vld [vmem:[#allocation2 + $0x120] sm:$0xff] }
 0x228   : > { %v1556_v5 = vshrl.u32 %v8525_v58, 16  ;;  %v1563_v10 = vshll.u32 %v8545_v7, 16  ;;  %v1271_v12 = vmul.f32 %v1218_v61, %v1059_v20  ;;  %v1549_v17 = vor.u32 %v1548_v22, %v1544_v1  ;;  %v1404_v22 = vld [vmem:[#allocation2 + $0x128] sm:$0xff] }
 0x229   : > { %v8574_v23 = vpack.c.bf16 %v1396_v48, %v1396_v48  ;;  %v1272_v19 = vmul.f32 %v1218_v61, %v1060_v4  ;;  %v1061_v32 = vmul.f32 %v7640_v46, %v8330_v36  ;;  %v1570_v24 = vshll.u32 %v8557_v53, 16 }
 0x22a   : > { %1359 = vst.msk [vmem:[#allocation2 + $0x139] sm:$0xff] %vm474_vm1, %v1271_v12  ;;  %v1062_v42 = vmul.f32 %v7641_v30, %v8342_v27  ;;  %v1063_v56 = vmul.f32 %v7642_v63, %v8330_v36  ;;  %v1064_v37 = vmul.f32 %v7643_v28, %v8342_v27  ;;  %v1561_v0 = vor.u32 %v1560_v13, %v1556_v5  ;;  %v1405_v63 = vld [vmem:[#allocation2 + $0x130] sm:$0x3] }
 0x22b   : > { %v1582_v50 = vshll.u32 %v8564_v43, 16  ;;  %1360 = vst.msk [vmem:[#allocation2 + $0x141] sm:$0xff] %vm474_vm1, %v1272_v19  ;;  %v1273_v20 = vmul.f32 %v1222_v40, %v1061_v32  ;;  %v2098_v61 = vrot.slane %v8433_v16, 1  ;;  %v2099_v4 = vrot.slane %v8435_v21, 1 }
 0x22c   : > { %6993 = vmatmul.mubr.msk.bf16.gmra.mxu0 %vm474_vm1, %v8554_v51  ;;  %v1274_v1 = vmul.f32 %v1222_v40, %v1062_v42  ;;  %v1275_v48 = vmul.f32 %v1226_v33, %v1063_v56  ;;  %v1276_v3 = vmul.f32 %v1226_v33, %v1064_v37  ;;  %v1565_v12 = vrot.slane %v1563_v10, 1 }
 0x22d   : > { %6996 = vmatprep.mubr.msk.bf16.mxu0 %vm474_vm1, %v8562_v14  ;;  %v8592_v46 = vpack.c.bf16 %v1399_v29, %v1399_v29  ;;  %1361 = vst.msk [vmem:[#allocation2 + $0x151] sm:$0xff] %vm474_vm1, %v1273_v20  ;;  %v8596_v13 = vsel %vm1458_vm12, %v1549_v17, %v1553_v41  ;;  %v1572_v5 = vrot.slane %v1570_v24, 1  ;;  %v8598_v19 = vpack.c.bf16 %v1401_v9, %v1400_v34  ;;  %v1402_v29 = vld [vmem:[#allocation2 + $0x118] sm:$0x3] }
 0x22e   : > { %7031 = vmatmul.mubr.msk.bf16.gmra.mxu1 %vm474_vm1, %v8514_v25  ;;  %1362 = vst.msk [vmem:[#allocation2 + $0x159] sm:$0xff] %vm474_vm1, %v1274_v1  ;;  %1363 = vst.msk [vmem:[#allocation2 + $0x169] sm:$0xff] %vm474_vm1, %v1275_v48  ;;  %v8604_v40 = vsel %vm2094_vm13, %v2098_v61, %v2099_v4  ;;  %v8609_v21 = vsel %vm1458_vm12, %v1561_v0, %v1565_v12  ;;  %v1584_v33 = vrot.slane %v1582_v50, 1  ;;  %v1568_v10 = vshrl.u32 %v8557_v53, 16 }
 0x22f   : > { %7034 = vmatprep.mubr.msk.bf16.mxu1 %vm474_vm1, %v8525_v58  ;;  %1364 = vst.msk [vmem:[#allocation2 + $0x171] sm:$0xff] %vm474_vm1, %v1276_v3  ;;  %v8611_v41 = vpack.c.bf16 %v1404_v22, %v1403_v47  ;;  %v1575_v17 = vshll.u32 %v8574_v23, 16  ;;  %v1580_v32 = vshrl.u32 %v8564_v43, 16  ;;  %v1587_v24 = vshll.u32 %v8592_v46, 16 }
 0x230   : > { %v1573_v30 = vor.u32 %v1572_v5, %v1568_v10  ;;  %v1594_v42 = vshll.u32 %v8598_v19, 16  ;;  %v8625_v34 = vpack.c.bf16 %v1402_v29, %v1402_v29  ;;  %v1166_v20 = vcombine.high %v8534_v18, %v8534_v18  ;;  %v7644_v29 = vld [vmem:[%s7777_s15 + $0xf0] sm:$0xff] }
 0x231   : > { %v1585_v56 = vor.u32 %v1584_v33, %v1580_v32  ;;  %v1606_v28 = vshll.u32 %v8611_v41, 16  ;;  %v1406_v37 = vld [vmem:[#allocation2 + $0x138] sm:$0xff]  ;;  %v1577_v50 = vrot.slane %v1575_v17, 1  ;;  %v1589_v61 = vrot.slane %v1587_v24, 1 }
 0x232   : > { %v1407_v0 = vld [vmem:[#allocation2 + $0x140] sm:$0xff]  ;;  %v8629_v47 = vpack.c.bf16 %v1405_v63, %v1405_v63  ;;  %v1596_v48 = vrot.slane %v1594_v42, 1  ;;  %v1592_v18 = vshrl.u32 %v8598_v19, 16  ;;  %v1599_v33 = vshll.u32 %v8625_v34, 16  ;;  %v1408_v24 = vld [vmem:[#allocation2 + $0x148] sm:$0x3] }
 0x233   : > { %v8632_v1 = vsel %vm1458_vm12, %v1573_v30, %v1577_v50  ;;  %v8634_v3 = vpack.c.bf16 %v1407_v0, %v1406_v37  ;;  %v8639_v4 = vsel %vm1458_vm12, %v1585_v56, %v1589_v61  ;;  %v1608_v12 = vrot.slane %v1606_v28, 1 }
 0x234   : > { %6997 = vmatmul.mubr.msk.bf16.gmra.mxu0 %vm474_vm1, %v8596_v13  ;;  %v1409_v9 = vld [vmem:[#allocation2 + $0x150] sm:$0xff]  ;;  %11256 = vst [vmem:[#allocation4_spill] sm:$0xff] %v8639_v4  ;;  %v1230_v10 = vrot.slane %v1166_v20, %v8326_v35  ;;  %v1604_v17 = vshrl.u32 %v8611_v41, 16  ;;  %v1611_v32 = vshll.u32 %v8629_v47, 16  ;;  %v1065_v30 = vmul.f32 %v7644_v29, %v8330_v36 }
 0x235   : > { %7000 = vmatprep.mubr.msk.bf16.mxu0 %vm474_vm1, %v8609_v21  ;;  %v1410_v22 = vld [vmem:[#allocation2 + $0x158] sm:$0xff]  ;;  %v1597_v42 = vor.u32 %v1596_v48, %v1592_v18  ;;  %v1618_v63 = vshll.u32 %v8634_v3, 16  ;;  %v1411_v56 = vld [vmem:[#allocation2 + $0x160] sm:$0x3]  ;;  %v1412_v37 = vld [vmem:[#allocation2 + $0x168] sm:$0xff]  ;;  %v1601_v50 = vrot.slane %v1599_v33, 1 }
 0x236   : > { %7035 = vmatmul.mubr.msk.bf16.gmra.mxu1 %vm474_vm1, %v8557_v53  ;;  %v8641_v5 = vpack.c.bf16 %v1410_v22, %v1409_v9  ;;  %v1609_v35 = vor.u32 %v1608_v12, %v1604_v17  ;;  %v1413_v0 = vld [vmem:[#allocation2 + $0x170] sm:$0xff]  ;;  %v8658_v9 = vpack.c.bf16 %v1408_v24, %v1408_v24  ;;  %v1613_v20 = vrot.slane %v1611_v32, 1  ;;  %v7645_v22 = vld [vmem:[%s7777_s15 + $0xf8] sm:$0xff] }
 0x237   : > { %7038 = vmatprep.mubr.msk.bf16.mxu1 %vm474_vm1, %v8564_v43  ;;  %v8660_v61 = vpack.c.bf16 %v1411_v56, %v1411_v56  ;;  %v1066_v36 = vmul.f32 %v7645_v22, %v8342_v27  ;;  %v1277_v29 = vmul.f32 %v1230_v10, %v1065_v30  ;;  %v8665_v48 = vsel %vm1458_vm12, %v1597_v42, %v1601_v50  ;;  %v1414_v42 = vld [vmem:[#allocation2 + $0x178] sm:$0x3] }
 0x238   : > { %v1630_v28 = vshll.u32 %v8641_v5, 16  ;;  %v1620_v18 = vrot.slane %v1618_v63, 1  ;;  %v8672_v12 = vsel %vm1458_vm12, %v1609_v35, %v1613_v20  ;;  %v1616_v27 = vshrl.u32 %v8634_v3, 16 }
 0x239   : > { %v1278_v17 = vmul.f32 %v1230_v10, %v1066_v36  ;;  %1365 = vst.msk [vmem:[#allocation2 + $0x181] sm:$0xff] %vm474_vm1, %v1277_v29  ;;  %v1623_v32 = vshll.u32 %v8658_v9, 16  ;;  %v1628_v24 = vshrl.u32 %v8641_v5, 16  ;;  %v1635_v30 = vshll.u32 %v8660_v61, 16 }
 0x23a   : > { %v1632_v33 = vrot.slane %v1630_v28, 1  ;;  %v1621_v10 = vor.u32 %v1620_v18, %v1616_v27  ;;  %v8687_v28 = vpack.c.bf16 %v1414_v42, %v1414_v42  ;;  %v2095_v29 = vrot.slane %v8286_v62, 1  ;;  %v8719_v62 = vld [vmem:[%s11233_s7 + $0xe] sm:$0x3] }
 0x23b   : > { %1366 = vst.msk [vmem:[#allocation2 + $0x189] sm:$0xff] %vm474_vm1, %v1278_v17  ;;  %v1625_v35 = vrot.slane %v1623_v32, 1  ;;  %v2096_v18 = vrot.slane %v8292_v54, 1  ;;  %v2101_v54 = vrot.slane %v8440_v2, 1 }
 0x23c   : > { %7001 = vmatmul.mubr.msk.bf16.gmra.mxu0 %vm474_vm1, %v8632_v1  ;;  %v1633_v56 = vor.u32 %v1632_v33, %v1628_v24  ;;  %v1647_v36 = vshll.u32 %v8687_v28, 16  ;;  %v2813_v24 = vsel %vm1701_vm10, %v8431_v31, 0  ;;  %v2607_v31 = vsel %vm1701_vm10, %v8486_v26, 0 }
 0x23d   : > { %7004 = vmatprep.mubr.msk.bf16.mxu0 %vm474_vm1, %v8639_v4  ;;  %v8667_v4 = vpack.c.bf16 %v1413_v0, %v1412_v37  ;;  %v1637_v37 = vrot.slane %v1635_v30, 1  ;;  %v8690_v0 = vsel %vm1458_vm12, %v1621_v10, %v1625_v35  ;;  %v2097_v27 = vsel %vm2094_vm13, %v2095_v29, %v2096_v18  ;;  %v8734_v30 = vld [vmem:[%s11233_s7 + $0xc] sm:$0x3] }
 0x23e   : > { %7039 = vmatmul.mubr.msk.bf16.gmra.mxu1 %vm474_vm1, %v8598_v19  ;;  %v1649_v17 = vrot.slane %v1647_v36, 1  ;;  %v2107_v26 = vrot.slane %v8460_v6, 1  ;;  %v2108_v10 = vrot.slane %v8476_v39, 1  ;;  %v2113_v39 = vrot.slane %v8493_v8, 1 }
 0x23f   : > { %7042 = vmatprep.mubr.msk.bf16.mxu1 %vm474_vm1, %v8611_v41  ;;  %v1642_v63 = vshll.u32 %v8667_v4, 16  ;;  %v8695_v20 = vsel %vm1458_vm12, %v1633_v56, %v1637_v37  ;;  %v1640_v22 = vshrl.u32 %v8667_v4, 16  ;;  %v2114_v37 = vrot.slane %v8512_v49, 1 }
 0x240   : > { %v8759_v35 = vsel %vm2094_vm13, %v2107_v26, %v2108_v10  ;;  %v2117_v49 = vrot.slane %v8531_v59, 1  ;;  %v2119_v29 = vrot.slane %v8525_v58, 1  ;;  %v2120_v18 = vrot.slane %v8545_v7, 1 }
 0x241   : > { %v1644_v50 = vrot.slane %v1642_v63, 1  ;;  %v2105_v63 = vrot.slane %v8471_v60, 1  ;;  %v2110_v60 = vrot.slane %v8481_v57, 1  ;;  %v8777_v36 = vsel %vm2094_vm13, %v2113_v39, %v2114_v37 }
 0x242   : > { %v2122_v59 = vrot.slane %v8557_v53, 1  ;;  %v2125_v7 = vrot.slane %v8564_v43, 1  ;;  %v1416_v39 = vld [vmem:[#allocation2 + $0x188] sm:$0xff]  ;;  %v2138_v37 = vrot.slane %v8660_v61, 1  ;;  %v2141_v61 = vrot.slane %v8687_v28, 1 }
 0x243   : > { %v1645_v33 = vor.u32 %v1644_v50, %v1640_v22  ;;  %v2111_v50 = vrot.slane %v8510_v44, 1  ;;  %v2116_v44 = vrot.slane %v8514_v25, 1  ;;  %v6470_v28 = vld [vmem:[%s11233_s7 + $0x10] sm:$0x3] }
 0x244   : > { %7005 = vmatmul.mubr.msk.bf16.gmra.mxu0 %vm474_vm1, %v8665_v48 }
 0x245   : > { %7008 = vmatprep.mubr.msk.bf16.mxu0 %vm474_vm1, %v8672_v12  ;;  %v8709_v32 = vsel %vm1458_vm12, %v1645_v33, %v1649_v17  ;;  %v8772_v22 = vsel %vm2094_vm13, %v2110_v60, %v2111_v50  ;;  %v8790_v33 = vsel %vm2094_vm13, %v2116_v44, %v2117_v49  ;;  %v8795_v17 = vsel %vm2094_vm13, %v2119_v29, %v2120_v18  ;;  %v1415_v60 = vld [vmem:[#allocation2 + $0x180] sm:$0xff] }
 0x246   : > { %7043 = vmatmul.mubr.msk.bf16.gmra.mxu1 %vm474_vm1, %v8634_v3  ;;  %v8851_v49 = vpack.c.bf16 %v1416_v39, %v1415_v60  ;;  %v3226_v18 = vsel %vm1701_vm10, %v8719_v62, 0  ;;  %v3432_v39 = vsel %vm1701_vm10, %v6470_v28, 0 }
 0x247   : > { %7046 = vmatprep.mubr.msk.bf16.mxu1 %vm474_vm1, %v8641_v5 }
 0x24c   : > { %7009 = vmatmul.mubr.msk.bf16.gmra.mxu0 %vm474_vm1, %v8690_v0 }
 0x24d   : > { %7012 = vmatprep.mubr.msk.bf16.mxu0 %vm474_vm1, %v8695_v20 }
 0x24e   : > { %7047 = vmatmul.mubr.msk.bf16.gmra.mxu1 %vm474_vm1, %v8667_v4 }
 0x24f   : > { %7086 = vmatprep.mubr.msk.bf16.mxu1 %vm474_vm1, %v8433_v16  ;;  %v2102_v16 = vrot.slane %v8442_v52, 1  ;;  %v2104_v52 = vrot.slane %v8452_v38, 1 }
 0x251   : > { %v8739_v42 = vsel %vm2094_vm13, %v2101_v54, %v2102_v16  ;;  %v8754_v56 = vsel %vm2094_vm13, %v2104_v52, %v2105_v63  ;;  %v2129_v16 = vrot.slane %v8625_v34, 1  ;;  %v2132_v52 = vrot.slane %v8629_v47, 1 }
 0x252   : > { %v2134_v34 = vrot.slane %v8634_v3, 1  ;;  %v2137_v47 = vrot.slane %v8641_v5, 1  ;;  %v2135_v63 = vrot.slane %v8658_v9, 1  ;;  %v2140_v9 = vrot.slane %v8667_v4, 1 }
 0x254   : > { %7013 = vmatmul.mubr.msk.bf16.gmra.mxu0 %vm474_vm1, %v8709_v32  ;;  %v8844_v50 = vsel %vm2094_vm13, %v2134_v34, %v2135_v63  ;;  %v8849_v44 = vsel %vm2094_vm13, %v2137_v47, %v2138_v37  ;;  %v8862_v29 = vsel %vm2094_vm13, %v2140_v9, %v2141_v61 }
 0x255   : > { %7052 = vmatprep.mubr.msk.bf16.mxu0 %vm474_vm1, %v2097_v27  ;;  %v2123_v27 = vrot.slane %v8574_v23, 1  ;;  %v2128_v23 = vrot.slane %v8598_v19, 1 }
 0x256   : > { %7087 = vmatmul.mubr.msk.bf16.vlgmr.msra.gmra.mxu1 %vm474_vm1, %v8440_v2 }
 0x257   : > { %7090 = vmatprep.mubr.msk.bf16.mxu1 %vm474_vm1, %v8452_v38  ;;  %7153 = vmatpush3.bf16.msra.mxu1 %v2813_v24  ;;  %v2126_v24 = vrot.slane %v8592_v46, 1  ;;  %v8808_v54 = vsel %vm2094_vm13, %v2122_v59, %v2123_v27  ;;  %v2131_v46 = vrot.slane %v8611_v41, 1  ;;  %v8826_v26 = vsel %vm2094_vm13, %v2128_v23, %v2129_v16 }
 0x258   : > { %7601 = vmatprep.subr.msk.bf16.mxu1 %vm1701_vm10, %v8719_v62  ;;  %v1417_v62 = vld [vmem:[#allocation2 + $0x190] sm:$0x3]  ;;  %v2592_v59 = vshll.u32 %v8851_v49, 16 }
 0x259   : > { %v8831_v10 = vsel %vm2094_vm13, %v2131_v46, %v2132_v52  ;;  %v2590_v46 = vshrl.u32 %v8851_v49, 16 }
 0x25c   : > { %7053 = vmatmul.mubr.msk.bf16.vlgmr.msra.gmra.mxu0 %vm474_vm1, %v8604_v40 }
 0x25d   : > { %7119 = vmatpush3.bf16.msra.mxu0 %v2607_v31  ;;  %7056 = vmatprep.mubr.msk.bf16.mxu0 %vm474_vm1, %v8739_v42  ;;  %v8813_v31 = vsel %vm2094_vm13, %v2125_v7, %v2126_v24  ;;  %v2804_v7 = vrot.slane %v8851_v49, 1  ;;  %v2594_v24 = vrot.slane %v2592_v59, 1 }
 0x25e   : > { %7091 = vmatmul.mubr.msk.bf16.gmra.mxu1 %vm474_vm1, %v8460_v6  ;;  %7600 = vmatprep.subr.msk.bf16.mxu0 %vm1701_vm10, %v8734_v30 }
 0x25f   : > { %7094 = vmatprep.mubr.msk.bf16.mxu1 %vm474_vm1, %v8481_v57  ;;  %v2595_v52 = vor.u32 %v2594_v24, %v2590_v46 }
 0x264   : > { %7057 = vmatmul.mubr.msk.bf16.gmra.mxu0 %vm474_vm1, %v8754_v56 }
 0x265   : > { %7060 = vmatprep.mubr.msk.bf16.mxu0 %vm474_vm1, %v8759_v35 }
 0x266   : > { %7095 = vmatmul.mubr.msk.bf16.gmra.mxu1 %vm474_vm1, %v8493_v8 }
 0x267   : > { %7098 = vmatprep.mubr.msk.bf16.mxu1 %vm474_vm1, %v8514_v25 }
 0x26c   : > { %7061 = vmatmul.mubr.msk.bf16.gmra.mxu0 %vm474_vm1, %v8772_v22 }
 0x26d   : > { %7064 = vmatprep.mubr.msk.bf16.mxu0 %vm474_vm1, %v8777_v36 }
 0x26e   : > { %7099 = vmatmul.mubr.msk.bf16.gmra.mxu1 %vm474_vm1, %v8525_v58 }
 0x26f   : > { %7102 = vmatprep.mubr.msk.bf16.mxu1 %vm474_vm1, %v8557_v53 }
 0x274   : > { %7065 = vmatmul.mubr.msk.bf16.gmra.mxu0 %vm474_vm1, %v8790_v33 }
 0x275   : > { %7068 = vmatprep.mubr.msk.bf16.mxu0 %vm474_vm1, %v8795_v17 }
 0x276   : > { %7103 = vmatmul.mubr.msk.bf16.gmra.mxu1 %vm474_vm1, %v8564_v43 }
 0x277   : > { %7106 = vmatprep.mubr.msk.bf16.mxu1 %vm474_vm1, %v8598_v19 }
 0x27c   : > { %7069 = vmatmul.mubr.msk.bf16.gmra.mxu0 %vm474_vm1, %v8808_v54 }
 0x27d   : > { %7072 = vmatprep.mubr.msk.bf16.mxu0 %vm474_vm1, %v8813_v31 }
 0x27e   : > { %7107 = vmatmul.mubr.msk.bf16.gmra.mxu1 %vm474_vm1, %v8611_v41 }
 0x27f   : > { %7110 = vmatprep.mubr.msk.bf16.mxu1 %vm474_vm1, %v8634_v3 }
 0x284   : > { %7073 = vmatmul.mubr.msk.bf16.gmra.mxu0 %vm474_vm1, %v8826_v26 }
 0x285   : > { %7076 = vmatprep.mubr.msk.bf16.mxu0 %vm474_vm1, %v8831_v10 }
 0x286   : > { %7111 = vmatmul.mubr.msk.bf16.gmra.mxu1 %vm474_vm1, %v8641_v5 }
 0x287   : > { %7114 = vmatprep.mubr.msk.bf16.mxu1 %vm474_vm1, %v8667_v4 }
 0x28c   : > { %7077 = vmatmul.mubr.msk.bf16.gmra.mxu0 %vm474_vm1, %v8844_v50 }
 0x28d   : > { %7080 = vmatprep.mubr.msk.bf16.mxu0 %vm474_vm1, %v8849_v44 }
 0x28e   : > { %7115 = vmatmul.mubr.msk.bf16.gmra.mxu1 %vm474_vm1, %v8851_v49 }
 0x28f   : > { %7154 = vmatprep.mubr.msk.bf16.mxu1 %vm474_vm1, %v8604_v40  ;;  %v3014_v40 = vsel %vm1701_vm10, %v8734_v30, 0  ;;  %v1454_v30 = vpack.c.bf16 %v1417_v62, %v1417_v62 }
 0x291   : > { %v2805_v27 = vrot.slane %v1454_v30, 1  ;;  %v2597_v16 = vshll.u32 %v1454_v30, 16 }
 0x293   : > { %v8935_v23 = vsel %vm2094_vm13, %v2804_v7, %v2805_v27  ;;  %v2599_v34 = vrot.slane %v2597_v16, 1 }
 0x294   : > { %7081 = vmatmul.mubr.msk.bf16.gmra.mxu0 %vm474_vm1, %v8862_v29 }
 0x295   : > { %7120 = vmatprep.mubr.msk.bf16.mxu0 %vm474_vm1, %v8479_v55  ;;  %v11257_v55 = vld [vmem:[#allocation4_spill] sm:$0xff]  ;;  %v8943_v47 = vsel %vm1458_vm12, %v2595_v52, %v2599_v34 }
 0x296   : > { %7155 = vmatmul.mubr.msk.bf16.vlgmr.msra.gmra.mxu1 %vm474_vm1, %v8739_v42 }
 0x297   : > { %7158 = vmatprep.mubr.msk.bf16.mxu1 %vm474_vm1, %v8754_v56  ;;  %7221 = vmatpush3.bf16.msra.mxu1 %v3226_v18 }
 0x29c   : > { %7121 = vmatmul.mubr.msk.bf16.vlgmr.msra.gmra.mxu0 %vm474_vm1, %v8491_v15 }
 0x29d   : > { %7187 = vmatpush3.bf16.msra.mxu0 %v3014_v40  ;;  %7124 = vmatprep.mubr.msk.bf16.mxu0 %vm474_vm1, %v8518_v45 }
 0x29e   : > { %7159 = vmatmul.mubr.msk.bf16.gmra.mxu1 %vm474_vm1, %v8759_v35  ;;  %7602 = vmatprep.subr.msk.bf16.mxu0 %vm1701_vm10, %v6470_v28 }
 0x29f   : > { %7162 = vmatprep.mubr.msk.bf16.mxu1 %vm474_vm1, %v8772_v22 }
 0x2a4   : > { %7125 = vmatmul.mubr.msk.bf16.gmra.mxu0 %vm474_vm1, %v8523_v11 }
 0x2a5   : > { %7128 = vmatprep.mubr.msk.bf16.mxu0 %vm474_vm1, %v8554_v51 }
 0x2a6   : > { %7163 = vmatmul.mubr.msk.bf16.gmra.mxu1 %vm474_vm1, %v8777_v36 }
 0x2a7   : > { %7166 = vmatprep.mubr.msk.bf16.mxu1 %vm474_vm1, %v8790_v33 }
 0x2ac   : > { %7129 = vmatmul.mubr.msk.bf16.gmra.mxu0 %vm474_vm1, %v8562_v14 }
 0x2ad   : > { %7132 = vmatprep.mubr.msk.bf16.mxu0 %vm474_vm1, %v8596_v13 }
 0x2ae   : > { %7167 = vmatmul.mubr.msk.bf16.gmra.mxu1 %vm474_vm1, %v8795_v17 }
 0x2af   : > { %7170 = vmatprep.mubr.msk.bf16.mxu1 %vm474_vm1, %v8808_v54 }
 0x2b4   : > { %7133 = vmatmul.mubr.msk.bf16.gmra.mxu0 %vm474_vm1, %v8609_v21 }
 0x2b5   : > { %7136 = vmatprep.mubr.msk.bf16.mxu0 %vm474_vm1, %v8632_v1 }
 0x2b6   : > { %7171 = vmatmul.mubr.msk.bf16.gmra.mxu1 %vm474_vm1, %v8813_v31 }
 0x2b7   : > { %7174 = vmatprep.mubr.msk.bf16.mxu1 %vm474_vm1, %v8826_v26 }
 0x2bc   : > { %7137 = vmatmul.mubr.msk.bf16.gmra.mxu0 %vm474_vm1, %v11257_v55 }
 0x2bd   : > { %7140 = vmatprep.mubr.msk.bf16.mxu0 %vm474_vm1, %v8665_v48 }
 0x2be   : > { %7175 = vmatmul.mubr.msk.bf16.gmra.mxu1 %vm474_vm1, %v8831_v10 }
 0x2bf   : > { %7178 = vmatprep.mubr.msk.bf16.mxu1 %vm474_vm1, %v8844_v50 }
 0x2c4   : > { %7141 = vmatmul.mubr.msk.bf16.gmra.mxu0 %vm474_vm1, %v8672_v12 }
 0x2c5   : > { %7144 = vmatprep.mubr.msk.bf16.mxu0 %vm474_vm1, %v8690_v0 }
 0x2c6   : > { %7179 = vmatmul.mubr.msk.bf16.gmra.mxu1 %vm474_vm1, %v8849_v44 }
 0x2c7   : > { %7182 = vmatprep.mubr.msk.bf16.mxu1 %vm474_vm1, %v8862_v29 }
 0x2cc   : > { %7145 = vmatmul.mubr.msk.bf16.gmra.mxu0 %vm474_vm1, %v8695_v20 }
 0x2cd   : > { %7148 = vmatprep.mubr.msk.bf16.mxu0 %vm474_vm1, %v8709_v32 }
 0x2ce   : > { %7183 = vmatmul.mubr.msk.bf16.gmra.mxu1 %vm474_vm1, %v8935_v23 }
 0x2cf   : > { %7222 = vmatprep.mubr.msk.bf16.mxu1 %vm474_vm1, %v8491_v15 }
 0x2d4   : > { %7149 = vmatmul.mubr.msk.bf16.gmra.mxu0 %vm474_vm1, %v8943_v47 }
 0x2d5   : > { %v7020_v63 = vpop.f32.mrf.mxu1  ;;  %7188 = vmatprep.mubr.msk.bf16.mxu0 %vm474_vm1, %v8440_v2 }
 0x2d6   : > { %7223 = vmatmul.mubr.msk.bf16.vlgmr.msra.gmra.mxu1 %vm474_vm1, %v8518_v45 }
 0x2d7   : > { %7226 = vmatprep.mubr.msk.bf16.mxu1 %vm474_vm1, %v8523_v11  ;;  %v1935_v60 = vpop.f32.mrf.mxu1 }
 0x2d9   : > { %v7021_v15 = vpop.f32.mrf.mxu1 }
 0x2db   : > { %v1938_v37 = vpop.f32.mrf.mxu1 }
 0x2dc   : > { %v6986_v9 = vpop.f32.mrf.mxu0  ;;  %7189 = vmatmul.mubr.msk.bf16.vlgmr.msra.gmra.mxu0 %vm474_vm1, %v8452_v38 }
 0x2dd   : > { %v8956_v61 = vadd.f32 %v7020_v63, %v6986_v9  ;;  %7255 = vmatpush3.bf16.msra.mxu0 %v3432_v39  ;;  %7192 = vmatprep.mubr.msk.bf16.mxu0 %vm474_vm1, %v8460_v6 }
 0x2de   : > { %v7024_v2 = vpop.f32.mrf.mxu1  ;;  %7227 = vmatmul.mubr.msk.bf16.gmra.mxu1 %vm474_vm1, %v8554_v51  ;;  %v1739_v45 = vpop.f32.mrf.mxu0 }
 0x2df   : > { %v8962_v11 = vadd.f32 %v1935_v60, %v1739_v45  ;;  %7230 = vmatprep.mubr.msk.bf16.mxu1 %vm474_vm1, %v8562_v14 }
 0x2e0   : > { %v1951_v18 = vpop.f32.mrf.mxu1  ;;  %v6987_v40 = vpop.f32.mrf.mxu0 }
 0x2e1   : > { %v8966_v28 = vadd.f32 %v7021_v15, %v6987_v40 }
 0x2e2   : > { %v7025_v38 = vpop.f32.mrf.mxu1  ;;  %v1742_v62 = vpop.f32.mrf.mxu0 }
 0x2e3   : > { %v8968_v30 = vadd.f32 %v1938_v37, %v1742_v62 }
 0x2e4   : > { %v1954_v59 = vpop.f32.mrf.mxu1  ;;  %v6990_v6 = vpop.f32.mrf.mxu0  ;;  %7193 = vmatmul.mubr.msk.bf16.gmra.mxu0 %vm474_vm1, %v8481_v57 }
 0x2e5   : > { %v8972_v51 = vadd.f32 %v7024_v2, %v6990_v6  ;;  %7196 = vmatprep.mubr.msk.bf16.mxu0 %vm474_vm1, %v8493_v8  ;;  %v1418_v6 = vld [vmem:[#allocation2 + $0x198] sm:$0xff] }
 0x2e6   : > { %v7028_v7 = vpop.f32.mrf.mxu1  ;;  %7231 = vmatmul.mubr.msk.bf16.gmra.mxu1 %vm474_vm1, %v8596_v13  ;;  %v1755_v14 = vpop.f32.mrf.mxu0 }
 0x2e7   : > { %v8978_v27 = vadd.f32 %v1951_v18, %v1755_v14  ;;  %7234 = vmatprep.mubr.msk.bf16.mxu1 %vm474_vm1, %v8609_v21 }
 0x2e8   : > { %v1967_v24 = vpop.f32.mrf.mxu1  ;;  %v6991_v46 = vpop.f32.mrf.mxu0 }
 0x2e9   : > { %v8982_v16 = vadd.f32 %v7025_v38, %v6991_v46 }
 0x2ea   : > { %v7029_v57 = vpop.f32.mrf.mxu1  ;;  %v1758_v52 = vpop.f32.mrf.mxu0 }
 0x2eb   : > { %v8984_v34 = vadd.f32 %v1954_v59, %v1758_v52  ;;  %v1420_v52 = vld [vmem:[#allocation2 + $0x1a8] sm:$0x3] }
 0x2ec   : > { %v1970_v63 = vpop.f32.mrf.mxu1  ;;  %v6994_v8 = vpop.f32.mrf.mxu0  ;;  %7197 = vmatmul.mubr.msk.bf16.gmra.mxu0 %vm474_vm1, %v8514_v25 }
 0x2ed   : > { %v8988_v13 = vadd.f32 %v7028_v7, %v6994_v8  ;;  %7200 = vmatprep.mubr.msk.bf16.mxu0 %vm474_vm1, %v8525_v58  ;;  %v1419_v7 = vld [vmem:[#allocation2 + $0x1a0] sm:$0xff] }
 0x2ee   : > { %v7032_v60 = vpop.f32.mrf.mxu1  ;;  %7235 = vmatmul.mubr.msk.bf16.gmra.mxu1 %vm474_vm1, %v8632_v1  ;;  %v1771_v21 = vpop.f32.mrf.mxu0 }
 0x2ef   : > { %v8994_v15 = vadd.f32 %v1967_v24, %v1771_v21  ;;  %7238 = vmatprep.mubr.msk.bf16.mxu1 %vm474_vm1, %v11257_v55  ;;  %v9034_v21 = vpack.c.bf16 %v1420_v52, %v1420_v52 }
 0x2f0   : > { %v1983_v39 = vpop.f32.mrf.mxu1  ;;  %v6995_v37 = vpop.f32.mrf.mxu0 }
 0x2f1   : > { %v8998_v9 = vadd.f32 %v7029_v57, %v6995_v37 }
 0x2f2   : > { %v7033_v25 = vpop.f32.mrf.mxu1  ;;  %v1774_v2 = vpop.f32.mrf.mxu0 }
 0x2f3   : > { %v9000_v45 = vadd.f32 %v1970_v63, %v1774_v2 }
 0x2f4   : > { %v1986_v18 = vpop.f32.mrf.mxu1  ;;  %v6998_v58 = vpop.f32.mrf.mxu0  ;;  %7201 = vmatmul.mubr.msk.bf16.gmra.mxu0 %vm474_vm1, %v8557_v53 }
 0x2f5   : > { %v9004_v1 = vadd.f32 %v7032_v60, %v6998_v58  ;;  %7204 = vmatprep.mubr.msk.bf16.mxu0 %vm474_vm1, %v8564_v43  ;;  %v9018_v43 = vpack.c.bf16 %v1419_v7, %v1418_v6  ;;  %v3216_v58 = vshll.u32 %v9034_v21, 16 }
 0x2f6   : > { %v7036_v40 = vpop.f32.mrf.mxu1  ;;  %7239 = vmatmul.mubr.msk.bf16.gmra.mxu1 %vm474_vm1, %v8665_v48  ;;  %v1787_v55 = vpop.f32.mrf.mxu0 }
 0x2f7   : > { %v9010_v38 = vadd.f32 %v1983_v39, %v1787_v55  ;;  %7242 = vmatprep.mubr.msk.bf16.mxu1 %vm474_vm1, %v8672_v12 }
 0x2f8   : > { %v1999_v62 = vpop.f32.mrf.mxu1  ;;  %v6999_v59 = vpop.f32.mrf.mxu0 }
 0x2f9   : > { %v9014_v53 = vadd.f32 %v7033_v25, %v6999_v59 }
 0x2fa   : > { %v7037_v14 = vpop.f32.mrf.mxu1  ;;  %v1790_v24 = vpop.f32.mrf.mxu0 }
 0x2fb   : > { %v9016_v46 = vadd.f32 %v1986_v18, %v1790_v24  ;;  %v3209_v18 = vshrl.u32 %v9018_v43, 16 }
 0x2fc   : > { %v9020_v57 = vpop.f32.mrf.mxu1  ;;  %v7002_v48 = vpop.f32.mrf.mxu0  ;;  %7205 = vmatmul.mubr.msk.bf16.gmra.mxu0 %vm474_vm1, %v8598_v19  ;;  %v3211_v19 = vshll.u32 %v9018_v43, 16 }
 0x2fd   : > { %v9024_v12 = vadd.f32 %v7036_v40, %v7002_v48  ;;  %7208 = vmatprep.mubr.msk.bf16.mxu0 %vm474_vm1, %v8611_v41 }
 0x2fe   : > { %v7040_v63 = vpop.f32.mrf.mxu1  ;;  %7243 = vmatmul.mubr.msk.bf16.gmra.mxu1 %vm474_vm1, %v8690_v0  ;;  %v1803_v8 = vpop.f32.mrf.mxu0  ;;  %v3213_v0 = vrot.slane %v3211_v19, 1 }
 0x2ff   : > { %v9030_v60 = vadd.f32 %v1999_v62, %v1803_v8  ;;  %7246 = vmatprep.mubr.msk.bf16.mxu1 %vm474_vm1, %v8695_v20 }
 0x300   : > { %v2015_v39 = vpop.f32.mrf.mxu1  ;;  %v7003_v37 = vpop.f32.mrf.mxu0  ;;  %v3214_v7 = vor.u32 %v3213_v0, %v3209_v18 }
 0x301   : > { %v9037_v25 = vadd.f32 %v7037_v14, %v7003_v37  ;;  %v3218_v14 = vrot.slane %v3216_v58, 1 }
 0x302   : > { %v7041_v2 = vpop.f32.mrf.mxu1  ;;  %v9039_v41 = vpop.f32.mrf.mxu0 }
 0x304   : > { %v9043_v40 = vpop.f32.mrf.mxu1  ;;  %v7006_v55 = vpop.f32.mrf.mxu0  ;;  %7209 = vmatmul.mubr.msk.bf16.gmra.mxu0 %vm474_vm1, %v8634_v3 }
 0x305   : > { %v9047_v20 = vadd.f32 %v7040_v63, %v7006_v55  ;;  %7212 = vmatprep.mubr.msk.bf16.mxu0 %vm474_vm1, %v8641_v5  ;;  %v3219_v5 = vsel %vm1458_vm12, %v3214_v7, %v3218_v14 }
 0x306   : > { %v7044_v62 = vpop.f32.mrf.mxu1  ;;  %7247 = vmatmul.mubr.msk.bf16.gmra.mxu1 %vm474_vm1, %v8709_v32  ;;  %v1819_v59 = vpop.f32.mrf.mxu0 }
 0x307   : > { %v9053_v6 = vadd.f32 %v2015_v39, %v1819_v59  ;;  %7250 = vmatprep.mubr.msk.bf16.mxu1 %vm474_vm1, %v8943_v47 }
 0x308   : > { %v2031_v24 = vpop.f32.mrf.mxu1  ;;  %v7007_v48 = vpop.f32.mrf.mxu0 }
 0x309   : > { %v9057_v3 = vadd.f32 %v7041_v2, %v7007_v48 }
 0x30a   : > { %v7045_v52 = vpop.f32.mrf.mxu1  ;;  %v9059_v63 = vpop.f32.mrf.mxu0 }
 0x30c   : > { %v9062_v8 = vpop.f32.mrf.mxu1  ;;  %v7010_v32 = vpop.f32.mrf.mxu0  ;;  %7213 = vmatmul.mubr.msk.bf16.gmra.mxu0 %vm474_vm1, %v8667_v4 }
 0x30d   : > { %11258 = vst [vmem:[#allocation5_spill] sm:$0xff] %v9062_v8  ;;  %v9066_v19 = vadd.f32 %v7044_v62, %v7010_v32  ;;  %7216 = vmatprep.mubr.msk.bf16.mxu0 %vm474_vm1, %v8851_v49 }
 0x30e   : > { %v7048_v47 = vpop.f32.mrf.mxu1  ;;  %v1835_v39 = vpop.f32.mrf.mxu0  ;;  %7251 = vmatmul.mubr.msk.bf16.gmra.mxu1 %vm474_vm1, %v3219_v5 }
 0x30f   : > { %v9071_v37 = vadd.f32 %v2031_v24, %v1835_v39 }
 0x310   : > { %v2047_v2 = vpop.f32.mrf.mxu1  ;;  %v7011_v18 = vpop.f32.mrf.mxu0 }
 0x311   : > { %v9073_v0 = vadd.f32 %v7045_v52, %v7011_v18 }
 0x312   : > { %v7049_v58 = vpop.f32.mrf.mxu1  ;;  %v9075_v55 = vpop.f32.mrf.mxu0 }
 0x314   : > { %v9077_v59 = vpop.f32.mrf.mxu1  ;;  %v7014_v4 = vpop.f32.mrf.mxu0  ;;  %7217 = vmatmul.mubr.msk.bf16.gmra.mxu0 %vm474_vm1, %v9018_v43 }
 0x315   : > { %11259 = vst [vmem:[#allocation6_spill] sm:$0xff] %v9077_v59  ;;  %v9081_v49 = vadd.f32 %v7048_v47, %v7014_v4  ;;  %7256 = vmatprep.mubr.msk.bf16.mxu0 %vm474_vm1, %v8739_v42 }
 0x316   : > { %v7088_v62 = vpop.f32.mrf.mxu1  ;;  %v1851_v7 = vpop.f32.mrf.mxu0 }
 0x317   : > { %v9085_v14 = vadd.f32 %v2047_v2, %v1851_v7 }
 0x318   : > { %v2431_v24 = vpop.f32.mrf.mxu1  ;;  %v7015_v48 = vpop.f32.mrf.mxu0 }
 0x319   : > { %v9087_v52 = vadd.f32 %v7049_v58, %v7015_v48 }
 0x31a   : > { %v7089_v5 = vpop.f32.mrf.mxu1  ;;  %v9089_v32 = vpop.f32.mrf.mxu0 }
 0x31b   : > { %11260 = vst [vmem:[#allocation7_spill] sm:$0xff] %v9089_v32 }
 0x31c   : > { %v9091_v39 = vpop.f32.mrf.mxu1  ;;  %v7054_v18 = vpop.f32.mrf.mxu0  ;;  %7257 = vmatmul.mubr.msk.bf16.vlgmr.msra.gmra.mxu0 %vm474_vm1, %v8754_v56 }
 0x31d   : > { %11261 = vst [vmem:[#allocation4_spill] sm:$0xff] %v9091_v39  ;;  %v2359_v47 = vadd.f32 %v7054_v18, %v8956_v61  ;;  %7260 = vmatprep.mubr.msk.bf16.mxu0 %vm474_vm1, %v8759_v35 }
 0x31e   : > { %v7092_v42 = vpop.f32.mrf.mxu1  ;;  %v2230_v2 = vpop.f32.mrf.mxu0 }
 0x31f   : > { %v2357_v4 = vadd.f32 %v2230_v2, %v8962_v11  ;;  %v9099_v58 = vadd.f32 %v7088_v62, %v2359_v47 }
 0x320   : > { %v2447_v7 = vpop.f32.mrf.mxu1  ;;  %v7055_v48 = vpop.f32.mrf.mxu0 }
 0x321   : > { %v2360_v59 = vadd.f32 %v7055_v48, %v8966_v28  ;;  %v9102_v39 = vadd.f32 %v2431_v24, %v2357_v4 }
 0x322   : > { %v7093_v32 = vpop.f32.mrf.mxu1  ;;  %v2233_v8 = vpop.f32.mrf.mxu0 }
 0x323   : > { %v9105_v56 = vadd.f32 %v2233_v8, %v8968_v30  ;;  %v9107_v61 = vadd.f32 %v7089_v5, %v2360_v59 }
 0x324   : > { %v9109_v35 = vpop.f32.mrf.mxu1  ;;  %v7058_v18 = vpop.f32.mrf.mxu0  ;;  %7261 = vmatmul.mubr.msk.bf16.gmra.mxu0 %vm474_vm1, %v8772_v22 }
 0x325   : > { %v2363_v11 = vadd.f32 %v7058_v18, %v8972_v51  ;;  %7264 = vmatprep.mubr.msk.bf16.mxu0 %vm474_vm1, %v8777_v36 }
 0x326   : > { %v7096_v28 = vpop.f32.mrf.mxu1  ;;  %v2246_v62 = vpop.f32.mrf.mxu0 }
 0x327   : > { %v2361_v24 = vadd.f32 %v2246_v62, %v8978_v27  ;;  %v9117_v47 = vadd.f32 %v7092_v42, %v2363_v11 }
 0x328   : > { %v2463_v30 = vpop.f32.mrf.mxu1  ;;  %v7059_v8 = vpop.f32.mrf.mxu0 }
 0x329   : > { %v2364_v59 = vadd.f32 %v7059_v8, %v8982_v16  ;;  %v9120_v5 = vadd.f32 %v2447_v7, %v2361_v24 }
 0x32a   : > { %v7097_v2 = vpop.f32.mrf.mxu1  ;;  %v2249_v4 = vpop.f32.mrf.mxu0 }
 0x32b   : > { %v9123_v22 = vadd.f32 %v2249_v4, %v8984_v34  ;;  %v9125_v51 = vadd.f32 %v7093_v32, %v2364_v59 }
 0x32c   : > { %v9127_v36 = vpop.f32.mrf.mxu1  ;;  %v7062_v48 = vpop.f32.mrf.mxu0  ;;  %7265 = vmatmul.mubr.msk.bf16.gmra.mxu0 %vm474_vm1, %v8790_v33 }
 0x32d   : > { %v2367_v27 = vadd.f32 %v7062_v48, %v8988_v13  ;;  %7268 = vmatprep.mubr.msk.bf16.mxu0 %vm474_vm1, %v8795_v17 }
 0x32e   : > { %v7100_v16 = vpop.f32.mrf.mxu1  ;;  %v2262_v42 = vpop.f32.mrf.mxu0 }
 0x32f   : > { %v2365_v7 = vadd.f32 %v2262_v42, %v8994_v15  ;;  %v9135_v18 = vadd.f32 %v7096_v28, %v2367_v27 }
 0x330   : > { %v2479_v34 = vpop.f32.mrf.mxu1  ;;  %v7063_v32 = vpop.f32.mrf.mxu0 }
 0x331   : > { %v2368_v11 = vadd.f32 %v7063_v32, %v8998_v9  ;;  %v9138_v62 = vadd.f32 %v2463_v30, %v2365_v7 }
 0x332   : > { %v7101_v24 = vpop.f32.mrf.mxu1  ;;  %v2265_v8 = vpop.f32.mrf.mxu0 }
 0x333   : > { %v9141_v33 = vadd.f32 %v2265_v8, %v9000_v45  ;;  %v9143_v13 = vadd.f32 %v7097_v2, %v2368_v11 }
 0x334   : > { %v9145_v17 = vpop.f32.mrf.mxu1  ;;  %v7066_v59 = vpop.f32.mrf.mxu0  ;;  %7269 = vmatmul.mubr.msk.bf16.gmra.mxu0 %vm474_vm1, %v8808_v54 }
 0x335   : > { %v2371_v15 = vadd.f32 %v7066_v59, %v9004_v1  ;;  %7272 = vmatprep.mubr.msk.bf16.mxu0 %vm474_vm1, %v8813_v31 }
 0x336   : > { %v7104_v9 = vpop.f32.mrf.mxu1  ;;  %v2278_v28 = vpop.f32.mrf.mxu0 }
 0x337   : > { %v2369_v30 = vadd.f32 %v2278_v28, %v9010_v38  ;;  %v9153_v4 = vadd.f32 %v7100_v16, %v2371_v15  ;;  %v6489_v38 = vld [vmem:[%s11236_s10 + $0x2] sm:$0x3] }
 0x338   : > { %v2495_v45 = vpop.f32.mrf.mxu1  ;;  %v7067_v2 = vpop.f32.mrf.mxu0  ;;  %7603 = vmatprep.subr.msk.bf16.mxu1 %vm1701_vm10, %v6489_v38 }
 0x339   : > { %v2372_v48 = vadd.f32 %v7067_v2, %v9014_v53  ;;  %v9156_v27 = vadd.f32 %v2479_v34, %v2369_v30 }
 0x33a   : > { %v7105_v42 = vpop.f32.mrf.mxu1  ;;  %v2281_v7 = vpop.f32.mrf.mxu0 }
 0x33b   : > { %v9159_v54 = vadd.f32 %v2281_v7, %v9016_v46  ;;  %v9161_v1 = vadd.f32 %v7101_v24, %v2372_v48  ;;  %v4158_v46 = vsel %vm1701_vm10, %v6489_v38, 0 }
 0x33c   : > { %v9163_v31 = vpop.f32.mrf.mxu1  ;;  %v7070_v32 = vpop.f32.mrf.mxu0  ;;  %7273 = vmatmul.mubr.msk.bf16.gmra.mxu0 %vm474_vm1, %v8826_v26  ;;  %7289 = vmatpush3.bf16.msra.mxu1 %v4158_v46 }
 0x33d   : > { %v2375_v53 = vadd.f32 %v7070_v32, %v9024_v12  ;;  %7276 = vmatprep.mubr.msk.bf16.mxu0 %vm474_vm1, %v8831_v10 }
 0x33e   : > { %v7108_v16 = vpop.f32.mrf.mxu1  ;;  %v2294_v34 = vpop.f32.mrf.mxu0 }
 0x33f   : > { %v2373_v11 = vadd.f32 %v2294_v34, %v9030_v60  ;;  %v9176_v24 = vadd.f32 %v7104_v9, %v2375_v53 }
 0x340   : > { %v2511_v26 = vpop.f32.mrf.mxu1  ;;  %v7071_v8 = vpop.f32.mrf.mxu0 }
 0x341   : > { %v2376_v59 = vadd.f32 %v7071_v8, %v9037_v25  ;;  %v9179_v15 = vadd.f32 %v2495_v45, %v2373_v11 }
 0x342   : > { %v7109_v12 = vpop.f32.mrf.mxu1  ;;  %v9181_v28 = vpop.f32.mrf.mxu0 }
 0x343   : > { %v9183_v10 = vadd.f32 %v7105_v42, %v2376_v59 }
 0x344   : > { %v9185_v30 = vpop.f32.mrf.mxu1  ;;  %v7074_v2 = vpop.f32.mrf.mxu0  ;;  %7277 = vmatmul.mubr.msk.bf16.gmra.mxu0 %vm474_vm1, %v8844_v50 }
 0x345   : > { %v2379_v60 = vadd.f32 %v7074_v2, %v9047_v20  ;;  %7280 = vmatprep.mubr.msk.bf16.mxu0 %vm474_vm1, %v8849_v44 }
 0x346   : > { %v7112_v9 = vpop.f32.mrf.mxu1  ;;  %v2310_v25 = vpop.f32.mrf.mxu0 }
 0x347   : > { %v2377_v45 = vadd.f32 %v2310_v25, %v9053_v6  ;;  %v9193_v48 = vadd.f32 %v7108_v16, %v2379_v60  ;;  %v3424_v16 = vrot.slane %v9034_v21, 1 }
 0x348   : > { %v2527_v7 = vpop.f32.mrf.mxu1  ;;  %v7075_v42 = vpop.f32.mrf.mxu0 }
 0x349   : > { %v2380_v32 = vadd.f32 %v7075_v42, %v9057_v3  ;;  %v9196_v38 = vadd.f32 %v2511_v26, %v2377_v45  ;;  %v3423_v3 = vrot.slane %v9018_v43, 1 }
 0x34a   : > { %v7113_v53 = vpop.f32.mrf.mxu1  ;;  %v9198_v46 = vpop.f32.mrf.mxu0 }
 0x34b   : > { %v9200_v50 = vadd.f32 %v7109_v12, %v2380_v32 }
 0x34c   : > { %v9202_v20 = vpop.f32.mrf.mxu1  ;;  %v7078_v44 = vpop.f32.mrf.mxu0  ;;  %7281 = vmatmul.mubr.msk.bf16.gmra.mxu0 %vm474_vm1, %v8862_v29  ;;  %v3425_v29 = vsel %vm2094_vm13, %v3423_v3, %v3424_v16 }
 0x34d   : > { %v2383_v6 = vadd.f32 %v7078_v44, %v9066_v19  ;;  %7284 = vmatprep.mubr.msk.bf16.mxu0 %vm474_vm1, %v8935_v23 }
 0x34e   : > { %v7116_v34 = vpop.f32.mrf.mxu1  ;;  %v2326_v11 = vpop.f32.mrf.mxu0 }
 0x34f   : > { %v2381_v26 = vadd.f32 %v2326_v11, %v9071_v37  ;;  %v9212_v8 = vadd.f32 %v7112_v9, %v2383_v6 }
 0x350   : > { %v2543_v59 = vpop.f32.mrf.mxu1  ;;  %v7079_v12 = vpop.f32.mrf.mxu0 }
 0x351   : > { %v2384_v2 = vadd.f32 %v7079_v12, %v9073_v0  ;;  %v9216_v19 = vadd.f32 %v2527_v7, %v2381_v26 }
 0x352   : > { %v7117_v60 = vpop.f32.mrf.mxu1  ;;  %v9218_v23 = vpop.f32.mrf.mxu0 }
 0x353   : > { %v9220_v43 = vadd.f32 %v7113_v53, %v2384_v2 }
 0x354   : > { %v9222_v21 = vpop.f32.mrf.mxu1  ;;  %v7082_v25 = vpop.f32.mrf.mxu0  ;;  %7285 = vmatmul.mubr.msk.bf16.gmra.mxu0 %vm474_vm1, %v3425_v29 }
 0x355   : > { %v2387_v37 = vadd.f32 %v7082_v25, %v9081_v49 }
 0x356   : > { %v9226_v9 = vpop.f32.mrf.mxu1  ;;  %v2342_v45 = vpop.f32.mrf.mxu0 }
 0x357   : > { %v2385_v0 = vadd.f32 %v2342_v45, %v9085_v14  ;;  %v9229_v42 = vadd.f32 %v7116_v34, %v2387_v37 }
 0x358   : > { %v9231_v7 = vpop.f32.mrf.mxu1  ;;  %v7083_v32 = vpop.f32.mrf.mxu0 }
 0x359   : > { %v2388_v53 = vadd.f32 %v7083_v32, %v9087_v52  ;;  %v9234_v44 = vadd.f32 %v2543_v59, %v2385_v0 }
 0x35a   : > { %v9236_v6 = vpop.f32.mrf.mxu1  ;;  %v9238_v3 = vpop.f32.mrf.mxu0 }
 0x35b   : > { %v9240_v16 = vadd.f32 %v7117_v60, %v2388_v53 }
 0x35c   : > { %v9242_v49 = vpop.f32.mrf.mxu1  ;;  %v7122_v11 = vpop.f32.mrf.mxu0 }
 0x35d   : > { %v9245_v14 = vadd.f32 %v7122_v11, %v9099_v58 }
 0x35e   : > { %v9247_v34 = vpop.f32.mrf.mxu1  ;;  %v2643_v26 = vpop.f32.mrf.mxu0 }
 0x35f   : > { %v9250_v12 = vadd.f32 %v2643_v26, %v9102_v39 }
 0x360   : > { %v9252_v52 = vpop.f32.mrf.mxu1  ;;  %v7123_v59 = vpop.f32.mrf.mxu0 }
 0x361   : > { %v9255_v2 = vadd.f32 %v7123_v59, %v9107_v61 }
 0x362   : > { %v9257_v29 = vpop.f32.mrf.mxu1  ;;  %v9259_v60 = vpop.f32.mrf.mxu0 }
 0x364   : > { %v9261_v25 = vpop.f32.mrf.mxu1  ;;  %v7126_v58 = vpop.f32.mrf.mxu0 }
 0x365   : > { %11262 = vst [vmem:[#allocation8_spill] sm:$0xff] %v9261_v25  ;;  %v9264_v37 = vadd.f32 %v7126_v58, %v9117_v47 }
 0x366   : > { %v9266_v45 = vpop.f32.mrf.mxu1  ;;  %v2659_v39 = vpop.f32.mrf.mxu0 }
 0x367   : > { %11263 = vst [vmem:[#allocation9_spill] sm:$0xff] %v9266_v45  ;;  %v9269_v0 = vadd.f32 %v2659_v39, %v9120_v5 }
 0x368   : > { %v9271_v32 = vpop.f32.mrf.mxu1  ;;  %v7127_v61 = vpop.f32.mrf.mxu0 }
 0x369   : > { %11264 = vst [vmem:[#allocation10_spill] sm:$0xff] %v9271_v32  ;;  %v9274_v53 = vadd.f32 %v7127_v61, %v9125_v51 }
 0x36a   : > { %v9276_v11 = vpop.f32.mrf.mxu1  ;;  %v9278_v26 = vpop.f32.mrf.mxu0 }
 0x36b   : > { %11265 = vst [vmem:[#allocation11_spill] sm:$0xff] %v9276_v11 }
 0x36c   : > { %v9280_v59 = vpop.f32.mrf.mxu1  ;;  %v7130_v47 = vpop.f32.mrf.mxu0 }
 0x36d   : > { %11266 = vst [vmem:[#allocation12_spill] sm:$0xff] %v9280_v59  ;;  %v9283_v58 = vadd.f32 %v7130_v47, %v9135_v18 }
 0x36e   : > { %v9285_v45 = vpop.f32.mrf.mxu1  ;;  %v2675_v5 = vpop.f32.mrf.mxu0 }
 0x36f   : > { %11267 = vst [vmem:[#allocation13_spill] sm:$0xff] %v9283_v58  ;;  %11268 = vst [vmem:[#allocation14_spill] sm:$0xff] %v9285_v45  ;;  %v9288_v39 = vadd.f32 %v2675_v5, %v9138_v62 }
 0x370   : > { %v9290_v32 = vpop.f32.mrf.mxu1  ;;  %v7131_v51 = vpop.f32.mrf.mxu0 }
 0x371   : > { %11269 = vst [vmem:[#allocation15_spill] sm:$0xff] %v9288_v39  ;;  %11270 = vst [vmem:[#allocation16_spill] sm:$0xff] %v9290_v32  ;;  %v9293_v61 = vadd.f32 %v7131_v51, %v9143_v13 }
 0x372   : > { %v9295_v11 = vpop.f32.mrf.mxu1  ;;  %v9297_v25 = vpop.f32.mrf.mxu0 }
 0x373   : > { %11271 = vst [vmem:[#allocation17_spill] sm:$0xff] %v9293_v61  ;;  %11272 = vst [vmem:[#allocation18_spill] sm:$0xff] %v9295_v11 }
 0x374   : > { %v9299_v59 = vpop.f32.mrf.mxu1  ;;  %v7134_v18 = vpop.f32.mrf.mxu0 }
 0x375   : > { %11273 = vst [vmem:[#allocation19_spill] sm:$0xff] %v9299_v59  ;;  %v9302_v47 = vadd.f32 %v7134_v18, %v9153_v4  ;;  %v3914_v59 = vld [vmem:[%s11236_s10] sm:$0x3] }
 0x376   : > { %v9304_v45 = vpop.f32.mrf.mxu1  ;;  %v2691_v62 = vpop.f32.mrf.mxu0  ;;  %7604 = vmatprep.subr.msk.bf16.mxu0 %vm1701_vm10, %v3914_v59  ;;  %v4354_v18 = vsel %vm1701_vm10, %v3914_v59, 0 }
 0x377   : > { %11274 = vst [vmem:[#allocation20_spill] sm:$0xff] %v9302_v47  ;;  %11275 = vst [vmem:[#allocation21_spill] sm:$0xff] %v9304_v45  ;;  %v9307_v5 = vadd.f32 %v2691_v62, %v9156_v27  ;;  %7323 = vmatpush3.bf16.msra.mxu0 %v4354_v18 }
 0x378   : > { %v9309_v32 = vpop.f32.mrf.mxu1  ;;  %v7135_v13 = vpop.f32.mrf.mxu0 }
 0x379   : > { %11276 = vst [vmem:[#allocation22_spill] sm:$0xff] %v9307_v5  ;;  %11277 = vst [vmem:[#allocation23_spill] sm:$0xff] %v9309_v32  ;;  %v9312_v51 = vadd.f32 %v7135_v13, %v9161_v1  ;;  %v3824_v1 = vld [vmem:[#allocation3] sm:$0xff]  ;;  %v3825_v13 = vld [vmem:[#allocation3 + $0x8] sm:$0xff] }
 0x37a   : > { %v9317_v11 = vpop.f32.mrf.mxu1  ;;  %v9319_v4 = vpop.f32.mrf.mxu0  ;;  %v9330_v5 = vpack.c.bf16 %v3825_v13, %v3824_v1 }
 0x37b   : > { %11278 = vst [vmem:[#allocation24_spill] sm:$0xff] %v9312_v51  ;;  %11279 = vst [vmem:[#allocation25_spill] sm:$0xff] %v9317_v11 }
 0x37c   : > { %v9323_v27 = vpop.f32.mrf.mxu1  ;;  %v7138_v62 = vpop.f32.mrf.mxu0  ;;  %7324 = vmatprep.mubr.msk.bf16.mxu0 %vm474_vm1, %v9330_v5  ;;  %v3916_v1 = vshrl.u32 %v9330_v5, 16  ;;  %v3918_v13 = vshll.u32 %v9330_v5, 16 }
 0x37d   : > { %11280 = vst [vmem:[#allocation26_spill] sm:$0xff] %v9323_v27  ;;  %v9326_v32 = vadd.f32 %v7138_v62, %v9176_v24 }
 0x37e   : > { %v9328_v45 = vpop.f32.mrf.mxu1  ;;  %v2707_v51 = vpop.f32.mrf.mxu0 }
 0x37f   : > { %11281 = vst [vmem:[#allocation27_spill] sm:$0xff] %v9326_v32  ;;  %11282 = vst [vmem:[#allocation28_spill] sm:$0xff] %v9328_v45  ;;  %v9333_v11 = vadd.f32 %v2707_v51, %v9179_v15  ;;  %v3826_v45 = vld [vmem:[#allocation3 + $0x10] sm:$0x3]  ;;  %v9351_v15 = vld [vmem:[%s11236_s10 + $0x4] sm:$0x3] }
 0x380   : > { %v9335_v47 = vpop.f32.mrf.mxu1  ;;  %v7139_v59 = vpop.f32.mrf.mxu0  ;;  %11287 = vst [vmem:[#allocation33_spill] sm:$0xff] %v9351_v15  ;;  %v9355_v27 = vpack.c.bf16 %v3826_v45, %v3826_v45  ;;  %7605 = vmatprep.subr.msk.bf16.mxu1 %vm1701_vm10, %v9351_v15 }
 0x381   : > { %11283 = vst [vmem:[#allocation29_spill] sm:$0xff] %v9333_v11  ;;  %11284 = vst [vmem:[#allocation30_spill] sm:$0xff] %v9335_v47  ;;  %v9340_v18 = vadd.f32 %v7139_v59, %v9183_v10  ;;  %v3920_v59 = vrot.slane %v3918_v13, 1 }
 0x382   : > { %v9342_v24 = vpop.f32.mrf.mxu1  ;;  %v9344_v62 = vpop.f32.mrf.mxu0  ;;  %v3923_v11 = vshll.u32 %v9355_v27, 16 }
 0x383   : > { %11285 = vst [vmem:[#allocation31_spill] sm:$0xff] %v9340_v18  ;;  %11286 = vst [vmem:[#allocation32_spill] sm:$0xff] %v9342_v24  ;;  %v3921_v61 = vor.u32 %v3920_v59, %v3916_v1 }
 0x384   : > { %v9353_v51 = vpop.f32.mrf.mxu1  ;;  %v7142_v47 = vpop.f32.mrf.mxu0  ;;  %v3925_v39 = vrot.slane %v3923_v11, 1 }
 0x385   : > { %11288 = vst [vmem:[#allocation34_spill] sm:$0xff] %v9353_v51  ;;  %v9360_v10 = vadd.f32 %v7142_v47, %v9193_v48 }
 0x386   : > { %v9362_v24 = vpop.f32.mrf.mxu1  ;;  %v2723_v18 = vpop.f32.mrf.mxu0  ;;  %v3926_v47 = vsel %vm1458_vm12, %v3921_v61, %v3925_v39 }
 0x387   : > { %v9366_v32 = vadd.f32 %v2723_v18, %v9196_v38  ;;  %7290 = vmatprep.mubr.msk.bf16.mxu1 %vm474_vm1, %v3926_v47 }
 0x388   : > { %v9368_v51 = vpop.f32.mrf.mxu1  ;;  %v7143_v45 = vpop.f32.mrf.mxu0 }
 0x389   : > { %v9371_v58 = vadd.f32 %v7143_v45, %v9200_v50 }
 0x38a   : > { %v9373_v15 = vpop.f32.mrf.mxu1  ;;  %v9375_v48 = vpop.f32.mrf.mxu0 }
 0x38b   : > { %11289 = vst [vmem:[#allocation35_spill] sm:$0xff] %v9373_v15 }
 0x38c   : > { %v9379_v13 = vpop.f32.mrf.mxu1  ;;  %v7146_v38 = vpop.f32.mrf.mxu0 }
 0x38d   : > { %11290 = vst [vmem:[#allocation36_spill] sm:$0xff] %v9379_v13  ;;  %v9382_v18 = vadd.f32 %v7146_v38, %v9212_v8 }
 0x38e   : > { %v9384_v1 = vpop.f32.mrf.mxu1  ;;  %v2739_v11 = vpop.f32.mrf.mxu0 }
 0x38f   : > { %11291 = vst [vmem:[#allocation37_spill] sm:$0xff] %v9384_v1  ;;  %v9387_v50 = vadd.f32 %v2739_v11, %v9216_v19 }
 0x390   : > { %v9389_v59 = vpop.f32.mrf.mxu1  ;;  %v7147_v45 = vpop.f32.mrf.mxu0 }
 0x391   : > { %11292 = vst [vmem:[#allocation38_spill] sm:$0xff] %v9389_v59  ;;  %v9392_v15 = vadd.f32 %v7147_v45, %v9220_v43 }
 0x392   : > { %v9394_v39 = vpop.f32.mrf.mxu1  ;;  %v9396_v61 = vpop.f32.mrf.mxu0 }
 0x393   : > { %11293 = vst [vmem:[#allocation39_spill] sm:$0xff] %v9392_v15  ;;  %11294 = vst [vmem:[#allocation40_spill] sm:$0xff] %v9394_v39 }
 0x394   : > { %v9398_v47 = vpop.f32.mrf.mxu1  ;;  %v7150_v8 = vpop.f32.mrf.mxu0 }
 0x395   : > { %11295 = vst [vmem:[#allocation41_spill] sm:$0xff] %v9398_v47  ;;  %v9401_v38 = vadd.f32 %v7150_v8, %v9229_v42 }
 0x396   : > { %v9403_v1 = vpop.f32.mrf.mxu1  ;;  %v2755_v19 = vpop.f32.mrf.mxu0 }
 0x397   : > { %11296 = vst [vmem:[#allocation42_spill] sm:$0xff] %v9401_v38  ;;  %11297 = vst [vmem:[#allocation43_spill] sm:$0xff] %v9403_v1  ;;  %v9406_v11 = vadd.f32 %v2755_v19, %v9234_v44 }
 0x398   : > { %v9408_v59 = vpop.f32.mrf.mxu1  ;;  %v7151_v43 = vpop.f32.mrf.mxu0 }
 0x399   : > { %11298 = vst [vmem:[#allocation44_spill] sm:$0xff] %v9406_v11  ;;  %11299 = vst [vmem:[#allocation45_spill] sm:$0xff] %v9408_v59  ;;  %v9411_v45 = vadd.f32 %v7151_v43, %v9240_v16 }
 0x39a   : > { %v9413_v39 = vpop.f32.mrf.mxu1  ;;  %v9415_v13 = vpop.f32.mrf.mxu0 }
 0x39b   : > { %11300 = vst [vmem:[#allocation46_spill] sm:$0xff] %v9411_v45  ;;  %11301 = vst [vmem:[#allocation47_spill] sm:$0xff] %v9413_v39 }
 0x39c   : > { %v9417_v47 = vpop.f32.mrf.mxu1  ;;  %v9419_v42 = vpop.f32.mrf.mxu0 }
 0x39d   : > { %11302 = vst [vmem:[#allocation48_spill] sm:$0xff] %v9417_v47 }
 0x39e   : > { %v9421_v8 = vpop.f32.mrf.mxu1  ;;  %v9423_v1 = vpop.f32.mrf.mxu0 }
 0x39f   : > { %11303 = vst [vmem:[#allocation49_spill] sm:$0xff] %v9421_v8 }
 0x3a0   : > { %v9425_v44 = vpop.f32.mrf.mxu1  ;;  %v9427_v19 = vpop.f32.mrf.mxu0 }
 0x3a1   : > { %11304 = vst [vmem:[#allocation50_spill] sm:$0xff] %v9425_v44 }
 0x3a2   : > { %v9429_v59 = vpop.f32.mrf.mxu1  ;;  %v9431_v16 = vpop.f32.mrf.mxu0 }
 0x3a3   : > { %11305 = vst [vmem:[#allocation51_spill] sm:$0xff] %v9429_v59  ;;  %11306 = vst [vmem:[#allocation52_spill] sm:$0xff] %v9431_v16 }
 0x3a4   : > { %v9433_v43 = vpop.f32.mrf.mxu1  ;;  %v9435_v39 = vpop.f32.mrf.mxu0 }
 0x3a5   : > { %11307 = vst [vmem:[#allocation53_spill] sm:$0xff] %v9433_v43  ;;  %11308 = vst [vmem:[#allocation54_spill] sm:$0xff] %v9435_v39 }
 0x3a6   : > { %v9437_v45 = vpop.f32.mrf.mxu1  ;;  %v9439_v47 = vpop.f32.mrf.mxu0 }
 0x3a7   : > { %11309 = vst [vmem:[#allocation55_spill] sm:$0xff] %v9437_v45  ;;  %11310 = vst [vmem:[#allocation56_spill] sm:$0xff] %v9439_v47 }
 0x3a8   : > { %v9441_v11 = vpop.f32.mrf.mxu1  ;;  %v9443_v8 = vpop.f32.mrf.mxu0 }
 0x3a9   : > { %11311 = vst [vmem:[#allocation57_spill] sm:$0xff] %v9441_v11  ;;  %11312 = vst [vmem:[#allocation58_spill] sm:$0xff] %v9443_v8  ;;  %v9464_v11 = vld [vmem:[%s11236_s10 + $0x6] sm:$0x3] }
 0x3aa   : > { %v9445_v38 = vpop.f32.mrf.mxu1  ;;  %v9447_v44 = vpop.f32.mrf.mxu0  ;;  %11321 = vst [vmem:[#allocation67_spill] sm:$0xff] %v9464_v11  ;;  %7606 = vmatprep.subr.msk.bf16.mxu0 %vm1701_vm10, %v9464_v11 }
 0x3ab   : > { %11313 = vst [vmem:[#allocation59_spill] sm:$0xff] %v9445_v38  ;;  %11314 = vst [vmem:[#allocation60_spill] sm:$0xff] %v9447_v44  ;;  %v4550_v44 = vrot.slane %v9355_v27, 1 }
 0x3ac   : > { %v9449_v15 = vpop.f32.mrf.mxu1  ;;  %v9451_v59 = vpop.f32.mrf.mxu0 }
 0x3ad   : > { %11315 = vst [vmem:[#allocation61_spill] sm:$0xff] %v9449_v15  ;;  %11316 = vst [vmem:[#allocation62_spill] sm:$0xff] %v9451_v59 }
 0x3ae   : > { %v9453_v16 = vpop.f32.mrf.mxu1  ;;  %v9455_v43 = vpop.f32.mrf.mxu0 }
 0x3af   : > { %11317 = vst [vmem:[#allocation63_spill] sm:$0xff] %v9453_v16  ;;  %11318 = vst [vmem:[#allocation64_spill] sm:$0xff] %v9455_v43 }
 0x3b0   : > { %v9457_v39 = vpop.f32.mrf.mxu1  ;;  %v9459_v45 = vpop.f32.mrf.mxu0 }
 0x3b1   : > { %11319 = vst [vmem:[#allocation65_spill] sm:$0xff] %v9457_v39  ;;  %11320 = vst [vmem:[#allocation66_spill] sm:$0xff] %v9459_v45  ;;  %v4549_v45 = vrot.slane %v9330_v5, 1 }
 0x3b2   : > { %v9468_v38 = vpop.f32.mrf.mxu1  ;;  %v9470_v15 = vpop.f32.mrf.mxu0 }
 0x3b3   : > { %11322 = vst [vmem:[#allocation68_spill] sm:$0xff] %v9468_v38  ;;  %v9487_v38 = vsel %vm2094_vm13, %v4549_v45, %v4550_v44  ;;  %v2003_v45 = vadd.f32 %v9020_v57, %v9039_v41  ;;  %v2019_v44 = vadd.f32 %v9043_v40, %v9059_v63  ;;  %v11342_v57 = vld [vmem:[#allocation4_spill] sm:$0xff] }
 0x3b4   : > { %v9472_v59 = vpop.f32.mrf.mxu0  ;;  %v9474_v16 = vpop.f32.mrf.mxu1  ;;  %11329 = vst [vmem:[#allocation75_spill] sm:$0xff] %v9487_v38  ;;  %v11339_v38 = vld [vmem:[#allocation5_spill] sm:$0xff]  ;;  %v2559_v41 = vadd.f32 %v11342_v57, %v9105_v56  ;;  %v2571_v56 = vadd.f32 %v9145_v17, %v9159_v54  ;;  %v2979_v54 = vadd.f32 %v9236_v6, %v9255_v2 }
 0x3b5   : > { %11323 = vst [vmem:[#allocation69_spill] sm:$0xff] %v9472_v59  ;;  %11324 = vst [vmem:[#allocation70_spill] sm:$0xff] %v9474_v16  ;;  %v11345_v2 = vld [vmem:[#allocation9_spill] sm:$0xff] }
 0x3b6   : > { %v9476_v43 = vpop.f32.mrf.mxu0  ;;  %v9482_v8 = vpop.f32.mrf.mxu1  ;;  %v2783_v17 = vadd.f32 %v9319_v4, %v2571_v56  ;;  %v11359_v56 = vld [vmem:[#allocation21_spill] sm:$0xff] }
 0x3b7   : > { %11325 = vst [vmem:[#allocation71_spill] sm:$0xff] %v9476_v43  ;;  %11327 = vst [vmem:[#allocation73_spill] sm:$0xff] %v9482_v8 }
 0x3b8   : > { %v9478_v39 = vpop.f32.mrf.mxu0  ;;  %v9491_v59 = vpop.f32.mrf.mxu1 }
 0x3b9   : > { %11326 = vst [vmem:[#allocation72_spill] sm:$0xff] %v9478_v39  ;;  %11331 = vst [vmem:[#allocation77_spill] sm:$0xff] %v9491_v59  ;;  %v2035_v59 = vadd.f32 %v11339_v38, %v9075_v55  ;;  %v2563_v55 = vadd.f32 %v9109_v35, %v9123_v22 }
 0x3ba   : > { %v9484_v47 = vpop.f32.mrf.mxu0  ;;  %v9497_v39 = vpop.f32.mrf.mxu1 }
 0x3bb   : > { %11328 = vst [vmem:[#allocation74_spill] sm:$0xff] %v9484_v47  ;;  %11334 = vst [vmem:[#allocation80_spill] sm:$0xff] %v9497_v39  ;;  %v11340_v39 = vld [vmem:[#allocation7_spill] sm:$0xff] }
 0x3bc   : > { %v9489_v11 = vpop.f32.mrf.mxu0  ;;  %v9503_v8 = vpop.f32.mrf.mxu1 }
 0x3bd   : > { %11330 = vst [vmem:[#allocation76_spill] sm:$0xff] %v9489_v11  ;;  %11337 = vst [vmem:[#allocation83_spill] sm:$0xff] %v9503_v8  ;;  %v2374_v8 = vadd.f32 %v9181_v28, %v2003_v45  ;;  %v2775_v28 = vadd.f32 %v9278_v26, %v2563_v55  ;;  %v11353_v45 = vld [vmem:[#allocation22_spill] sm:$0xff] }
 0x3be   : > { %v9493_v16 = vpop.f32.mrf.mxu0  ;;  %v9517_v11 = vpop.f32.mrf.mxu1 }
 0x3bf   : > { %11332 = vst [vmem:[#allocation78_spill] sm:$0xff] %v9493_v16  ;;  %v11341_v16 = vld [vmem:[#allocation6_spill] sm:$0xff] }
 0x3c0   : > { %v9495_v43 = vpop.f32.mrf.mxu0 }
 0x3c1   : > { %11333 = vst [vmem:[#allocation79_spill] sm:$0xff] %v9495_v43 }
 0x3c2   : > { %v9499_v5 = vpop.f32.mrf.mxu0 }
 0x3c3   : > { %11335 = vst [vmem:[#allocation81_spill] sm:$0xff] %v9499_v5  ;;  %v2051_v5 = vadd.f32 %v11341_v16, %v11340_v39  ;;  %v2771_v39 = vadd.f32 %v9259_v60, %v2559_v41  ;;  %v11356_v41 = vld [vmem:[#allocation18_spill] sm:$0xff] }
 0x3c4   : > { %v9501_v27 = vpop.f32.mrf.mxu0 }
 0x3c5   : > { %11336 = vst [vmem:[#allocation82_spill] sm:$0xff] %v9501_v27  ;;  %v2382_v27 = vadd.f32 %v9218_v23, %v2035_v59  ;;  %v2386_v63 = vadd.f32 %v9238_v3, %v2051_v5  ;;  %v9535_v23 = vpop.f32.mrf.mxu1  ;;  %v2575_v59 = vadd.f32 %v9163_v31, %v2374_v8  ;;  %v2977_v31 = vadd.f32 %v9242_v49, %v2771_v39  ;;  %v11344_v49 = vld [vmem:[#allocation13_spill] sm:$0xff]  ;;  %v11357_v39 = vld [vmem:[#allocation19_spill] sm:$0xff] }
 0x3c6   : > { %v9505_v47 = vpop.f32.mrf.mxu0  ;;  %v2986_v4 = vadd.f32 %v11345_v2, %v11344_v49  ;;  %v11348_v8 = vld [vmem:[#allocation17_spill] sm:$0xff]  ;;  %v11362_v2 = vld [vmem:[#allocation31_spill] sm:$0xff] }
 0x3c7   : > { %11338 = vst [vmem:[#allocation84_spill] sm:$0xff] %v9505_v47  ;;  %v2378_v47 = vadd.f32 %v9198_v46, %v2019_v44  ;;  %v2567_v46 = vadd.f32 %v9127_v36, %v9141_v33  ;;  %v2583_v35 = vadd.f32 %v9202_v20, %v2382_v27  ;;  %v2587_v26 = vadd.f32 %v9222_v21, %v2386_v63  ;;  %v11354_v44 = vld [vmem:[#allocation16_spill] sm:$0xff] }
 0x3c8   : > { %v9513_v43 = vpop.f32.mrf.mxu0  ;;  %v2978_v36 = vadd.f32 %v9226_v9, %v9245_v14  ;;  %v2976_v33 = vadd.f32 %v9231_v7, %v9250_v12  ;;  %v2787_v21 = vadd.f32 %v9344_v62, %v2575_v59  ;;  %v2980_v9 = vadd.f32 %v9252_v52, %v9269_v0  ;;  %v11343_v14 = vld [vmem:[#allocation8_spill] sm:$0xff]  ;;  %v11349_v62 = vld [vmem:[#allocation11_spill] sm:$0xff] }
 0x3c9   : > { %v2579_v3 = vadd.f32 %v9185_v30, %v2378_v47  ;;  %v2779_v60 = vadd.f32 %v9297_v25, %v2567_v46  ;;  %v2982_v30 = vadd.f32 %v9247_v34, %v9264_v37  ;;  %v2983_v7 = vadd.f32 %v9257_v29, %v9274_v53  ;;  %v9564_v25 = vpop.f32.mrf.mxu1  ;;  %v11346_v34 = vld [vmem:[#allocation15_spill] sm:$0xff]  ;;  %v11347_v37 = vld [vmem:[#allocation10_spill] sm:$0xff]  ;;  %v11350_v52 = vld [vmem:[#allocation12_spill] sm:$0xff] }
 0x3ca   : > { %v9524_v40 = vpop.f32.mrf.mxu0  ;;  %v2981_v12 = vadd.f32 %v11343_v14, %v2775_v28  ;;  %v2984_v47 = vadd.f32 %v11347_v37, %v11346_v34  ;;  %v2987_v16 = vadd.f32 %v11349_v62, %v11348_v8  ;;  %v11351_v29 = vld [vmem:[#allocation20_spill] sm:$0xff]  ;;  %v11352_v53 = vld [vmem:[#allocation14_spill] sm:$0xff]  ;;  %v2988_v57 = vadd.f32 %v11354_v44, %v11353_v45  ;;  %v11358_v46 = vld [vmem:[#allocation27_spill] sm:$0xff] }
 0x3cb   : > { %v2791_v6 = vadd.f32 %v9375_v48, %v2579_v3  ;;  %v2985_v0 = vadd.f32 %v11350_v52, %v2779_v60  ;;  %v2990_v27 = vadd.f32 %v11352_v53, %v11351_v29  ;;  %v11355_v48 = vld [vmem:[#allocation24_spill] sm:$0xff]  ;;  %v2795_v55 = vadd.f32 %v9396_v61, %v2583_v35  ;;  %v11360_v3 = vld [vmem:[#allocation29_spill] sm:$0xff]  ;;  %v11361_v60 = vld [vmem:[#allocation23_spill] sm:$0xff]  ;;  %v9603_v61 = vpop.f32.mrf.mxu1 }
 0x3cc   : > { %v9530_v38 = vpop.f32.mrf.mxu0  ;;  %v2991_v63 = vadd.f32 %v11356_v41, %v11355_v48  ;;  %v9584_v28 = vadd.f32 %v11357_v39, %v2783_v17  ;;  %v9588_v59 = vadd.f32 %v11359_v56, %v11358_v46  ;;  %v9592_v14 = vadd.f32 %v11361_v60, %v11360_v3  ;;  %v11363_v34 = vld [vmem:[#allocation25_spill] sm:$0xff]  ;;  %v11364_v8 = vld [vmem:[#allocation26_spill] sm:$0xff]  ;;  %11365 = vst [vmem:[#allocation5_spill] sm:$0xff] %v9603_v61  ;;  %v11366_v35 = vld [vmem:[#allocation28_spill] sm:$0xff] }
 0x3cd   : > { %v9598_v37 = vadd.f32 %v11363_v34, %v11362_v2  ;;  %v9601_v62 = vadd.f32 %v11364_v8, %v2787_v21  ;;  %v9607_v17 = vadd.f32 %v11366_v35, %v9360_v10  ;;  %v11367_v52 = vld [vmem:[#allocation33_spill] sm:$0xff]  ;;  %v2799_v53 = vadd.f32 %v9415_v13, %v2587_v26  ;;  %v11369_v45 = vld [vmem:[#allocation30_spill] sm:$0xff]  ;;  %v11370_v48 = vld [vmem:[#allocation32_spill] sm:$0xff] }
 0x3ce   : > { %v9542_v22 = vpop.f32.mrf.mxu0  ;;  %v9611_v29 = vsel %vm1701_vm10, %v11367_v52, 0  ;;  %v9616_v44 = vadd.f32 %v11369_v45, %v9366_v32  ;;  %v9620_v21 = vadd.f32 %v11370_v48, %v9371_v58  ;;  %v11371_v41 = vld [vmem:[#allocation34_spill] sm:$0xff]  ;;  %v3179_v10 = vadd.f32 %v9419_v42, %v2978_v36  ;;  %v11372_v26 = vld [vmem:[#allocation39_spill] sm:$0xff]  ;;  %v11374_v60 = vld [vmem:[#allocation36_spill] sm:$0xff] }
 0x3cf   : > { %11368 = vst [vmem:[#allocation7_spill] sm:$0xff] %v9611_v29  ;;  %v9623_v39 = vadd.f32 %v11371_v41, %v2791_v6  ;;  %v3177_v56 = vadd.f32 %v9423_v1, %v2976_v33  ;;  %v9631_v13 = vadd.f32 %v9362_v24, %v9382_v18  ;;  %v9635_v32 = vadd.f32 %v9368_v51, %v9387_v50  ;;  %v11373_v3 = vld [vmem:[#allocation35_spill] sm:$0xff]  ;;  %v11375_v42 = vld [vmem:[#allocation42_spill] sm:$0xff]  ;;  %v11376_v36 = vld [vmem:[#allocation37_spill] sm:$0xff]  ;;  %v9653_v50 = vpop.f32.mrf.mxu1 }
 0x3d0   : > { %v9556_v20 = vpop.f32.mrf.mxu0  ;;  %v3180_v58 = vadd.f32 %v9427_v19, %v2979_v54  ;;  %v9640_v6 = vadd.f32 %v11373_v3, %v11372_v26  ;;  %v9643_v2 = vadd.f32 %v11374_v60, %v2795_v55  ;;  %v9647_v1 = vadd.f32 %v11376_v36, %v11375_v42  ;;  %v11377_v24 = vld [vmem:[#allocation52_spill] sm:$0xff]  ;;  %v11378_v34 = vld [vmem:[#allocation54_spill] sm:$0xff]  ;;  %11379 = vst [vmem:[#allocation6_spill] sm:$0xff] %v9653_v50  ;;  %v11387_v42 = vld [vmem:[#allocation41_spill] sm:$0xff] }
 0x3d1   : > { %v3178_v18 = vadd.f32 %v11377_v24, %v2977_v31  ;;  %v3183_v51 = vadd.f32 %v11378_v34, %v2982_v30  ;;  %v11380_v19 = vld [vmem:[#allocation44_spill] sm:$0xff]  ;;  %v11381_v54 = vld [vmem:[#allocation38_spill] sm:$0xff]  ;;  %v9667_v31 = vadd.f32 %v11387_v42, %v2799_v53  ;;  %v11392_v50 = vld [vmem:[#allocation45_spill] sm:$0xff]  ;;  %v9685_v42 = vpop.f32.mrf.mxu1 }
 0x3d2   : > { %v9573_v5 = vpop.f32.mrf.mxu0  ;;  %v9657_v8 = vadd.f32 %v11381_v54, %v11380_v19  ;;  %v11382_v35 = vld [vmem:[#allocation46_spill] sm:$0xff]  ;;  %v11383_v52 = vld [vmem:[#allocation40_spill] sm:$0xff]  ;;  %v11391_v54 = vld [vmem:[#allocation43_spill] sm:$0xff] }
 0x3d3   : > { %v9661_v55 = vadd.f32 %v11383_v52, %v11382_v35  ;;  %v11384_v45 = vld [vmem:[#allocation56_spill] sm:$0xff]  ;;  %v11385_v41 = vld [vmem:[#allocation58_spill] sm:$0xff]  ;;  %v3391_v29 = vadd.f32 %v11391_v54, %v3179_v10  ;;  %v3389_v35 = vadd.f32 %v11392_v50, %v3177_v56 }
 0x3d4   : > { %v9594_v49 = vpop.f32.mrf.mxu0  ;;  %v3181_v48 = vadd.f32 %v11384_v45, %v2980_v9  ;;  %v3184_v26 = vadd.f32 %v11385_v41, %v2983_v7  ;;  %v11386_v3 = vld [vmem:[#allocation60_spill] sm:$0xff]  ;;  %v11389_v36 = vld [vmem:[#allocation62_spill] sm:$0xff]  ;;  %v3186_v9 = vadd.f32 %v9470_v15, %v2985_v0  ;;  %v11394_v7 = vld [vmem:[#allocation69_spill] sm:$0xff] }
 0x3d5   : > { %v3182_v60 = vadd.f32 %v11386_v3, %v2981_v12  ;;  %v3187_v24 = vadd.f32 %v11389_v36, %v2986_v4  ;;  %v11390_v34 = vld [vmem:[#allocation64_spill] sm:$0xff]  ;;  %v11393_v52 = vld [vmem:[#allocation66_spill] sm:$0xff]  ;;  %v3191_v45 = vadd.f32 %v11394_v7, %v2990_v27  ;;  %v11395_v41 = vld [vmem:[#allocation47_spill] sm:$0xff] }
 0x3d6   : > { %v9625_v46 = vpop.f32.mrf.mxu0  ;;  %v3185_v19 = vadd.f32 %v11390_v34, %v2984_v47  ;;  %v3188_v61 = vadd.f32 %v11393_v52, %v2987_v16  ;;  %v9681_v53 = vld [vmem:[%s11234_s8] ss:$0 sm:$0xff]  ;;  %v3392_v4 = vadd.f32 %v11395_v41, %v3180_v58  ;;  %v11396_v3 = vld [vmem:[#allocation71_spill] sm:$0xff]  ;;  %v11398_v16 = vld [vmem:[#allocation49_spill] sm:$0xff] }
 0x3d7   : > { %v3189_v47 = vadd.f32 %v11396_v3, %v2988_v57  ;;  %v11397_v56 = vld [vmem:[#allocation48_spill] sm:$0xff]  ;;  %v3395_v36 = vadd.f32 %v11398_v16, %v3183_v51  ;;  %v11400_v54 = vld [vmem:[#allocation50_spill] sm:$0xff]  ;;  %v11401_v58 = vld [vmem:[#allocation51_spill] sm:$0xff] }
 0x3d8   : > { %v9649_v33 = vpop.f32.mrf.mxu0  ;;  %v3390_v50 = vadd.f32 %v11397_v56, %v3178_v18  ;;  %v11399_v15 = vld [vmem:[#allocation72_spill] sm:$0xff]  ;;  %v3393_v52 = vadd.f32 %v11400_v54, %v3181_v48  ;;  %v3396_v7 = vadd.f32 %v11401_v58, %v3184_v26  ;;  %v11402_v57 = vld [vmem:[#allocation53_spill] sm:$0xff]  ;;  %v11405_v16 = vld [vmem:[#allocation59_spill] sm:$0xff] }
 0x3d9   : > { %v3192_v0 = vadd.f32 %v11399_v15, %v2991_v63  ;;  %v9693_v27 = vld [vmem:[%s11235_s9] ss:$0 sm:$0xff]  ;;  %v9698_v41 = vadd.f32 %v11402_v57, %v3182_v60  ;;  %v11404_v63 = vld [vmem:[#allocation57_spill] sm:$0xff]  ;;  %v9708_v15 = vadd.f32 %v11405_v16, %v3188_v61  ;;  %v11407_v26 = vld [vmem:[#allocation63_spill] sm:$0xff] }
 0x3da   : > { %v9669_v30 = vpop.f32.mrf.mxu0  ;;  %v9705_v3 = vadd.f32 %v11404_v63, %v3185_v19  ;;  %v9714_v54 = vadd.f32 %v11407_v26, %v3191_v45  ;;  %v11408_v60 = vld [vmem:[#allocation67_spill] sm:$0xff]  ;;  %v11409_v58 = vld [vmem:[#allocation65_spill] sm:$0xff]  ;;  %v11411_v45 = vld [vmem:[#allocation76_spill] sm:$0xff] }
 0x3db   : > { %11388 = vst [vmem:[#allocation4_spill] sm:$0xff] %v9669_v30  ;;  %v11406_v30 = vld [vmem:[#allocation61_spill] sm:$0xff]  ;;  %v9725_v61 = vadd.f32 %v11409_v58, %v3189_v47  ;;  %v3195_v57 = vadd.f32 %v11411_v45, %v9588_v59  ;;  %v11413_v26 = vld [vmem:[#allocation68_spill] sm:$0xff]  ;;  %v11416_v59 = vld [vmem:[#allocation82_spill] sm:$0xff] }
 0x3dc   : > { %v7258_v12 = vpop.f32.mrf.mxu0  ;;  %v9711_v48 = vadd.f32 %v11406_v30, %v3186_v9  ;;  %v11410_v30 = vld [vmem:[#allocation74_spill] sm:$0xff]  ;;  %v3199_v45 = vadd.f32 %v11416_v59, %v9607_v17 }
 0x3dd   : > { %v3597_v10 = vadd.f32 %v7258_v12, %v3391_v29  ;;  %v11403_v12 = vld [vmem:[#allocation55_spill] sm:$0xff]  ;;  %v3190_v9 = vadd.f32 %v11410_v30, %v9584_v28  ;;  %v11415_v28 = vld [vmem:[#allocation81_spill] sm:$0xff] }
 0x3de   : > { %v3468_v34 = vpop.f32.mrf.mxu0  ;;  %v9702_v51 = vadd.f32 %v11403_v12, %v3187_v24  ;;  %v11412_v12 = vld [vmem:[#allocation78_spill] sm:$0xff]  ;;  %v3194_v30 = vadd.f32 %v11415_v28, %v9601_v62  ;;  %v3200_v62 = vadd.f32 %v9513_v43, %v9620_v21  ;;  %v11420_v28 = vld [vmem:[#allocation77_spill] sm:$0xff]  ;;  %v11421_v21 = vld [vmem:[#allocation80_spill] sm:$0xff] }
 0x3df   : > { %v3636_v29 = vmul.f32 %v9681_v53, %v3597_v10  ;;  %v3595_v18 = vadd.f32 %v3468_v34, %v3389_v35  ;;  %v9718_v10 = vsel %vm1701_vm10, %v11408_v60, 0  ;;  %v9720_v35 = vpop.f32.mrf.mxu1  ;;  %v3193_v63 = vadd.f32 %v11412_v12, %v9592_v14  ;;  %v11417_v14 = vld [vmem:[#allocation84_spill] sm:$0xff] }
 0x3e0   : > { %v7259_v56 = vpop.f32.mrf.mxu0  ;;  %v9734_v60 = vadd.f32 %v11413_v26, %v3192_v0  ;;  %v3197_v12 = vadd.f32 %v11417_v14, %v9616_v44 }
 0x3e1   : > { %v3675_v24 = vadd.f32 %v9693_v27, %v3636_v29  ;;  %v3634_v19 = vmul.f32 %v9681_v53, %v3595_v18  ;;  %v3598_v34 = vadd.f32 %v7259_v56, %v3392_v4  ;;  %v11414_v56 = vld [vmem:[#allocation79_spill] sm:$0xff]  ;;  %v9746_v26 = vpop.f32.mrf.mxu1  ;;  %v9760_v59 = vadd.f32 %v11420_v28, %v3193_v63 }
 0x3e2   : > { %v3471_v16 = vpop.f32.mrf.mxu0  ;;  %v3196_v58 = vadd.f32 %v11414_v56, %v9598_v37  ;;  %v11419_v56 = vld [vmem:[#allocation73_spill] sm:$0xff]  ;;  %v9775_v63 = vadd.f32 %v9535_v23, %v3197_v12  ;;  %v9787_v23 = vadd.f32 %v9564_v25, %v3200_v62  ;;  %v3207_v25 = vadd.f32 %v9594_v49, %v9647_v1  ;;  %v11424_v49 = vld [vmem:[#allocation6_spill] sm:$0xff] }
 0x3e3   : > { %v3707_v29 = vmax.f32 %v3675_v24, 0.0  ;;  %v3673_v18 = vadd.f32 %v9693_v27, %v3634_v19  ;;  %v3637_v4 = vmul.f32 %v9681_v53, %v3598_v34  ;;  %v3596_v47 = vadd.f32 %v3471_v16, %v3390_v50  ;;  %v11418_v16 = vld [vmem:[#allocation70_spill] sm:$0xff] }
 0x3e4   : > { %v7262_v0 = vpop.f32.mrf.mxu0  ;;  %v9754_v17 = vadd.f32 %v11418_v16, %v3190_v9  ;;  %v9757_v44 = vadd.f32 %v11419_v56, %v3195_v57  ;;  %v9766_v14 = vadd.f32 %v11421_v21, %v3196_v58  ;;  %v11422_v9 = vld [vmem:[#allocation83_spill] sm:$0xff]  ;;  %v9772_v57 = vadd.f32 %v9517_v11, %v3199_v45 }
 0x3e5   : > { %3794 = vst.msk [vmem:[#allocation3 + $0x31] sm:$0xff] %vm474_vm1, %v3707_v29  ;;  %v3705_v24 = vmax.f32 %v3673_v18, 0.0  ;;  %v3676_v50 = vadd.f32 %v9693_v27, %v3637_v4  ;;  %v3635_v19 = vmul.f32 %v9681_v53, %v3596_v47  ;;  %v3601_v37 = vadd.f32 %v7262_v0, %v3395_v36  ;;  %v7252_v29 = vpop.f32.mrf.mxu1 }
 0x3e6   : > { %v3484_v34 = vpop.f32.mrf.mxu0  ;;  %v9769_v0 = vadd.f32 %v11422_v9, %v3194_v30  ;;  %v3198_v58 = vadd.f32 %v9524_v40, %v9623_v39  ;;  %v3203_v30 = vadd.f32 %v9530_v38, %v9631_v13  ;;  %v3201_v11 = vadd.f32 %v9542_v22, %v9635_v32 }
 0x3e7   : > { %3792 = vst.msk [vmem:[#allocation3 + $0x19] sm:$0xff] %vm474_vm1, %v3705_v24  ;;  %v3708_v18 = vmax.f32 %v3676_v50, 0.0  ;;  %v3674_v4 = vadd.f32 %v9693_v27, %v3635_v19  ;;  %v3640_v36 = vmul.f32 %v9681_v53, %v3601_v37  ;;  %v3599_v47 = vadd.f32 %v3484_v34, %v3393_v52  ;;  %v3374_v12 = vpop.f32.mrf.mxu1 }
 0x3e8   : > { %v7263_v43 = vpop.f32.mrf.mxu0  ;;  %v3204_v38 = vadd.f32 %v9556_v20, %v9640_v6  ;;  %v3202_v22 = vadd.f32 %v9573_v5, %v9643_v2  ;;  %v3205_v39 = vadd.f32 %v9625_v46, %v9657_v8  ;;  %v3208_v20 = vadd.f32 %v9649_v33, %v9661_v55  ;;  %v11423_v6 = vld [vmem:[#allocation5_spill] sm:$0xff] }
 0x3e9   : > { %3795 = vst.msk [vmem:[#allocation3 + $0x39] sm:$0xff] %vm474_vm1, %v3708_v18  ;;  %v3706_v24 = vmax.f32 %v3674_v4, 0.0  ;;  %v3679_v50 = vadd.f32 %v9693_v27, %v3640_v36  ;;  %v3638_v52 = vmul.f32 %v9681_v53, %v3599_v47  ;;  %v3602_v19 = vadd.f32 %v7263_v43, %v3396_v7  ;;  %v7253_v8 = vpop.f32.mrf.mxu1 }
 0x3ea   : > { %v3487_v45 = vpop.f32.mrf.mxu0  ;;  %v9808_v2 = vadd.f32 %v11423_v6, %v3198_v58  ;;  %v9811_v1 = vadd.f32 %v11424_v49, %v3203_v30  ;;  %v9814_v46 = vadd.f32 %v9685_v42, %v3201_v11  ;;  %v9820_v55 = vadd.f32 %v7252_v29, %v3207_v25 }
 0x3eb   : > { %3793 = vst.msk [vmem:[#allocation3 + $0x21] sm:$0xff] %vm474_vm1, %v3706_v24  ;;  %v3711_v37 = vmax.f32 %v3679_v50, 0.0  ;;  %v3677_v34 = vadd.f32 %v9693_v27, %v3638_v52  ;;  %v3641_v7 = vmul.f32 %v9681_v53, %v3602_v19  ;;  %v3600_v40 = vadd.f32 %v3487_v45, %v9698_v41  ;;  %v11425_v50 = vld [vmem:[#allocation4_spill] sm:$0xff] }
 0x3ec   : > { %v7266_v13 = vpop.f32.mrf.mxu0  ;;  %v9822_v18 = vadd.f32 %v3374_v12, %v3205_v39  ;;  %v9825_v42 = vadd.f32 %v9720_v35, %v3204_v38  ;;  %v9828_v43 = vadd.f32 %v9746_v26, %v3202_v22  ;;  %v3830_v24 = vld [vmem:[#allocation3 + $0x30] sm:$0xff]  ;;  %v9836_v52 = vadd.f32 %v11425_v50, %v9667_v31 }
 0x3ed   : > { %3798 = vst.msk [vmem:[#allocation3 + $0x61] sm:$0xff] %vm474_vm1, %v3711_v37  ;;  %v3709_v32 = vmax.f32 %v3677_v34, 0.0  ;;  %v3680_v62 = vadd.f32 %v9693_v27, %v3641_v7  ;;  %v3639_v41 = vmul.f32 %v9681_v53, %v3600_v40  ;;  %v3605_v16 = vadd.f32 %v7266_v13, %v9702_v51 }
 0x3ee   : > { %v3500_v5 = vpop.f32.mrf.mxu0  ;;  %v9838_v19 = vadd.f32 %v7253_v8, %v3208_v20  ;;  %v3827_v31 = vld [vmem:[#allocation3 + $0x18] sm:$0xff] }
 0x3ef   : > { %3796 = vst.msk [vmem:[#allocation3 + $0x49] sm:$0xff] %vm474_vm1, %v3709_v32  ;;  %v3712_v56 = vmax.f32 %v3680_v62, 0.0  ;;  %v3678_v28 = vadd.f32 %v9693_v27, %v3639_v41  ;;  %v3644_v51 = vmul.f32 %v9681_v53, %v3605_v16  ;;  %v3603_v33 = vadd.f32 %v3500_v5, %v9705_v3 }
 0x3f0   : > { %v7267_v4 = vpop.f32.mrf.mxu0  ;;  %v3831_v36 = vld [vmem:[#allocation3 + $0x38] sm:$0xff]  ;;  %v3832_v47 = vld [vmem:[#allocation3 + $0x40] sm:$0x3] }
 0x3f1   : > { %3799 = vst.msk [vmem:[#allocation3 + $0x69] sm:$0xff] %vm474_vm1, %v3712_v56  ;;  %v3710_v21 = vmax.f32 %v3678_v28, 0.0  ;;  %v3683_v9 = vadd.f32 %v9693_v27, %v3644_v51  ;;  %v3642_v3 = vmul.f32 %v9681_v53, %v3603_v33  ;;  %v3606_v29 = vadd.f32 %v7267_v4, %v9708_v15 }
 0x3f2   : > { %v3503_v35 = vpop.f32.mrf.mxu0  ;;  %v3828_v58 = vld [vmem:[#allocation3 + $0x20] sm:$0xff]  ;;  %v9840_v26 = vpack.c.bf16 %v3831_v36, %v3830_v24  ;;  %v3829_v30 = vld [vmem:[#allocation3 + $0x28] sm:$0x3]  ;;  %v9842_v11 = vpack.c.bf16 %v3832_v47, %v3832_v47 }
 0x3f3   : > { %3797 = vst.msk [vmem:[#allocation3 + $0x51] sm:$0xff] %vm474_vm1, %v3710_v21  ;;  %v3715_v45 = vmax.f32 %v3683_v9, 0.0  ;;  %v3681_v12 = vadd.f32 %v9693_v27, %v3642_v3  ;;  %v3645_v15 = vmul.f32 %v9681_v53, %v3606_v29  ;;  %v3604_v37 = vadd.f32 %v3503_v35, %v9711_v48  ;;  %v9861_v48 = vld [vmem:[%s11236_s10 + $0xa] sm:$0x3] }
 0x3f4   : > { %v7270_v34 = vpop.f32.mrf.mxu0  ;;  %v9848_v7 = vpack.c.bf16 %v3828_v58, %v3827_v31  ;;  %v9850_v40 = vpack.c.bf16 %v3829_v30, %v3829_v30  ;;  %v3940_v38 = vshrl.u32 %v9840_v26, 16  ;;  %v3942_v22 = vshll.u32 %v9840_v26, 16  ;;  %v3836_v3 = vld [vmem:[#allocation3 + $0x60] sm:$0xff] }
 0x3f5   : > { %3802 = vst.msk [vmem:[#allocation3 + $0x91] sm:$0xff] %vm474_vm1, %v3715_v45  ;;  %v3713_v25 = vmax.f32 %v3681_v12, 0.0  ;;  %v3684_v39 = vadd.f32 %v9693_v27, %v3645_v15  ;;  %v3643_v13 = vmul.f32 %v9681_v53, %v3604_v37  ;;  %v3609_v32 = vadd.f32 %v7270_v34, %v9714_v54 }
 0x3f6   : > { %7325 = vmatmul.mubr.msk.bf16.vlgmr.msra.gmra.mxu0 %vm474_vm1, %v9848_v7  ;;  %v3516_v62 = vpop.f32.mrf.mxu0  ;;  %v3928_v41 = vshrl.u32 %v9848_v7, 16  ;;  %v3930_v16 = vshll.u32 %v9848_v7, 16  ;;  %v3935_v20 = vshll.u32 %v9850_v40, 16  ;;  %v3944_v5 = vrot.slane %v3942_v22, 1 }
 0x3f7   : > { %3800 = vst.msk [vmem:[#allocation3 + $0x79] sm:$0xff] %vm474_vm1, %v3713_v25  ;;  %v3716_v6 = vmax.f32 %v3684_v39, 0.0  ;;  %v3682_v54 = vadd.f32 %v9693_v27, %v3643_v13  ;;  %v3648_v49 = vmul.f32 %v9681_v53, %v3609_v32  ;;  %v3607_v8 = vadd.f32 %v3516_v62, %v9725_v61  ;;  %7328 = vmatprep.mubr.msk.bf16.mxu0 %vm474_vm1, %v9840_v26  ;;  %v9903_v13 = vld [vmem:[%s11236_s10 + $0x8] sm:$0x3] }
 0x3f8   : > { %7391 = vmatpush3.bf16.msra.mxu0 %v9718_v10  ;;  %v7271_v56 = vpop.f32.mrf.mxu0  ;;  %v3932_v28 = vrot.slane %v3930_v16, 1  ;;  %v3937_v51 = vrot.slane %v3935_v20, 1  ;;  %v3945_v33 = vor.u32 %v3944_v5, %v3940_v38  ;;  %v3947_v4 = vshll.u32 %v9842_v11, 16  ;;  %v3837_v36 = vld [vmem:[#allocation3 + $0x68] sm:$0xff]  ;;  %v3838_v47 = vld [vmem:[#allocation3 + $0x70] sm:$0x3] }
 0x3f9   : > { %7608 = vmatprep.subr.msk.bf16.mxu0 %vm1701_vm10, %v9861_v48  ;;  %3803 = vst.msk [vmem:[#allocation3 + $0x99] sm:$0xff] %vm474_vm1, %v3716_v6  ;;  %v3714_v21 = vmax.f32 %v3682_v54, 0.0  ;;  %v3687_v61 = vadd.f32 %v9693_v27, %v3648_v49  ;;  %v3646_v9 = vmul.f32 %v9681_v53, %v3607_v8  ;;  %v3610_v10 = vadd.f32 %v7271_v56, %v9734_v60  ;;  %v3833_v60 = vld [vmem:[#allocation3 + $0x48] sm:$0xff] }
 0x3fa   : > { %v3519_v29 = vpop.f32.mrf.mxu0  ;;  %v3933_v24 = vor.u32 %v3932_v28, %v3928_v41  ;;  %v3949_v50 = vrot.slane %v3947_v4, 1  ;;  %v3834_v35 = vld [vmem:[#allocation3 + $0x50] sm:$0xff]  ;;  %v9882_v58 = vpack.c.bf16 %v3837_v36, %v3836_v3  ;;  %v3835_v30 = vld [vmem:[#allocation3 + $0x58] sm:$0x3]  ;;  %v9884_v45 = vpack.c.bf16 %v3838_v47, %v3838_v47  ;;  %v11426_v16 = vld [vmem:[#allocation7_spill] sm:$0xff] }
 0x3fb   : > { %3801 = vst.msk [vmem:[#allocation3 + $0x81] sm:$0xff] %vm474_vm1, %v3714_v21  ;;  %v3719_v12 = vmax.f32 %v3687_v61, 0.0  ;;  %v3685_v15 = vadd.f32 %v9693_v27, %v3646_v9  ;;  %v3649_v37 = vmul.f32 %v9681_v53, %v3610_v10  ;;  %v3608_v31 = vadd.f32 %v3519_v29, %v9754_v17 }
 0x3fc   : > { %v7274_v34 = vpop.f32.mrf.mxu0  ;;  %v9891_v38 = vsel %vm1458_vm12, %v3933_v24, %v3937_v51  ;;  %v9894_v22 = vsel %vm1458_vm12, %v3945_v33, %v3949_v50  ;;  %v9896_v25 = vpack.c.bf16 %v3834_v35, %v3833_v60  ;;  %v9898_v39 = vpack.c.bf16 %v3835_v30, %v3835_v30  ;;  %v3842_v3 = vld [vmem:[#allocation3 + $0x90] sm:$0xff] }
 0x3fd   : > { %3806 = vst.msk [vmem:[#allocation3 + $0xc1] sm:$0xff] %vm474_vm1, %v3719_v12  ;;  %v3717_v17 = vmax.f32 %v3685_v15, 0.0  ;;  %v3688_v32 = vadd.f32 %v9693_v27, %v3649_v37  ;;  %v3647_v62 = vmul.f32 %v9681_v53, %v3608_v31  ;;  %v3613_v41 = vadd.f32 %v7274_v34, %v9757_v44  ;;  %7291 = vmatmul.mubr.msk.bf16.vlgmr.msra.gmra.mxu1 %vm474_vm1, %v9891_v38 }
 0x3fe   : > { %7357 = vmatpush3.bf16.msra.mxu1 %v11426_v16  ;;  %7294 = vmatprep.mubr.msk.bf16.mxu1 %vm474_vm1, %v9894_v22  ;;  %v3532_v20 = vpop.f32.mrf.mxu0  ;;  %v3952_v5 = vshrl.u32 %v9896_v25, 16  ;;  %v3954_v6 = vshll.u32 %v9896_v25, 16  ;;  %v3959_v54 = vshll.u32 %v9898_v39, 16  ;;  %v3964_v49 = vshrl.u32 %v9882_v58, 16 }
 0x3ff   : > { %3804 = vst.msk [vmem:[#allocation3 + $0xa9] sm:$0xff] %vm474_vm1, %v3717_v17  ;;  %v3720_v44 = vmax.f32 %v3688_v32, 0.0  ;;  %v3686_v8 = vadd.f32 %v9693_v27, %v3647_v62  ;;  %v3652_v56 = vmul.f32 %v9681_v53, %v3613_v41  ;;  %7329 = vmatmul.mubr.msk.bf16.gmra.mxu0 %vm474_vm1, %v9896_v25  ;;  %v3611_v28 = vadd.f32 %v3532_v20, %v9760_v59  ;;  %v3839_v17 = vld [vmem:[#allocation3 + $0x78] sm:$0xff] }
 0x400   : > { %7607 = vmatprep.subr.msk.bf16.mxu1 %vm1701_vm10, %v9903_v13  ;;  %7332 = vmatprep.mubr.msk.bf16.mxu0 %vm474_vm1, %v9882_v58  ;;  %v7275_v51 = vpop.f32.mrf.mxu0  ;;  %v3956_v33 = vrot.slane %v3954_v6, 1  ;;  %v3961_v4 = vrot.slane %v3959_v54, 1  ;;  %v3966_v36 = vshll.u32 %v9882_v58, 16  ;;  %v3971_v47 = vshll.u32 %v9884_v45, 16  ;;  %v3843_v21 = vld [vmem:[#allocation3 + $0x98] sm:$0xff] }
 0x401   : > { %3807 = vst.msk [vmem:[#allocation3 + $0xc9] sm:$0xff] %vm474_vm1, %v3720_v44  ;;  %v3718_v61 = vmax.f32 %v3686_v8, 0.0  ;;  %v3691_v9 = vadd.f32 %v9693_v27, %v3652_v56  ;;  %v3650_v59 = vmul.f32 %v9681_v53, %v3611_v28  ;;  %v3614_v10 = vadd.f32 %v7275_v51, %v9766_v14 }
 0x402   : > { %v3535_v29 = vpop.f32.mrf.mxu0  ;;  %v3957_v24 = vor.u32 %v3956_v33, %v3952_v5  ;;  %v3968_v50 = vrot.slane %v3966_v36, 1  ;;  %v3973_v35 = vrot.slane %v3971_v47, 1  ;;  %v3840_v30 = vld [vmem:[#allocation3 + $0x80] sm:$0xff]  ;;  %v9934_v12 = vpack.c.bf16 %v3843_v21, %v3842_v3  ;;  %v3841_v15 = vld [vmem:[#allocation3 + $0x88] sm:$0x3] }
 0x403   : > { %3805 = vst.msk [vmem:[#allocation3 + $0xb1] sm:$0xff] %vm474_vm1, %v3718_v61  ;;  %v3723_v37 = vmax.f32 %v3691_v9, 0.0  ;;  %v3689_v31 = vadd.f32 %v9693_v27, %v3650_v59  ;;  %v3653_v60 = vmul.f32 %v9681_v53, %v3614_v10  ;;  %v3612_v34 = vadd.f32 %v3535_v29, %v9769_v0  ;;  %v3844_v0 = vld [vmem:[#allocation3 + $0xa0] sm:$0x3] }
 0x404   : > { %v7278_v14 = vpop.f32.mrf.mxu0  ;;  %v9941_v32 = vsel %vm1458_vm12, %v3957_v24, %v3961_v4  ;;  %v3969_v62 = vor.u32 %v3968_v50, %v3964_v49  ;;  %v9943_v41 = vpack.c.bf16 %v3840_v30, %v3839_v17  ;;  %v9945_v16 = vpack.c.bf16 %v3841_v15, %v3841_v15  ;;  %v3848_v24 = vld [vmem:[#allocation3 + $0xc0] sm:$0xff] }
 0x405   : > { %3810 = vst.msk [vmem:[#allocation3 + $0xf1] sm:$0xff] %vm474_vm1, %v3723_v37  ;;  %v3721_v20 = vmax.f32 %v3689_v31, 0.0  ;;  %v3692_v5 = vadd.f32 %v9693_v27, %v3653_v60  ;;  %v3651_v6 = vmul.f32 %v9681_v53, %v3612_v34  ;;  %v3617_v54 = vadd.f32 %v7278_v14, %v9772_v57  ;;  %7295 = vmatmul.mubr.msk.bf16.gmra.mxu1 %vm474_vm1, %v9941_v32 }
 0x406   : > { %v9954_v44 = vsel %vm1458_vm12, %v3969_v62, %v3973_v35  ;;  %v3548_v49 = vpop.f32.mrf.mxu0  ;;  %v3976_v8 = vshrl.u32 %v9943_v41, 16  ;;  %v3978_v56 = vshll.u32 %v9943_v41, 16  ;;  %v3983_v28 = vshll.u32 %v9945_v16, 16 }
 0x407   : > { %3808 = vst.msk [vmem:[#allocation3 + $0xd9] sm:$0xff] %vm474_vm1, %v3721_v20  ;;  %v3724_v51 = vmax.f32 %v3692_v5, 0.0  ;;  %v3690_v33 = vadd.f32 %v9693_v27, %v3651_v6  ;;  %v3656_v57 = vmul.f32 %v9681_v53, %v3617_v54  ;;  %7298 = vmatprep.mubr.msk.bf16.mxu1 %vm474_vm1, %v9954_v44  ;;  %7333 = vmatmul.mubr.msk.bf16.gmra.mxu0 %vm474_vm1, %v9943_v41  ;;  %v3988_v9 = vshrl.u32 %v9934_v12, 16 }
 0x408   : > { %v3615_v4 = vadd.f32 %v3548_v49, %v9775_v63  ;;  %7336 = vmatprep.mubr.msk.bf16.mxu0 %vm474_vm1, %v9934_v12  ;;  %v7279_v36 = vpop.f32.mrf.mxu0  ;;  %v3980_v47 = vrot.slane %v3978_v56, 1  ;;  %v3985_v21 = vrot.slane %v3983_v28, 1  ;;  %v9969_v61 = vpack.c.bf16 %v3844_v0, %v3844_v0  ;;  %v3849_v59 = vld [vmem:[#allocation3 + $0xc8] sm:$0xff] }
 0x409   : > { %3811 = vst.msk [vmem:[#allocation3 + $0xf9] sm:$0xff] %vm474_vm1, %v3724_v51  ;;  %v3722_v10 = vmax.f32 %v3690_v33, 0.0  ;;  %v3695_v3 = vadd.f32 %v9693_v27, %v3656_v57  ;;  %v3618_v63 = vadd.f32 %v7279_v36, %v9787_v23  ;;  %v3990_v30 = vshll.u32 %v9934_v12, 16  ;;  %v3845_v23 = vld [vmem:[#allocation3 + $0xa8] sm:$0xff] }
 0x40a   : > { %v3654_v29 = vmul.f32 %v9681_v53, %v3615_v4  ;;  %v3551_v50 = vpop.f32.mrf.mxu0  ;;  %v3981_v35 = vor.u32 %v3980_v47, %v3976_v8  ;;  %v3995_v15 = vshll.u32 %v9969_v61, 16  ;;  %v3846_v37 = vld [vmem:[#allocation3 + $0xb0] sm:$0xff]  ;;  %v9978_v31 = vpack.c.bf16 %v3849_v59, %v3848_v24  ;;  %v3847_v62 = vld [vmem:[#allocation3 + $0xb8] sm:$0x3] }
 0x40b   : > { %3809 = vst.msk [vmem:[#allocation3 + $0xe1] sm:$0xff] %vm474_vm1, %v3722_v10  ;;  %v3727_v60 = vmax.f32 %v3695_v3, 0.0  ;;  %v3657_v17 = vmul.f32 %v9681_v53, %v3618_v63  ;;  %v3616_v14 = vadd.f32 %v3551_v50, %v9808_v2  ;;  %v3992_v6 = vrot.slane %v3990_v30, 1  ;;  %v3850_v2 = vld [vmem:[#allocation3 + $0xd0] sm:$0x3] }
 0x40c   : > { %v3693_v34 = vadd.f32 %v9693_v27, %v3654_v29  ;;  %v7282_v20 = vpop.f32.mrf.mxu0  ;;  %v9985_v5 = vsel %vm1458_vm12, %v3981_v35, %v3985_v21  ;;  %v3997_v54 = vrot.slane %v3995_v15, 1  ;;  %v9987_v0 = vpack.c.bf16 %v3846_v37, %v3845_v23 }
 0x40d   : > { %3814 = vst.msk [vmem:[#allocation3 + $0x121] sm:$0xff] %vm474_vm1, %v3727_v60  ;;  %v3696_v8 = vadd.f32 %v9693_v27, %v3657_v17  ;;  %v3655_v56 = vmul.f32 %v9681_v53, %v3616_v14  ;;  %v3621_v28 = vadd.f32 %v7282_v20, %v9811_v1  ;;  %7299 = vmatmul.mubr.msk.bf16.gmra.mxu1 %vm474_vm1, %v9985_v5  ;;  %v4012_v60 = vshrl.u32 %v9978_v31, 16 }
 0x40e   : > { %v3725_v49 = vmax.f32 %v3693_v34, 0.0  ;;  %v3993_v51 = vor.u32 %v3992_v6, %v3988_v9  ;;  %v3564_v33 = vpop.f32.mrf.mxu0  ;;  %v9995_v57 = vpack.c.bf16 %v3847_v62, %v3847_v62  ;;  %v4000_v4 = vshrl.u32 %v9987_v0, 16  ;;  %v3851_v6 = vld [vmem:[#allocation3 + $0xd8] sm:$0xff] }
 0x40f   : > { %v4002_v36 = vshll.u32 %v9987_v0, 16  ;;  %v3728_v47 = vmax.f32 %v3696_v8, 0.0  ;;  %v3694_v21 = vadd.f32 %v9693_v27, %v3655_v56  ;;  %v3660_v59 = vmul.f32 %v9681_v53, %v3621_v28  ;;  %7337 = vmatmul.mubr.msk.bf16.gmra.mxu0 %vm474_vm1, %v9987_v0 }
 0x410   : > { %3812 = vst.msk [vmem:[#allocation3 + $0x109] sm:$0xff] %vm474_vm1, %v3725_v49  ;;  %v3619_v1 = vadd.f32 %v3564_v33, %v9814_v46  ;;  %v10006_v9 = vsel %vm1458_vm12, %v3993_v51, %v3997_v54  ;;  %7340 = vmatprep.mubr.msk.bf16.mxu0 %vm474_vm1, %v9978_v31  ;;  %v7283_v10 = vpop.f32.mrf.mxu0  ;;  %v4007_v29 = vshll.u32 %v9995_v57, 16  ;;  %v10011_v63 = vpack.c.bf16 %v3850_v2, %v3850_v2  ;;  %v3855_v54 = vld [vmem:[#allocation3 + $0xf8] sm:$0xff]  ;;  %v3377_v51 = vpop.f32.mrf.mxu1 }
 0x411   : > { %v4004_v3 = vrot.slane %v4002_v36, 1  ;;  %3815 = vst.msk [vmem:[#allocation3 + $0x129] sm:$0xff] %vm474_vm1, %v3728_v47  ;;  %v3726_v24 = vmax.f32 %v3694_v21, 0.0  ;;  %v3699_v50 = vadd.f32 %v9693_v27, %v3660_v59  ;;  %7302 = vmatprep.mubr.msk.bf16.mxu1 %vm474_vm1, %v10006_v9  ;;  %v3622_v35 = vadd.f32 %v7283_v10, %v9825_v42  ;;  %v3854_v47 = vld [vmem:[#allocation3 + $0xf0] sm:$0xff] }
 0x412   : > { %v3658_v46 = vmul.f32 %v9681_v53, %v3619_v1  ;;  %v3567_v30 = vpop.f32.mrf.mxu0  ;;  %v4009_v37 = vrot.slane %v4007_v29, 1  ;;  %v4014_v34 = vshll.u32 %v9978_v31, 16  ;;  %v3852_v17 = vld [vmem:[#allocation3 + $0xe0] sm:$0xff]  ;;  %v3853_v42 = vld [vmem:[#allocation3 + $0xe8] sm:$0x3]  ;;  %v4019_v28 = vshll.u32 %v10011_v63, 16 }
 0x413   : > { %v4005_v15 = vor.u32 %v4004_v3, %v4000_v4  ;;  %3813 = vst.msk [vmem:[#allocation3 + $0x111] sm:$0xff] %vm474_vm1, %v3726_v24  ;;  %v3731_v14 = vmax.f32 %v3699_v50, 0.0  ;;  %v3661_v62 = vmul.f32 %v9681_v53, %v3622_v35  ;;  %v3620_v20 = vadd.f32 %v3567_v30, %v9828_v43 }
 0x414   : > { %v3697_v23 = vadd.f32 %v9693_v27, %v3658_v46  ;;  %v7286_v49 = vpop.f32.mrf.mxu0  ;;  %v4016_v56 = vrot.slane %v4014_v34, 1  ;;  %v10029_v2 = vpack.c.bf16 %v3852_v17, %v3851_v6  ;;  %v4021_v59 = vrot.slane %v4019_v28, 1  ;;  %v3856_v46 = vld [vmem:[#allocation3 + $0x100] sm:$0x3] }
 0x415   : > { %v10026_v8 = vsel %vm1458_vm12, %v4005_v15, %v4009_v37  ;;  %3818 = vst.msk [vmem:[#allocation3 + $0x151] sm:$0xff] %vm474_vm1, %v3731_v14  ;;  %v3700_v4 = vadd.f32 %v9693_v27, %v3661_v62  ;;  %v3659_v43 = vmul.f32 %v9681_v53, %v3620_v20  ;;  %v3625_v36 = vadd.f32 %v7286_v49, %v9820_v55 }
 0x416   : > { %v3729_v33 = vmax.f32 %v3697_v23, 0.0  ;;  %7303 = vmatmul.mubr.msk.bf16.gmra.mxu1 %vm474_vm1, %v10026_v8  ;;  %v4017_v21 = vor.u32 %v4016_v56, %v4012_v60  ;;  %v3580_v1 = vpop.f32.mrf.mxu0  ;;  %v10037_v10 = vpack.c.bf16 %v3855_v54, %v3854_v47  ;;  %v10039_v3 = vpack.c.bf16 %v3853_v42, %v3853_v42 }
 0x417   : > { %v3732_v29 = vmax.f32 %v3700_v4, 0.0  ;;  %v3698_v24 = vadd.f32 %v9693_v27, %v3659_v43  ;;  %v3664_v50 = vmul.f32 %v9681_v53, %v3625_v36  ;;  %7341 = vmatmul.mubr.msk.bf16.gmra.mxu0 %vm474_vm1, %v10029_v2  ;;  %v3623_v55 = vadd.f32 %v3580_v1, %v9822_v18 }
 0x418   : > { %3816 = vst.msk [vmem:[#allocation3 + $0x139] sm:$0xff] %vm474_vm1, %v3729_v33  ;;  %v3418_v35 = vadd.f32 %v3377_v51, %v9836_v52  ;;  %v10049_v30 = vsel %vm1458_vm12, %v4017_v21, %v4021_v59  ;;  %7344 = vmatprep.mubr.msk.bf16.mxu0 %vm474_vm1, %v10037_v10  ;;  %v7287_v15 = vpop.f32.mrf.mxu0  ;;  %v4026_v37 = vshll.u32 %v10029_v2, 16  ;;  %v4031_v60 = vshll.u32 %v10039_v3, 16  ;;  %v3861_v42 = vld [vmem:[#allocation3 + $0x128] sm:$0xff]  ;;  %v3860_v21 = vld [vmem:[#allocation3 + $0x120] sm:$0xff] }
 0x419   : > { %3819 = vst.msk [vmem:[#allocation3 + $0x159] sm:$0xff] %vm474_vm1, %v3732_v29  ;;  %v3730_v34 = vmax.f32 %v3698_v24, 0.0  ;;  %v3703_v17 = vadd.f32 %v9693_v27, %v3664_v50  ;;  %7306 = vmatprep.mubr.msk.bf16.mxu1 %vm474_vm1, %v10049_v30  ;;  %v3662_v18 = vmul.f32 %v9681_v53, %v3623_v55  ;;  %v3626_v52 = vadd.f32 %v7287_v15, %v9838_v19  ;;  %v3857_v33 = vld [vmem:[#allocation3 + $0x108] sm:$0xff]  ;;  %v3862_v50 = vld [vmem:[#allocation3 + $0x130] sm:$0x3] }
 0x41a   : > { %v3583_v14 = vpop.f32.mrf.mxu0  ;;  %v4024_v23 = vshrl.u32 %v10029_v2, 16  ;;  %v4028_v62 = vrot.slane %v4026_v37, 1  ;;  %v4033_v20 = vrot.slane %v4031_v60, 1  ;;  %v10062_v6 = vpack.c.bf16 %v3856_v46, %v3856_v46  ;;  %v3858_v54 = vld [vmem:[#allocation3 + $0x110] sm:$0xff]  ;;  %v3859_v4 = vld [vmem:[#allocation3 + $0x118] sm:$0x3] }
 0x41b   : > { %3817 = vst.msk [vmem:[#allocation3 + $0x141] sm:$0xff] %vm474_vm1, %v3730_v34  ;;  %v3735_v49 = vmax.f32 %v3703_v17, 0.0  ;;  %v3701_v56 = vadd.f32 %v9693_v27, %v3662_v18  ;;  %v3665_v28 = vmul.f32 %v9681_v53, %v3626_v52  ;;  %v3624_v51 = vadd.f32 %v3583_v14, %v3418_v35 }
 0x41c   : > { %v4029_v19 = vor.u32 %v4028_v62, %v4024_v23  ;;  %v4038_v43 = vshll.u32 %v10037_v10, 16  ;;  %v4043_v36 = vshll.u32 %v10062_v6, 16  ;;  %v10069_v47 = vpack.c.bf16 %v3858_v54, %v3857_v33 }
 0x41d   : > { %3822 = vst.msk [vmem:[#allocation3 + $0x181] sm:$0xff] %vm474_vm1, %v3735_v49  ;;  %v3733_v59 = vmax.f32 %v3701_v56, 0.0  ;;  %v3704_v1 = vadd.f32 %v9693_v27, %v3665_v28  ;;  %v3663_v29 = vmul.f32 %v9681_v53, %v3624_v51  ;;  %v10074_v24 = vpack.c.bf16 %v3861_v42, %v3860_v21 }
 0x41e   : > { %v10077_v55 = vsel %vm1458_vm12, %v4029_v19, %v4033_v20  ;;  %v4036_v46 = vshrl.u32 %v10037_v10, 16  ;;  %v4040_v35 = vrot.slane %v4038_v43, 1  ;;  %v10080_v15 = vpack.c.bf16 %v3859_v4, %v3859_v4 }
 0x41f   : > { %3820 = vst.msk [vmem:[#allocation3 + $0x169] sm:$0xff] %vm474_vm1, %v3733_v59  ;;  %v3736_v37 = vmax.f32 %v3704_v1, 0.0  ;;  %v3702_v60 = vadd.f32 %v9693_v27, %v3663_v29  ;;  %7307 = vmatmul.mubr.msk.bf16.gmra.mxu1 %vm474_vm1, %v10077_v55  ;;  %v4045_v53 = vrot.slane %v4043_v36, 1  ;;  %7345 = vmatmul.mubr.msk.bf16.gmra.mxu0 %vm474_vm1, %v10069_v47  ;;  %v4050_v34 = vshll.u32 %v10069_v47, 16  ;;  %v3866_v27 = vld [vmem:[#allocation3 + $0x150] sm:$0xff]  ;;  %v3863_v42 = vld [vmem:[#allocation3 + $0x138] sm:$0xff] }
 0x420   : > { %v4041_v17 = vor.u32 %v4040_v35, %v4036_v46  ;;  %7348 = vmatprep.mubr.msk.bf16.mxu0 %vm474_vm1, %v10074_v24  ;;  %v4048_v18 = vshrl.u32 %v10069_v47, 16  ;;  %v4055_v52 = vshll.u32 %v10080_v15, 16  ;;  %v10093_v14 = vpack.c.bf16 %v3862_v50, %v3862_v50  ;;  %v3867_v23 = vld [vmem:[#allocation3 + $0x158] sm:$0xff]  ;;  %v3868_v56 = vld [vmem:[#allocation3 + $0x160] sm:$0x3] }
 0x421   : > { %3823 = vst.msk [vmem:[#allocation3 + $0x189] sm:$0xff] %vm474_vm1, %v3736_v37  ;;  %v3734_v62 = vmax.f32 %v3702_v60, 0.0  ;;  %v4052_v20 = vrot.slane %v4050_v34, 1  ;;  %v4062_v54 = vshll.u32 %v10074_v24, 16  ;;  %v10097_v49 = vpack.c.bf16 %v3867_v23, %v3866_v27 }
 0x422   : > { %v10100_v28 = vsel %vm1458_vm12, %v4041_v17, %v4045_v53  ;;  %v4057_v51 = vrot.slane %v4055_v52, 1  ;;  %v4060_v33 = vshrl.u32 %v10074_v24, 16  ;;  %v4067_v4 = vshll.u32 %v10093_v14, 16  ;;  %v3864_v19 = vld [vmem:[#allocation3 + $0x140] sm:$0xff]  ;;  %v3865_v43 = vld [vmem:[#allocation3 + $0x148] sm:$0x3] }
 0x423   : > { %3821 = vst.msk [vmem:[#allocation3 + $0x171] sm:$0xff] %vm474_vm1, %v3734_v62  ;;  %7310 = vmatprep.mubr.msk.bf16.mxu1 %vm474_vm1, %v10100_v28  ;;  %v4053_v36 = vor.u32 %v4052_v20, %v4048_v18  ;;  %v4064_v21 = vrot.slane %v4062_v54, 1  ;;  %v10107_v59 = vpack.c.bf16 %v3864_v19, %v3863_v42  ;;  %v10109_v1 = vpack.c.bf16 %v3865_v43, %v3865_v43 }
 0x424   : > { %v10111_v29 = vpack.c.bf16 %v3868_v56, %v3868_v56  ;;  %v4086_v50 = vshll.u32 %v10097_v49, 16  ;;  %v4069_v37 = vrot.slane %v4067_v4, 1  ;;  %v4552_v17 = vrot.slane %v9848_v7, 1 }
 0x425   : > { %v10115_v46 = vsel %vm1458_vm12, %v4053_v36, %v4057_v51  ;;  %v4065_v35 = vor.u32 %v4064_v21, %v4060_v33  ;;  %v4074_v60 = vshll.u32 %v10107_v59, 16  ;;  %v4072_v53 = vshrl.u32 %v10107_v59, 16 }
 0x426   : > { %v4079_v34 = vshll.u32 %v10109_v1, 16  ;;  %v4088_v27 = vrot.slane %v4086_v50, 1  ;;  %v4553_v23 = vrot.slane %v9850_v40, 1  ;;  %v4084_v20 = vshrl.u32 %v10097_v49, 16  ;;  %v3869_v51 = vld [vmem:[#allocation3 + $0x168] sm:$0xff] }
 0x427   : > { %7311 = vmatmul.mubr.msk.bf16.gmra.mxu1 %vm474_vm1, %v10115_v46  ;;  %v10124_v18 = vsel %vm1458_vm12, %v4065_v35, %v4069_v37  ;;  %7349 = vmatmul.mubr.msk.bf16.gmra.mxu0 %vm474_vm1, %v10107_v59  ;;  %v4076_v52 = vrot.slane %v4074_v60, 1  ;;  %v4091_v54 = vshll.u32 %v10111_v29, 16 }
 0x428   : > { %7314 = vmatprep.mubr.msk.bf16.mxu1 %vm474_vm1, %v10124_v18  ;;  %7352 = vmatprep.mubr.msk.bf16.mxu0 %vm474_vm1, %v10097_v49  ;;  %v10136_v42 = vsel %vm2094_vm13, %v4552_v17, %v4553_v23  ;;  %v4081_v56 = vrot.slane %v4079_v34, 1  ;;  %v4089_v19 = vor.u32 %v4088_v27, %v4084_v20  ;;  %v5267_v27 = vsel %vm1701_vm10, %v9861_v48, 0  ;;  %v10171_v23 = vld [vmem:[%s11236_s10 + $0xe] sm:$0x3] }
 0x429   : > { %v4077_v62 = vor.u32 %v4076_v52, %v4072_v53  ;;  %v4093_v21 = vrot.slane %v4091_v54, 1  ;;  %v4555_v48 = vrot.slane %v9840_v26, 1  ;;  %v5061_v20 = vsel %vm1701_vm10, %v9903_v13, 0  ;;  %v10186_v54 = vld [vmem:[%s11236_s10 + $0xc] sm:$0x3] }
 0x42a   : > { %v3870_v33 = vld [vmem:[#allocation3 + $0x170] sm:$0xff]  ;;  %v3871_v4 = vld [vmem:[#allocation3 + $0x178] sm:$0x3]  ;;  %v4559_v13 = vrot.slane %v9898_v39, 1  ;;  %v4565_v39 = vrot.slane %v9945_v16, 1  ;;  %v4570_v16 = vrot.slane %v9987_v0, 1 }
 0x42b   : > { %v10138_v40 = vpack.c.bf16 %v3870_v33, %v3869_v51  ;;  %v10140_v43 = vpack.c.bf16 %v3871_v4, %v3871_v4  ;;  %v10143_v36 = vsel %vm1458_vm12, %v4077_v62, %v4081_v56  ;;  %v10150_v37 = vsel %vm1458_vm12, %v4089_v19, %v4093_v21 }
 0x42c   : > { %v4556_v62 = vrot.slane %v9842_v11, 1  ;;  %v4558_v11 = vrot.slane %v9896_v25, 1  ;;  %v4561_v51 = vrot.slane %v9882_v58, 1  ;;  %v4562_v33 = vrot.slane %v9884_v45, 1 }
 0x42d   : > { %v4098_v50 = vshll.u32 %v10138_v40, 16  ;;  %v4103_v35 = vshll.u32 %v10140_v43, 16  ;;  %v4096_v60 = vshrl.u32 %v10138_v40, 16  ;;  %v4564_v45 = vrot.slane %v9943_v41, 1 }
 0x42e   : > { %v10191_v56 = vsel %vm2094_vm13, %v4555_v48, %v4556_v62  ;;  %v10206_v4 = vsel %vm2094_vm13, %v4558_v11, %v4559_v13  ;;  %v10211_v19 = vsel %vm2094_vm13, %v4561_v51, %v4562_v33  ;;  %v4567_v21 = vrot.slane %v9934_v12, 1 }
 0x42f   : > { %7315 = vmatmul.mubr.msk.bf16.gmra.mxu1 %vm474_vm1, %v10143_v36  ;;  %7353 = vmatmul.mubr.msk.bf16.gmra.mxu0 %vm474_vm1, %v10138_v40  ;;  %v4100_v53 = vrot.slane %v4098_v50, 1  ;;  %v4105_v17 = vrot.slane %v4103_v35, 1  ;;  %v4568_v50 = vrot.slane %v9969_v61, 1  ;;  %v10224_v35 = vsel %vm2094_vm13, %v4564_v45, %v4565_v39  ;;  %v3873_v45 = vld [vmem:[#allocation3 + $0x188] sm:$0xff] }
 0x430   : > { %7318 = vmatprep.mubr.msk.bf16.mxu1 %vm474_vm1, %v10150_v37  ;;  %7392 = vmatprep.mubr.msk.bf16.mxu0 %vm474_vm1, %v9848_v7  ;;  %v11427_v7 = vld [vmem:[#allocation75_spill] sm:$0xff]  ;;  %v4571_v61 = vrot.slane %v9995_v57, 1  ;;  %v4576_v57 = vrot.slane %v10029_v2, 1  ;;  %v4580_v48 = vrot.slane %v10062_v6, 1  ;;  %v4583_v6 = vrot.slane %v10080_v15, 1 }
 0x431   : > { %v4101_v34 = vor.u32 %v4100_v53, %v4096_v60  ;;  %v10229_v60 = vsel %vm2094_vm13, %v4567_v21, %v4568_v50  ;;  %v4573_v53 = vrot.slane %v9978_v31, 1  ;;  %v4585_v11 = vrot.slane %v10074_v24, 1  ;;  %v3872_v50 = vld [vmem:[#allocation3 + $0x180] sm:$0xff] }
 0x432   : > { %v4586_v13 = vrot.slane %v10093_v14, 1  ;;  %v4588_v15 = vrot.slane %v10107_v59, 1  ;;  %v4589_v14 = vrot.slane %v10109_v1, 1  ;;  %v4591_v39 = vrot.slane %v10097_v49, 1 }
 0x433   : > { %v10160_v52 = vsel %vm1458_vm12, %v4101_v34, %v4105_v17  ;;  %v4574_v34 = vrot.slane %v10011_v63, 1  ;;  %v10242_v17 = vsel %vm2094_vm13, %v4570_v16, %v4571_v61  ;;  %v4577_v63 = vrot.slane %v10039_v3, 1 }
 0x434   : > { %v4582_v3 = vrot.slane %v10069_v47, 1  ;;  %v10283_v33 = vsel %vm2094_vm13, %v4585_v11, %v4586_v13  ;;  %v4592_v21 = vrot.slane %v10111_v29, 1  ;;  %v10295_v16 = vpack.c.bf16 %v3873_v45, %v3872_v50 }
 0x435   : > { %v10260_v62 = vsel %vm2094_vm13, %v4576_v57, %v4577_v63  ;;  %v10298_v61 = vsel %vm2094_vm13, %v4588_v15, %v4589_v14  ;;  %v4594_v1 = vrot.slane %v10138_v40, 1  ;;  %v4595_v29 = vrot.slane %v10140_v43, 1  ;;  %v6624_v43 = vld [vmem:[%s11236_s10 + $0x10] sm:$0x3] }
 0x436   : > { %v10278_v51 = vsel %vm2094_vm13, %v4582_v3, %v4583_v6  ;;  %v5680_v57 = vsel %vm1701_vm10, %v10171_v23, 0  ;;  %v5044_v6 = vshrl.u32 %v10295_v16, 16 }
 0x437   : > { %7319 = vmatmul.mubr.msk.bf16.gmra.mxu1 %vm474_vm1, %v10160_v52  ;;  %7393 = vmatmul.mubr.msk.bf16.vlgmr.msra.gmra.mxu0 %vm474_vm1, %v9840_v26 }
 0x438   : > { %7396 = vmatprep.mubr.msk.bf16.mxu0 %vm474_vm1, %v9896_v25  ;;  %7358 = vmatprep.mubr.msk.bf16.mxu1 %vm474_vm1, %v11427_v7  ;;  %v4579_v7 = vrot.slane %v10037_v10, 1 }
 0x439   : > { %7459 = vmatpush3.bf16.msra.mxu0 %v5267_v27  ;;  %v10247_v27 = vsel %vm2094_vm13, %v4573_v53, %v4574_v34  ;;  %v10303_v53 = vsel %vm2094_vm13, %v4591_v39, %v4592_v21  ;;  %v10314_v34 = vsel %vm2094_vm13, %v4594_v1, %v4595_v29  ;;  %v5886_v1 = vsel %vm1701_vm10, %v6624_v43, 0 }
 0x43a   : > { %7610 = vmatprep.subr.msk.bf16.mxu0 %vm1701_vm10, %v10171_v23 }
 0x43f   : > { %7359 = vmatmul.mubr.msk.bf16.vlgmr.msra.gmra.mxu1 %vm474_vm1, %v10136_v42  ;;  %7397 = vmatmul.mubr.msk.bf16.gmra.mxu0 %vm474_vm1, %v9882_v58 }
 0x440   : > { %7425 = vmatpush3.bf16.msra.mxu1 %v5061_v20  ;;  %7362 = vmatprep.mubr.msk.bf16.mxu1 %vm474_vm1, %v10191_v56  ;;  %v10265_v20 = vsel %vm2094_vm13, %v4579_v7, %v4580_v48  ;;  %v5046_v7 = vshll.u32 %v10295_v16, 16 }
 0x441   : > { %7400 = vmatprep.mubr.msk.bf16.mxu0 %vm474_vm1, %v9943_v41  ;;  %7609 = vmatprep.subr.msk.bf16.mxu1 %vm1701_vm10, %v10186_v54 }
 0x442   : > { %v5048_v3 = vrot.slane %v5046_v7, 1 }
 0x444   : > { %v5049_v13 = vor.u32 %v5048_v3, %v5044_v6 }
 0x447   : > { %7363 = vmatmul.mubr.msk.bf16.gmra.mxu1 %vm474_vm1, %v10206_v4  ;;  %7401 = vmatmul.mubr.msk.bf16.gmra.mxu0 %vm474_vm1, %v9934_v12 }
 0x448   : > { %7366 = vmatprep.mubr.msk.bf16.mxu1 %vm474_vm1, %v10211_v19  ;;  %7404 = vmatprep.mubr.msk.bf16.mxu0 %vm474_vm1, %v9987_v0 }
 0x44f   : > { %7367 = vmatmul.mubr.msk.bf16.gmra.mxu1 %vm474_vm1, %v10224_v35  ;;  %7405 = vmatmul.mubr.msk.bf16.gmra.mxu0 %vm474_vm1, %v9978_v31 }
 0x450   : > { %7370 = vmatprep.mubr.msk.bf16.mxu1 %vm474_vm1, %v10229_v60  ;;  %7408 = vmatprep.mubr.msk.bf16.mxu0 %vm474_vm1, %v10029_v2 }
 0x457   : > { %7371 = vmatmul.mubr.msk.bf16.gmra.mxu1 %vm474_vm1, %v10242_v17  ;;  %7409 = vmatmul.mubr.msk.bf16.gmra.mxu0 %vm474_vm1, %v10037_v10 }
 0x458   : > { %7374 = vmatprep.mubr.msk.bf16.mxu1 %vm474_vm1, %v10247_v27  ;;  %7412 = vmatprep.mubr.msk.bf16.mxu0 %vm474_vm1, %v10069_v47 }
 0x45f   : > { %7375 = vmatmul.mubr.msk.bf16.gmra.mxu1 %vm474_vm1, %v10260_v62  ;;  %7413 = vmatmul.mubr.msk.bf16.gmra.mxu0 %vm474_vm1, %v10074_v24 }
 0x460   : > { %7378 = vmatprep.mubr.msk.bf16.mxu1 %vm474_vm1, %v10265_v20  ;;  %7416 = vmatprep.mubr.msk.bf16.mxu0 %vm474_vm1, %v10107_v59 }
 0x467   : > { %7379 = vmatmul.mubr.msk.bf16.gmra.mxu1 %vm474_vm1, %v10278_v51  ;;  %7417 = vmatmul.mubr.msk.bf16.gmra.mxu0 %vm474_vm1, %v10097_v49 }
 0x468   : > { %7382 = vmatprep.mubr.msk.bf16.mxu1 %vm474_vm1, %v10283_v33  ;;  %7420 = vmatprep.mubr.msk.bf16.mxu0 %vm474_vm1, %v10138_v40 }
 0x46f   : > { %7383 = vmatmul.mubr.msk.bf16.gmra.mxu1 %vm474_vm1, %v10298_v61  ;;  %7421 = vmatmul.mubr.msk.bf16.gmra.mxu0 %vm474_vm1, %v10295_v16 }
 0x470   : > { %7386 = vmatprep.mubr.msk.bf16.mxu1 %vm474_vm1, %v10303_v53  ;;  %7460 = vmatprep.mubr.msk.bf16.mxu0 %vm474_vm1, %v10136_v42  ;;  %v5468_v42 = vsel %vm1701_vm10, %v10186_v54, 0  ;;  %v5258_v54 = vrot.slane %v10295_v16, 1 }
 0x477   : > { %7387 = vmatmul.mubr.msk.bf16.gmra.mxu1 %vm474_vm1, %v10314_v34  ;;  %7461 = vmatmul.mubr.msk.bf16.vlgmr.msra.gmra.mxu0 %vm474_vm1, %v10191_v56 }
 0x478   : > { %7426 = vmatprep.mubr.msk.bf16.mxu1 %vm474_vm1, %v9891_v38  ;;  %7464 = vmatprep.mubr.msk.bf16.mxu0 %vm474_vm1, %v10206_v4  ;;  %v3874_v38 = vld [vmem:[#allocation3 + $0x190] sm:$0x3] }
 0x479   : > { %7527 = vmatpush3.bf16.msra.mxu0 %v5680_v57  ;;  %v3911_v23 = vpack.c.bf16 %v3874_v38, %v3874_v38 }
 0x47b   : > { %v5259_v63 = vrot.slane %v3911_v23, 1  ;;  %v5051_v11 = vshll.u32 %v3911_v23, 16 }
 0x47d   : > { %v10383_v48 = vsel %vm2094_vm13, %v5258_v54, %v5259_v63  ;;  %v5053_v15 = vrot.slane %v5051_v11, 1 }
 0x47f   : > { %7427 = vmatmul.mubr.msk.bf16.vlgmr.msra.gmra.mxu1 %vm474_vm1, %v9894_v22  ;;  %7465 = vmatmul.mubr.msk.bf16.gmra.mxu0 %vm474_vm1, %v10211_v19  ;;  %v10395_v14 = vsel %vm1458_vm12, %v5049_v13, %v5053_v15 }
 0x480   : > { %7493 = vmatpush3.bf16.msra.mxu1 %v5468_v42  ;;  %7430 = vmatprep.mubr.msk.bf16.mxu1 %vm474_vm1, %v9941_v32 }
 0x481   : > { %7468 = vmatprep.mubr.msk.bf16.mxu0 %vm474_vm1, %v10224_v35  ;;  %7611 = vmatprep.subr.msk.bf16.mxu1 %vm1701_vm10, %v6624_v43 }
 0x487   : > { %7431 = vmatmul.mubr.msk.bf16.gmra.mxu1 %vm474_vm1, %v9954_v44  ;;  %7469 = vmatmul.mubr.msk.bf16.gmra.mxu0 %vm474_vm1, %v10229_v60 }
 0x488   : > { %7434 = vmatprep.mubr.msk.bf16.mxu1 %vm474_vm1, %v9985_v5  ;;  %7472 = vmatprep.mubr.msk.bf16.mxu0 %vm474_vm1, %v10242_v17 }
 0x48f   : > { %7435 = vmatmul.mubr.msk.bf16.gmra.mxu1 %vm474_vm1, %v10006_v9  ;;  %7473 = vmatmul.mubr.msk.bf16.gmra.mxu0 %vm474_vm1, %v10247_v27 }
 0x490   : > { %7438 = vmatprep.mubr.msk.bf16.mxu1 %vm474_vm1, %v10026_v8  ;;  %7476 = vmatprep.mubr.msk.bf16.mxu0 %vm474_vm1, %v10260_v62 }
 0x497   : > { %7439 = vmatmul.mubr.msk.bf16.gmra.mxu1 %vm474_vm1, %v10049_v30  ;;  %7477 = vmatmul.mubr.msk.bf16.gmra.mxu0 %vm474_vm1, %v10265_v20 }
 0x498   : > { %7442 = vmatprep.mubr.msk.bf16.mxu1 %vm474_vm1, %v10077_v55  ;;  %7480 = vmatprep.mubr.msk.bf16.mxu0 %vm474_vm1, %v10278_v51 }
 0x49f   : > { %7443 = vmatmul.mubr.msk.bf16.gmra.mxu1 %vm474_vm1, %v10100_v28  ;;  %7481 = vmatmul.mubr.msk.bf16.gmra.mxu0 %vm474_vm1, %v10283_v33 }
 0x4a0   : > { %7446 = vmatprep.mubr.msk.bf16.mxu1 %vm474_vm1, %v10115_v46  ;;  %7484 = vmatprep.mubr.msk.bf16.mxu0 %vm474_vm1, %v10298_v61 }
 0x4a7   : > { %7447 = vmatmul.mubr.msk.bf16.gmra.mxu1 %vm474_vm1, %v10124_v18  ;;  %7485 = vmatmul.mubr.msk.bf16.gmra.mxu0 %vm474_vm1, %v10303_v53 }
 0x4a8   : > { %7450 = vmatprep.mubr.msk.bf16.mxu1 %vm474_vm1, %v10143_v36  ;;  %7488 = vmatprep.mubr.msk.bf16.mxu0 %vm474_vm1, %v10314_v34 }
 0x4af   : > { %7451 = vmatmul.mubr.msk.bf16.gmra.mxu1 %vm474_vm1, %v10150_v37  ;;  %7489 = vmatmul.mubr.msk.bf16.gmra.mxu0 %vm474_vm1, %v10383_v48 }
 0x4b0   : > { %7454 = vmatprep.mubr.msk.bf16.mxu1 %vm474_vm1, %v10160_v52  ;;  %7528 = vmatprep.mubr.msk.bf16.mxu0 %vm474_vm1, %v9894_v22 }
 0x4b6   : > { %v7326_v45 = vpop.f32.mrf.mxu0 }
 0x4b7   : > { %7455 = vmatmul.mubr.msk.bf16.gmra.mxu1 %vm474_vm1, %v10395_v14  ;;  %7529 = vmatmul.mubr.msk.bf16.vlgmr.msra.gmra.mxu0 %vm474_vm1, %v9941_v32 }
 0x4b8   : > { %7494 = vmatprep.mubr.msk.bf16.mxu1 %vm474_vm1, %v9840_v26  ;;  %7532 = vmatprep.mubr.msk.bf16.mxu0 %vm474_vm1, %v9954_v44  ;;  %v4390_v22 = vpop.f32.mrf.mxu0 }
 0x4ba   : > { %v7327_v39 = vpop.f32.mrf.mxu0 }
 0x4bc   : > { %v4393_v21 = vpop.f32.mrf.mxu0 }
 0x4bd   : > { %v7292_v50 = vpop.f32.mrf.mxu1 }
 0x4be   : > { %v10406_v29 = vadd.f32 %v7326_v45, %v7292_v50 }
 0x4bf   : > { %7495 = vmatmul.mubr.msk.bf16.vlgmr.msra.gmra.mxu1 %vm474_vm1, %v9896_v25  ;;  %v7330_v57 = vpop.f32.mrf.mxu0  ;;  %7533 = vmatmul.mubr.msk.bf16.gmra.mxu0 %vm474_vm1, %v9985_v5  ;;  %v4194_v32 = vpop.f32.mrf.mxu1 }
 0x4c0   : > { %7561 = vmatpush3.bf16.msra.mxu1 %v5886_v1  ;;  %7498 = vmatprep.mubr.msk.bf16.mxu1 %vm474_vm1, %v9882_v58  ;;  %v10414_v26 = vadd.f32 %v4390_v22, %v4194_v32 }
 0x4c1   : > { %7536 = vmatprep.mubr.msk.bf16.mxu0 %vm474_vm1, %v10006_v9  ;;  %v4406_v44 = vpop.f32.mrf.mxu0  ;;  %v7293_v42 = vpop.f32.mrf.mxu1 }
 0x4c2   : > { %v10418_v43 = vadd.f32 %v7327_v39, %v7293_v42 }
 0x4c3   : > { %v7331_v38 = vpop.f32.mrf.mxu0  ;;  %v4197_v25 = vpop.f32.mrf.mxu1 }
 0x4c4   : > { %v10420_v23 = vadd.f32 %v4393_v21, %v4197_v25 }
 0x4c5   : > { %v4409_v54 = vpop.f32.mrf.mxu0  ;;  %v7296_v5 = vpop.f32.mrf.mxu1 }
 0x4c6   : > { %v10422_v63 = vadd.f32 %v7330_v57, %v7296_v5  ;;  %v3875_v5 = vld [vmem:[#allocation3 + $0x198] sm:$0xff] }
 0x4c7   : > { %7499 = vmatmul.mubr.msk.bf16.gmra.mxu1 %vm474_vm1, %v9943_v41  ;;  %v7334_v58 = vpop.f32.mrf.mxu0  ;;  %7537 = vmatmul.mubr.msk.bf16.gmra.mxu0 %vm474_vm1, %v10026_v8  ;;  %v4210_v9 = vpop.f32.mrf.mxu1 }
 0x4c8   : > { %7502 = vmatprep.mubr.msk.bf16.mxu1 %vm474_vm1, %v9934_v12  ;;  %v10430_v7 = vadd.f32 %v4406_v44, %v4210_v9  ;;  %7540 = vmatprep.mubr.msk.bf16.mxu0 %vm474_vm1, %v10049_v30 }
 0x4c9   : > { %v4422_v3 = vpop.f32.mrf.mxu0  ;;  %v7297_v6 = vpop.f32.mrf.mxu1 }
 0x4ca   : > { %v10434_v11 = vadd.f32 %v7331_v38, %v7297_v6 }
 0x4cb   : > { %v7335_v13 = vpop.f32.mrf.mxu0  ;;  %v4213_v15 = vpop.f32.mrf.mxu1 }
 0x4cc   : > { %v10436_v41 = vadd.f32 %v4409_v54, %v4213_v15  ;;  %v3877_v15 = vld [vmem:[#allocation3 + $0x1a8] sm:$0x3] }
 0x4cd   : > { %v4425_v45 = vpop.f32.mrf.mxu0  ;;  %v7300_v22 = vpop.f32.mrf.mxu1 }
 0x4ce   : > { %v10438_v8 = vadd.f32 %v7334_v58, %v7300_v22  ;;  %v3876_v58 = vld [vmem:[#allocation3 + $0x1a0] sm:$0xff]  ;;  %v10482_v22 = vpack.c.bf16 %v3877_v15, %v3877_v15 }
 0x4cf   : > { %7503 = vmatmul.mubr.msk.bf16.gmra.mxu1 %vm474_vm1, %v9987_v0  ;;  %v7338_v12 = vpop.f32.mrf.mxu0  ;;  %7541 = vmatmul.mubr.msk.bf16.gmra.mxu0 %vm474_vm1, %v10077_v55  ;;  %v4226_v30 = vpop.f32.mrf.mxu1 }
 0x4d0   : > { %7506 = vmatprep.mubr.msk.bf16.mxu1 %vm474_vm1, %v9978_v31  ;;  %v10446_v39 = vadd.f32 %v4422_v3, %v4226_v30  ;;  %7544 = vmatprep.mubr.msk.bf16.mxu0 %vm474_vm1, %v10100_v28 }
 0x4d1   : > { %v4438_v21 = vpop.f32.mrf.mxu0  ;;  %v7301_v50 = vpop.f32.mrf.mxu1 }
 0x4d2   : > { %v10450_v1 = vadd.f32 %v7335_v13, %v7301_v50 }
 0x4d3   : > { %v7339_v57 = vpop.f32.mrf.mxu0  ;;  %v4229_v32 = vpop.f32.mrf.mxu1 }
 0x4d4   : > { %v10452_v0 = vadd.f32 %v4425_v45, %v4229_v32 }
 0x4d5   : > { %v4441_v44 = vpop.f32.mrf.mxu0 }
 0x4d6   : > { %v7304_v42 = vpop.f32.mrf.mxu1 }
 0x4d7   : > { %v10454_v55 = vadd.f32 %v7338_v12, %v7304_v42  ;;  %7507 = vmatmul.mubr.msk.bf16.gmra.mxu1 %vm474_vm1, %v10029_v2  ;;  %v7342_v31 = vpop.f32.mrf.mxu0  ;;  %7545 = vmatmul.mubr.msk.bf16.gmra.mxu0 %vm474_vm1, %v10115_v46  ;;  %v10470_v46 = vpack.c.bf16 %v3876_v58, %v3875_v5 }
 0x4d8   : > { %v4242_v28 = vpop.f32.mrf.mxu1  ;;  %7510 = vmatprep.mubr.msk.bf16.mxu1 %vm474_vm1, %v10037_v10  ;;  %7548 = vmatprep.mubr.msk.bf16.mxu0 %vm474_vm1, %v10124_v18 }
 0x4d9   : > { %v10462_v38 = vadd.f32 %v4438_v21, %v4242_v28  ;;  %v4454_v25 = vpop.f32.mrf.mxu0  ;;  %v5665_v12 = vshll.u32 %v10470_v46, 16 }
 0x4da   : > { %v7305_v54 = vpop.f32.mrf.mxu1 }
 0x4db   : > { %v10466_v9 = vadd.f32 %v7339_v57, %v7305_v54  ;;  %v7343_v2 = vpop.f32.mrf.mxu0 }
 0x4dc   : > { %v4245_v3 = vpop.f32.mrf.mxu1 }
 0x4dd   : > { %v10468_v6 = vadd.f32 %v4441_v44, %v4245_v3  ;;  %v4457_v13 = vpop.f32.mrf.mxu0  ;;  %v5667_v44 = vrot.slane %v5665_v12, 1 }
 0x4df   : > { %v7308_v10 = vpop.f32.mrf.mxu1  ;;  %7511 = vmatmul.mubr.msk.bf16.gmra.mxu1 %vm474_vm1, %v10069_v47  ;;  %v7346_v45 = vpop.f32.mrf.mxu0  ;;  %7549 = vmatmul.mubr.msk.bf16.gmra.mxu0 %vm474_vm1, %v10143_v36  ;;  %v5663_v36 = vshrl.u32 %v10470_v46, 16 }
 0x4e0   : > { %v10476_v18 = vadd.f32 %v7342_v31, %v7308_v10  ;;  %7514 = vmatprep.mubr.msk.bf16.mxu1 %vm474_vm1, %v10074_v24  ;;  %7552 = vmatprep.mubr.msk.bf16.mxu0 %vm474_vm1, %v10150_v37  ;;  %v5670_v24 = vshll.u32 %v10482_v22, 16 }
 0x4e1   : > { %v4258_v30 = vpop.f32.mrf.mxu1  ;;  %v4470_v21 = vpop.f32.mrf.mxu0  ;;  %v5668_v5 = vor.u32 %v5667_v44, %v5663_v36 }
 0x4e2   : > { %v10485_v50 = vadd.f32 %v4454_v25, %v4258_v30  ;;  %v5672_v58 = vrot.slane %v5670_v24, 1 }
 0x4e3   : > { %v7309_v47 = vpop.f32.mrf.mxu1  ;;  %v7347_v57 = vpop.f32.mrf.mxu0 }
 0x4e4   : > { %v10487_v32 = vadd.f32 %v7343_v2, %v7309_v47 }
 0x4e5   : > { %v4261_v42 = vpop.f32.mrf.mxu1  ;;  %v4473_v31 = vpop.f32.mrf.mxu0 }
 0x4e6   : > { %v10491_v37 = vadd.f32 %v4457_v13, %v4261_v42 }
 0x4e7   : > { %v7312_v28 = vpop.f32.mrf.mxu1  ;;  %7515 = vmatmul.mubr.msk.bf16.gmra.mxu1 %vm474_vm1, %v10107_v59  ;;  %v7350_v54 = vpop.f32.mrf.mxu0  ;;  %7553 = vmatmul.mubr.msk.bf16.gmra.mxu0 %vm474_vm1, %v10160_v52  ;;  %v5673_v52 = vsel %vm1458_vm12, %v5668_v5, %v5672_v58 }
 0x4e8   : > { %v10497_v25 = vadd.f32 %v7346_v45, %v7312_v28  ;;  %7518 = vmatprep.mubr.msk.bf16.mxu1 %vm474_vm1, %v10097_v49  ;;  %7556 = vmatprep.mubr.msk.bf16.mxu0 %vm474_vm1, %v10395_v14 }
 0x4e9   : > { %v4274_v2 = vpop.f32.mrf.mxu1  ;;  %v4486_v3 = vpop.f32.mrf.mxu0 }
 0x4ea   : > { %v10503_v13 = vadd.f32 %v4470_v21, %v4274_v2 }
 0x4eb   : > { %v7313_v15 = vpop.f32.mrf.mxu1  ;;  %v7351_v59 = vpop.f32.mrf.mxu0 }
 0x4ec   : > { %v10505_v10 = vadd.f32 %v7347_v57, %v7313_v15 }
 0x4ed   : > { %v4277_v45 = vpop.f32.mrf.mxu1  ;;  %v4489_v12 = vpop.f32.mrf.mxu0 }
 0x4ee   : > { %v10508_v30 = vadd.f32 %v4473_v31, %v4277_v45 }
 0x4ef   : > { %v7316_v49 = vpop.f32.mrf.mxu1  ;;  %7519 = vmatmul.mubr.msk.bf16.gmra.mxu1 %vm474_vm1, %v10138_v40  ;;  %v7354_v14 = vpop.f32.mrf.mxu0  ;;  %7557 = vmatmul.mubr.msk.bf16.gmra.mxu0 %vm474_vm1, %v5673_v52 }
 0x4f0   : > { %v10513_v47 = vadd.f32 %v7350_v54, %v7316_v49  ;;  %7522 = vmatprep.mubr.msk.bf16.mxu1 %vm474_vm1, %v10295_v16 }
 0x4f1   : > { %v4290_v21 = vpop.f32.mrf.mxu1  ;;  %v4502_v57 = vpop.f32.mrf.mxu0 }
 0x4f2   : > { %v10517_v36 = vadd.f32 %v4486_v3, %v4290_v21 }
 0x4f3   : > { %v7317_v44 = vpop.f32.mrf.mxu1  ;;  %v7355_v24 = vpop.f32.mrf.mxu0 }
 0x4f4   : > { %v10519_v42 = vadd.f32 %v7351_v59, %v7317_v44 }
 0x4f5   : > { %v4293_v31 = vpop.f32.mrf.mxu1  ;;  %v4505_v28 = vpop.f32.mrf.mxu0 }
 0x4f6   : > { %v10521_v5 = vadd.f32 %v4489_v12, %v4293_v31 }
 0x4f7   : > { %v7320_v40 = vpop.f32.mrf.mxu1  ;;  %7523 = vmatmul.mubr.msk.bf16.gmra.mxu1 %vm474_vm1, %v10470_v46  ;;  %v7394_v54 = vpop.f32.mrf.mxu0 }
 0x4f8   : > { %v10525_v58 = vadd.f32 %v7354_v14, %v7320_v40  ;;  %7562 = vmatprep.mubr.msk.bf16.mxu1 %vm474_vm1, %v10191_v56 }
 0x4f9   : > { %v4306_v16 = vpop.f32.mrf.mxu1  ;;  %v4885_v2 = vpop.f32.mrf.mxu0 }
 0x4fa   : > { %v10529_v3 = vadd.f32 %v4502_v57, %v4306_v16 }
 0x4fb   : > { %v7321_v15 = vpop.f32.mrf.mxu1  ;;  %v7395_v59 = vpop.f32.mrf.mxu0 }
 0x4fc   : > { %v10531_v52 = vadd.f32 %v7355_v24, %v7321_v15 }
 0x4fd   : > { %v4309_v45 = vpop.f32.mrf.mxu1  ;;  %v4888_v12 = vpop.f32.mrf.mxu0 }
 0x4fe   : > { %v10533_v49 = vadd.f32 %v4505_v28, %v4309_v45 }
 0x4ff   : > { %v7360_v21 = vpop.f32.mrf.mxu1  ;;  %7563 = vmatmul.mubr.msk.bf16.vlgmr.msra.gmra.mxu1 %vm474_vm1, %v10206_v4  ;;  %v7398_v14 = vpop.f32.mrf.mxu0 }
 0x500   : > { %11428 = vst [vmem:[#allocation8_spill] sm:$0xff] %v10533_v49  ;;  %v4813_v44 = vadd.f32 %v7360_v21, %v10406_v29  ;;  %7566 = vmatprep.mubr.msk.bf16.mxu1 %vm474_vm1, %v10211_v19 }
 0x501   : > { %v4684_v56 = vpop.f32.mrf.mxu1  ;;  %v4901_v57 = vpop.f32.mrf.mxu0 }
 0x502   : > { %v4811_v31 = vadd.f32 %v4684_v56, %v10414_v26  ;;  %v10541_v24 = vadd.f32 %v7394_v54, %v4813_v44 }
 0x503   : > { %v7361_v40 = vpop.f32.mrf.mxu1  ;;  %v7399_v16 = vpop.f32.mrf.mxu0 }
 0x504   : > { %v4814_v28 = vadd.f32 %v7361_v40, %v10418_v43  ;;  %v10544_v15 = vadd.f32 %v4885_v2, %v4811_v31 }
 0x505   : > { %v4687_v45 = vpop.f32.mrf.mxu1  ;;  %v4904_v4 = vpop.f32.mrf.mxu0 }
 0x506   : > { %v4812_v49 = vadd.f32 %v4687_v45, %v10420_v23  ;;  %v10547_v29 = vadd.f32 %v7395_v59, %v4814_v28 }
 0x507   : > { %v7364_v21 = vpop.f32.mrf.mxu1  ;;  %7567 = vmatmul.mubr.msk.bf16.gmra.mxu1 %vm474_vm1, %v10224_v35  ;;  %v7402_v19 = vpop.f32.mrf.mxu0 }
 0x508   : > { %v4817_v26 = vadd.f32 %v7364_v21, %v10422_v63  ;;  %7570 = vmatprep.mubr.msk.bf16.mxu1 %vm474_vm1, %v10229_v60  ;;  %v10554_v54 = vadd.f32 %v4888_v12, %v4812_v49 }
 0x509   : > { %v4700_v43 = vpop.f32.mrf.mxu1  ;;  %v4917_v2 = vpop.f32.mrf.mxu0 }
 0x50a   : > { %v4815_v44 = vadd.f32 %v4700_v43, %v10430_v7  ;;  %v10557_v56 = vadd.f32 %v7398_v14, %v4817_v26 }
 0x50b   : > { %v7365_v23 = vpop.f32.mrf.mxu1  ;;  %v7403_v59 = vpop.f32.mrf.mxu0 }
 0x50c   : > { %v4818_v31 = vadd.f32 %v7365_v23, %v10434_v11  ;;  %v10560_v40 = vadd.f32 %v4901_v57, %v4815_v44 }
 0x50d   : > { %v4703_v35 = vpop.f32.mrf.mxu1  ;;  %v4920_v28 = vpop.f32.mrf.mxu0 }
 0x50e   : > { %v4816_v63 = vadd.f32 %v4703_v35, %v10436_v41  ;;  %v10563_v45 = vadd.f32 %v7399_v16, %v4818_v31 }
 0x50f   : > { %v7368_v60 = vpop.f32.mrf.mxu1  ;;  %7571 = vmatmul.mubr.msk.bf16.gmra.mxu1 %vm474_vm1, %v10242_v17  ;;  %v7406_v12 = vpop.f32.mrf.mxu0 }
 0x510   : > { %v4821_v7 = vadd.f32 %v7368_v60, %v10438_v8  ;;  %7574 = vmatprep.mubr.msk.bf16.mxu1 %vm474_vm1, %v10247_v27  ;;  %v10570_v49 = vadd.f32 %v4904_v4, %v4816_v63 }
 0x511   : > { %v4716_v11 = vpop.f32.mrf.mxu1  ;;  %v4933_v14 = vpop.f32.mrf.mxu0 }
 0x512   : > { %v4819_v57 = vadd.f32 %v4716_v11, %v10446_v39  ;;  %v10573_v21 = vadd.f32 %v7402_v19, %v4821_v7 }
 0x513   : > { %v7369_v41 = vpop.f32.mrf.mxu1  ;;  %v7407_v16 = vpop.f32.mrf.mxu0 }
 0x514   : > { %v4822_v26 = vadd.f32 %v7369_v41, %v10450_v1  ;;  %v10576_v43 = vadd.f32 %v4917_v2, %v4819_v57 }
 0x515   : > { %v4719_v17 = vpop.f32.mrf.mxu1  ;;  %v4936_v44 = vpop.f32.mrf.mxu0 }
 0x516   : > { %v4820_v8 = vadd.f32 %v4719_v17, %v10452_v0  ;;  %v10579_v23 = vadd.f32 %v7403_v59, %v4822_v26 }
 0x517   : > { %v7372_v27 = vpop.f32.mrf.mxu1  ;;  %7575 = vmatmul.mubr.msk.bf16.gmra.mxu1 %vm474_vm1, %v10260_v62  ;;  %v7410_v4 = vpop.f32.mrf.mxu0 }
 0x518   : > { %v4825_v39 = vadd.f32 %v7372_v27, %v10454_v55  ;;  %7578 = vmatprep.mubr.msk.bf16.mxu1 %vm474_vm1, %v10265_v20  ;;  %v10586_v19 = vadd.f32 %v4920_v28, %v4820_v8 }
 0x519   : > { %v4732_v1 = vpop.f32.mrf.mxu1  ;;  %v4949_v2 = vpop.f32.mrf.mxu0 }
 0x51a   : > { %v4823_v31 = vadd.f32 %v4732_v1, %v10462_v38  ;;  %v10589_v35 = vadd.f32 %v7406_v12, %v4825_v39 }
 0x51b   : > { %v7373_v0 = vpop.f32.mrf.mxu1  ;;  %v7411_v59 = vpop.f32.mrf.mxu0 }
 0x51c   : > { %v4826_v63 = vadd.f32 %v7373_v0, %v10466_v9  ;;  %v10592_v60 = vadd.f32 %v4933_v14, %v4823_v31 }
 0x51d   : > { %v4735_v62 = vpop.f32.mrf.mxu1  ;;  %v4952_v7 = vpop.f32.mrf.mxu0 }
 0x51e   : > { %v4824_v55 = vadd.f32 %v4735_v62, %v10468_v6  ;;  %v10595_v11 = vadd.f32 %v7407_v16, %v4826_v63 }
 0x51f   : > { %v7376_v20 = vpop.f32.mrf.mxu1  ;;  %7579 = vmatmul.mubr.msk.bf16.gmra.mxu1 %vm474_vm1, %v10278_v51  ;;  %v7414_v28 = vpop.f32.mrf.mxu0 }
 0x520   : > { %v4829_v38 = vadd.f32 %v7376_v20, %v10476_v18  ;;  %7582 = vmatprep.mubr.msk.bf16.mxu1 %vm474_vm1, %v10283_v33  ;;  %v10602_v12 = vadd.f32 %v4936_v44, %v4824_v55  ;;  %v5878_v55 = vrot.slane %v10482_v22, 1 }
 0x521   : > { %v4748_v9 = vpop.f32.mrf.mxu1  ;;  %v4965_v14 = vpop.f32.mrf.mxu0 }
 0x522   : > { %v4827_v57 = vadd.f32 %v4748_v9, %v10485_v50  ;;  %v10605_v41 = vadd.f32 %v7410_v4, %v4829_v38 }
 0x523   : > { %v7377_v6 = vpop.f32.mrf.mxu1  ;;  %v7415_v16 = vpop.f32.mrf.mxu0 }
 0x524   : > { %v4830_v26 = vadd.f32 %v7377_v6, %v10487_v32  ;;  %v10608_v17 = vadd.f32 %v4949_v2, %v4827_v57 }
 0x525   : > { %v4751_v51 = vpop.f32.mrf.mxu1  ;;  %v4968_v8 = vpop.f32.mrf.mxu0 }
 0x526   : > { %v4828_v18 = vadd.f32 %v4751_v51, %v10491_v37  ;;  %v10611_v27 = vadd.f32 %v7411_v59, %v4830_v26 }
 0x527   : > { %v7380_v33 = vpop.f32.mrf.mxu1  ;;  %7583 = vmatmul.mubr.msk.bf16.gmra.mxu1 %vm474_vm1, %v10298_v61  ;;  %v7418_v44 = vpop.f32.mrf.mxu0 }
 0x528   : > { %v4833_v50 = vadd.f32 %v7380_v33, %v10497_v25  ;;  %7586 = vmatprep.mubr.msk.bf16.mxu1 %vm474_vm1, %v10303_v53  ;;  %v10618_v4 = vadd.f32 %v4952_v7, %v4828_v18 }
 0x529   : > { %v4764_v32 = vpop.f32.mrf.mxu1  ;;  %v4981_v39 = vpop.f32.mrf.mxu0 }
 0x52a   : > { %v4831_v1 = vadd.f32 %v4764_v32, %v10503_v13  ;;  %v10621_v2 = vadd.f32 %v7414_v28, %v4833_v50 }
 0x52b   : > { %v7381_v37 = vpop.f32.mrf.mxu1  ;;  %v7419_v31 = vpop.f32.mrf.mxu0 }
 0x52c   : > { %v4834_v0 = vadd.f32 %v7381_v37, %v10505_v10  ;;  %v10624_v59 = vadd.f32 %v4965_v14, %v4831_v1  ;;  %v5877_v10 = vrot.slane %v10470_v46, 1 }
 0x52d   : > { %v4767_v61 = vpop.f32.mrf.mxu1  ;;  %v4984_v63 = vpop.f32.mrf.mxu0 }
 0x52e   : > { %v4832_v25 = vadd.f32 %v4767_v61, %v10508_v30  ;;  %v10627_v62 = vadd.f32 %v7415_v16, %v4834_v0 }
 0x52f   : > { %v7384_v53 = vpop.f32.mrf.mxu1  ;;  %7587 = vmatmul.mubr.msk.bf16.gmra.mxu1 %vm474_vm1, %v10314_v34  ;;  %v7422_v7 = vpop.f32.mrf.mxu0 }
 0x530   : > { %v4837_v13 = vadd.f32 %v7384_v53, %v10513_v47  ;;  %7590 = vmatprep.mubr.msk.bf16.mxu1 %vm474_vm1, %v10383_v48  ;;  %v10636_v20 = vadd.f32 %v4968_v8, %v4832_v25  ;;  %v5879_v47 = vsel %vm2094_vm13, %v5877_v10, %v5878_v55 }
 0x531   : > { %v4780_v28 = vpop.f32.mrf.mxu1  ;;  %v4997_v30 = vpop.f32.mrf.mxu0 }
 0x532   : > { %v4835_v38 = vadd.f32 %v4780_v28, %v10517_v36  ;;  %v10639_v9 = vadd.f32 %v7418_v44, %v4837_v13 }
 0x533   : > { %v7385_v14 = vpop.f32.mrf.mxu1  ;;  %v7423_v34 = vpop.f32.mrf.mxu0 }
 0x534   : > { %v4838_v57 = vadd.f32 %v7385_v14, %v10519_v42  ;;  %v10643_v6 = vadd.f32 %v4981_v39, %v4835_v38 }
 0x535   : > { %v4783_v48 = vpop.f32.mrf.mxu1  ;;  %v5000_v46 = vpop.f32.mrf.mxu0 }
 0x536   : > { %v4836_v22 = vadd.f32 %v4783_v48, %v10521_v5  ;;  %v10646_v16 = vadd.f32 %v7419_v31, %v4838_v57 }
 0x537   : > { %v7388_v26 = vpop.f32.mrf.mxu1  ;;  %7591 = vmatmul.mubr.msk.bf16.gmra.mxu1 %vm474_vm1, %v5879_v47  ;;  %v10649_v36 = vpop.f32.mrf.mxu0 }
 0x538   : > { %v4841_v51 = vadd.f32 %v7388_v26, %v10525_v58  ;;  %v10652_v8 = vadd.f32 %v4984_v63, %v4836_v22  ;;  %v11429_v58 = vld [vmem:[#allocation8_spill] sm:$0xff] }
 0x539   : > { %v4796_v42 = vpop.f32.mrf.mxu1  ;;  %v10654_v18 = vpop.f32.mrf.mxu0 }
 0x53a   : > { %v4839_v33 = vadd.f32 %v4796_v42, %v10529_v3  ;;  %v10657_v44 = vadd.f32 %v7422_v7, %v4841_v51 }
 0x53b   : > { %v7389_v50 = vpop.f32.mrf.mxu1  ;;  %v10659_v5 = vpop.f32.mrf.mxu0 }
 0x53c   : > { %v4842_v32 = vadd.f32 %v7389_v50, %v10531_v52  ;;  %v10662_v39 = vadd.f32 %v4997_v30, %v4839_v33 }
 0x53d   : > { %v4799_v1 = vpop.f32.mrf.mxu1  ;;  %v10664_v37 = vpop.f32.mrf.mxu0 }
 0x53e   : > { %v4840_v31 = vadd.f32 %v4799_v1, %v11429_v58  ;;  %v10667_v0 = vadd.f32 %v7423_v34, %v4842_v32 }
 0x53f   : > { %v7428_v61 = vpop.f32.mrf.mxu1  ;;  %v10669_v63 = vpop.f32.mrf.mxu0 }
 0x540   : > { %v10672_v3 = vadd.f32 %v7428_v61, %v10541_v24  ;;  %v10674_v25 = vadd.f32 %v5000_v46, %v4840_v31 }
 0x541   : > { %v5097_v53 = vpop.f32.mrf.mxu1  ;;  %v10676_v7 = vpop.f32.mrf.mxu0 }
 0x542   : > { %v10679_v52 = vadd.f32 %v5097_v53, %v10544_v15 }
 0x543   : > { %v7429_v13 = vpop.f32.mrf.mxu1  ;;  %v10681_v10 = vpop.f32.mrf.mxu0 }
 0x544   : > { %v10684_v55 = vadd.f32 %v7429_v13, %v10547_v29 }
 0x545   : > { %v5100_v28 = vpop.f32.mrf.mxu1  ;;  %v10686_v30 = vpop.f32.mrf.mxu0 }
 0x546   : > { %v10689_v24 = vadd.f32 %v5100_v28, %v10554_v54 }
 0x547   : > { %v7432_v38 = vpop.f32.mrf.mxu1  ;;  %v10691_v14 = vpop.f32.mrf.mxu0 }
 0x548   : > { %v10694_v34 = vadd.f32 %v7432_v38, %v10557_v56 }
 0x549   : > { %v5113_v15 = vpop.f32.mrf.mxu1  ;;  %v10696_v57 = vpop.f32.mrf.mxu0 }
 0x54a   : > { %v10699_v47 = vadd.f32 %v5113_v15, %v10560_v40 }
 0x54b   : > { %v7433_v29 = vpop.f32.mrf.mxu1  ;;  %v10701_v48 = vpop.f32.mrf.mxu0 }
 0x54c   : > { %v10704_v46 = vadd.f32 %v7433_v29, %v10563_v45 }
 0x54d   : > { %v5116_v54 = vpop.f32.mrf.mxu1  ;;  %v10706_v22 = vpop.f32.mrf.mxu0 }
 0x54e   : > { %v10709_v26 = vadd.f32 %v5116_v54, %v10570_v49 }
 0x54f   : > { %v7436_v56 = vpop.f32.mrf.mxu1  ;;  %v10711_v51 = vpop.f32.mrf.mxu0 }
 0x550   : > { %v10714_v42 = vadd.f32 %v7436_v56, %v10573_v21 }
 0x551   : > { %v5129_v40 = vpop.f32.mrf.mxu1  ;;  %v10716_v33 = vpop.f32.mrf.mxu0 }
 0x552   : > { %v10719_v50 = vadd.f32 %v5129_v40, %v10576_v43 }
 0x553   : > { %v7437_v45 = vpop.f32.mrf.mxu1  ;;  %v10721_v32 = vpop.f32.mrf.mxu0 }
 0x554   : > { %11430 = vst [vmem:[#allocation13_spill] sm:$0xff] %v10721_v32  ;;  %v10724_v1 = vadd.f32 %v7437_v45, %v10579_v23 }
 0x555   : > { %v5132_v49 = vpop.f32.mrf.mxu1  ;;  %v10726_v58 = vpop.f32.mrf.mxu0 }
 0x556   : > { %11431 = vst [vmem:[#allocation9_spill] sm:$0xff] %v10726_v58  ;;  %v10729_v31 = vadd.f32 %v5132_v49, %v10586_v19 }
 0x557   : > { %v7440_v21 = vpop.f32.mrf.mxu1  ;;  %v10731_v61 = vpop.f32.mrf.mxu0 }
 0x558   : > { %11432 = vst [vmem:[#allocation15_spill] sm:$0xff] %v10731_v61  ;;  %v10734_v53 = vadd.f32 %v7440_v21, %v10589_v35 }
 0x559   : > { %v5145_v43 = vpop.f32.mrf.mxu1  ;;  %v10736_v13 = vpop.f32.mrf.mxu0 }
 0x55a   : > { %11433 = vst [vmem:[#allocation10_spill] sm:$0xff] %v10736_v13  ;;  %v10739_v28 = vadd.f32 %v5145_v43, %v10592_v60 }
 0x55b   : > { %v7441_v23 = vpop.f32.mrf.mxu1  ;;  %v10741_v38 = vpop.f32.mrf.mxu0 }
 0x55c   : > { %11434 = vst [vmem:[#allocation17_spill] sm:$0xff] %v10741_v38  ;;  %v10744_v15 = vadd.f32 %v7441_v23, %v10595_v11 }
 0x55d   : > { %v5148_v19 = vpop.f32.mrf.mxu1  ;;  %v10746_v29 = vpop.f32.mrf.mxu0 }
 0x55e   : > { %11435 = vst [vmem:[#allocation11_spill] sm:$0xff] %v10744_v15  ;;  %11436 = vst [vmem:[#allocation12_spill] sm:$0xff] %v10746_v29  ;;  %v10749_v54 = vadd.f32 %v5148_v19, %v10602_v12 }
 0x55f   : > { %v7444_v35 = vpop.f32.mrf.mxu1  ;;  %v10751_v56 = vpop.f32.mrf.mxu0 }
 0x560   : > { %11437 = vst [vmem:[#allocation20_spill] sm:$0xff] %v10749_v54  ;;  %11438 = vst [vmem:[#allocation14_spill] sm:$0xff] %v10751_v56  ;;  %v10754_v40 = vadd.f32 %v7444_v35, %v10605_v41 }
 0x561   : > { %v5161_v60 = vpop.f32.mrf.mxu1  ;;  %v10756_v45 = vpop.f32.mrf.mxu0 }
 0x562   : > { %11439 = vst [vmem:[#allocation22_spill] sm:$0xff] %v10754_v40  ;;  %11440 = vst [vmem:[#allocation16_spill] sm:$0xff] %v10756_v45  ;;  %v10759_v49 = vadd.f32 %v5161_v60, %v10608_v17 }
 0x563   : > { %v7445_v11 = vpop.f32.mrf.mxu1  ;;  %v10761_v21 = vpop.f32.mrf.mxu0 }
 0x564   : > { %11441 = vst [vmem:[#allocation24_spill] sm:$0xff] %v10759_v49  ;;  %11442 = vst [vmem:[#allocation18_spill] sm:$0xff] %v10761_v21  ;;  %v10764_v43 = vadd.f32 %v7445_v11, %v10611_v27 }
 0x565   : > { %v5164_v12 = vpop.f32.mrf.mxu1  ;;  %v10766_v23 = vpop.f32.mrf.mxu0 }
 0x566   : > { %11443 = vst [vmem:[#allocation19_spill] sm:$0xff] %v10764_v43  ;;  %11444 = vst [vmem:[#allocation27_spill] sm:$0xff] %v10766_v23  ;;  %v10769_v19 = vadd.f32 %v5164_v12, %v10618_v4 }
 0x567   : > { %v7448_v41 = vpop.f32.mrf.mxu1  ;;  %v10771_v35 = vpop.f32.mrf.mxu0 }
 0x568   : > { %11445 = vst [vmem:[#allocation21_spill] sm:$0xff] %v10769_v19  ;;  %11446 = vst [vmem:[#allocation29_spill] sm:$0xff] %v10771_v35  ;;  %v10774_v45 = vadd.f32 %v7448_v41, %v10621_v2 }
 0x569   : > { %v5177_v17 = vpop.f32.mrf.mxu1  ;;  %v10776_v60 = vpop.f32.mrf.mxu0 }
 0x56a   : > { %11447 = vst [vmem:[#allocation23_spill] sm:$0xff] %v10774_v45  ;;  %11448 = vst [vmem:[#allocation31_spill] sm:$0xff] %v10776_v60  ;;  %v10779_v21 = vadd.f32 %v5177_v17, %v10624_v59 }
 0x56b   : > { %v7449_v27 = vpop.f32.mrf.mxu1  ;;  %v10781_v11 = vpop.f32.mrf.mxu0 }
 0x56c   : > { %11449 = vst [vmem:[#allocation25_spill] sm:$0xff] %v10779_v21  ;;  %11450 = vst [vmem:[#allocation26_spill] sm:$0xff] %v10781_v11  ;;  %v10784_v23 = vadd.f32 %v7449_v27, %v10627_v62 }
 0x56d   : > { %v5180_v4 = vpop.f32.mrf.mxu1  ;;  %v10786_v12 = vpop.f32.mrf.mxu0 }
 0x56e   : > { %11451 = vst [vmem:[#allocation28_spill] sm:$0xff] %v10784_v23  ;;  %11452 = vst [vmem:[#allocation33_spill] sm:$0xff] %v10786_v12  ;;  %v10789_v35 = vadd.f32 %v5180_v4, %v10636_v20 }
 0x56f   : > { %v7452_v2 = vpop.f32.mrf.mxu1  ;;  %v10791_v41 = vpop.f32.mrf.mxu0 }
 0x570   : > { %11453 = vst [vmem:[#allocation30_spill] sm:$0xff] %v10789_v35  ;;  %11454 = vst [vmem:[#allocation32_spill] sm:$0xff] %v10791_v41  ;;  %v10794_v60 = vadd.f32 %v7452_v2, %v10639_v9 }
 0x571   : > { %v5193_v59 = vpop.f32.mrf.mxu1  ;;  %v10799_v11 = vpop.f32.mrf.mxu0 }
 0x572   : > { %11455 = vst [vmem:[#allocation34_spill] sm:$0xff] %v10794_v60  ;;  %v10797_v17 = vadd.f32 %v5193_v59, %v10643_v6  ;;  %11457 = vst [vmem:[#allocation35_spill] sm:$0xff] %v10799_v11 }
 0x573   : > { %v7453_v62 = vpop.f32.mrf.mxu1  ;;  %v10804_v23 = vpop.f32.mrf.mxu0 }
 0x574   : > { %11456 = vst [vmem:[#allocation39_spill] sm:$0xff] %v10797_v17  ;;  %v10802_v27 = vadd.f32 %v7453_v62, %v10646_v16  ;;  %11459 = vst [vmem:[#allocation42_spill] sm:$0xff] %v10804_v23 }
 0x575   : > { %v5196_v12 = vpop.f32.mrf.mxu1  ;;  %v10812_v41 = vpop.f32.mrf.mxu0 }
 0x576   : > { %11458 = vst [vmem:[#allocation36_spill] sm:$0xff] %v10802_v27  ;;  %v10807_v20 = vadd.f32 %v5196_v12, %v10652_v8  ;;  %11462 = vst [vmem:[#allocation54_spill] sm:$0xff] %v10812_v41 }
 0x577   : > { %v7456_v4 = vpop.f32.mrf.mxu1  ;;  %v7530_v11 = vpop.f32.mrf.mxu0 }
 0x578   : > { %11460 = vst [vmem:[#allocation37_spill] sm:$0xff] %v10807_v20  ;;  %v10810_v9 = vadd.f32 %v7456_v4, %v10657_v44 }
 0x579   : > { %v5209_v2 = vpop.f32.mrf.mxu1  ;;  %v5716_v20 = vpop.f32.mrf.mxu0 }
 0x57a   : > { %11461 = vst [vmem:[#allocation52_spill] sm:$0xff] %v10810_v9  ;;  %v10815_v6 = vadd.f32 %v5209_v2, %v10662_v39 }
 0x57b   : > { %v7457_v59 = vpop.f32.mrf.mxu1  ;;  %v10823_v9 = vpop.f32.mrf.mxu0 }
 0x57c   : > { %11463 = vst [vmem:[#allocation44_spill] sm:$0xff] %v10815_v6  ;;  %v10818_v16 = vadd.f32 %v7457_v59, %v10667_v0 }
 0x57d   : > { %v5212_v62 = vpop.f32.mrf.mxu1  ;;  %v10829_v2 = vpop.f32.mrf.mxu0 }
 0x57e   : > { %11464 = vst [vmem:[#allocation38_spill] sm:$0xff] %v10818_v16  ;;  %v10821_v23 = vadd.f32 %v5212_v62, %v10674_v25 }
 0x57f   : > { %v7496_v8 = vpop.f32.mrf.mxu1  ;;  %v10835_v16 = vpop.f32.mrf.mxu0 }
 0x580   : > { %11465 = vst [vmem:[#allocation46_spill] sm:$0xff] %v10821_v23 }
 0x581   : > { %v5504_v12 = vpop.f32.mrf.mxu1  ;;  %v10841_v23 = vpop.f32.mrf.mxu0 }
 0x583   : > { %v7497_v44 = vpop.f32.mrf.mxu1  ;;  %v10847_v17 = vpop.f32.mrf.mxu0 }
 0x585   : > { %v5507_v4 = vpop.f32.mrf.mxu1  ;;  %v10853_v21 = vpop.f32.mrf.mxu0 }
 0x587   : > { %v10825_v41 = vpop.f32.mrf.mxu1  ;;  %v10859_v29 = vpop.f32.mrf.mxu0 }
 0x589   : > { %v10827_v39 = vpop.f32.mrf.mxu1  ;;  %v10865_v43 = vpop.f32.mrf.mxu0 }
 0x58b   : > { %v10831_v0 = vpop.f32.mrf.mxu1  ;;  %v10871_v61 = vpop.f32.mrf.mxu0 }
 0x58d   : > { %v10833_v59 = vpop.f32.mrf.mxu1 }
 0x58f   : > { %v10837_v25 = vpop.f32.mrf.mxu1 }
 0x591   : > { %v10839_v62 = vpop.f32.mrf.mxu1 }
 0x593   : > { %v10843_v6 = vpop.f32.mrf.mxu1 }
 0x595   : > { %v10845_v27 = vpop.f32.mrf.mxu1 }
 0x597   : > { %v10849_v60 = vpop.f32.mrf.mxu1 }
 0x599   : > { %v10851_v35 = vpop.f32.mrf.mxu1 }
 0x59b   : > { %v10855_v56 = vpop.f32.mrf.mxu1 }
 0x59c   : > { %11466 = vst [vmem:[#allocation40_spill] sm:$0xff] %v10855_v56  ;;  %v10877_v56 = vpop.f32.mrf.mxu0 }
 0x59d   : > { %v10857_v45 = vpop.f32.mrf.mxu1 }
 0x59e   : > { %11467 = vst [vmem:[#allocation56_spill] sm:$0xff] %v10857_v45 }
 0x59f   : > { %v10861_v19 = vpop.f32.mrf.mxu1 }
 0x5a0   : > { %11468 = vst [vmem:[#allocation58_spill] sm:$0xff] %v10861_v19  ;;  %v10883_v19 = vpop.f32.mrf.mxu0 }
 0x5a1   : > { %v10863_v38 = vpop.f32.mrf.mxu1  ;;  %11476 = vst [vmem:[#allocation69_spill] sm:$0xff] %v10883_v19 }
 0x5a2   : > { %11469 = vst [vmem:[#allocation60_spill] sm:$0xff] %v10863_v38 }
 0x5a3   : > { %v10867_v13 = vpop.f32.mrf.mxu1 }
 0x5a4   : > { %11470 = vst [vmem:[#allocation41_spill] sm:$0xff] %v10867_v13  ;;  %v10889_v13 = vpop.f32.mrf.mxu0 }
 0x5a5   : > { %v10869_v49 = vpop.f32.mrf.mxu1  ;;  %11479 = vst [vmem:[#allocation48_spill] sm:$0xff] %v10889_v13 }
 0x5a6   : > { %11471 = vst [vmem:[#allocation62_spill] sm:$0xff] %v10869_v49 }
 0x5a7   : > { %v10873_v40 = vpop.f32.mrf.mxu1 }
 0x5a8   : > { %11472 = vst [vmem:[#allocation64_spill] sm:$0xff] %v10873_v40  ;;  %v10895_v40 = vpop.f32.mrf.mxu0 }
 0x5a9   : > { %v10875_v58 = vpop.f32.mrf.mxu1  ;;  %11482 = vst [vmem:[#allocation50_spill] sm:$0xff] %v10895_v40 }
 0x5aa   : > { %11473 = vst [vmem:[#allocation43_spill] sm:$0xff] %v10875_v58 }
 0x5ab   : > { %v10879_v45 = vpop.f32.mrf.mxu1 }
 0x5ac   : > { %11474 = vst [vmem:[#allocation45_spill] sm:$0xff] %v10879_v45  ;;  %v5432_v45 = vadd.f32 %v10649_v36, %v10672_v3  ;;  %v5431_v36 = vadd.f32 %v10664_v37, %v10689_v24  ;;  %v10929_v37 = vld [vmem:[%s11238_s12] ss:$0 sm:$0xff] }
 0x5ad   : > { %v10881_v54 = vpop.f32.mrf.mxu1 }
 0x5ae   : > { %11475 = vst [vmem:[#allocation66_spill] sm:$0xff] %v10881_v54  ;;  %v5633_v19 = vadd.f32 %v7496_v8, %v5432_v45 }
 0x5af   : > { %v10885_v38 = vpop.f32.mrf.mxu1 }
 0x5b0   : > { %11477 = vst [vmem:[#allocation47_spill] sm:$0xff] %v10885_v38  ;;  %v5430_v38 = vadd.f32 %v10654_v18, %v10679_v52  ;;  %v5845_v45 = vadd.f32 %v7530_v11, %v5633_v19  ;;  %v10920_v18 = vld [vmem:[%s11237_s11] ss:$0 sm:$0xff]  ;;  %v5632_v52 = vadd.f32 %v5507_v4, %v5431_v36 }
 0x5b1   : > { %v10887_v32 = vpop.f32.mrf.mxu1 }
 0x5b2   : > { %11478 = vst [vmem:[#allocation71_spill] sm:$0xff] %v10887_v32  ;;  %v10905_v32 = vpop.f32.mrf.mxu0  ;;  %v5844_v36 = vadd.f32 %v10829_v2, %v5632_v52  ;;  %v5440_v2 = vadd.f32 %v10691_v14, %v10714_v42 }
 0x5b3   : > { %v10891_v49 = vpop.f32.mrf.mxu1 }
 0x5b4   : > { %11480 = vst [vmem:[#allocation49_spill] sm:$0xff] %v10891_v49  ;;  %v5631_v49 = vadd.f32 %v5504_v12, %v5430_v38  ;;  %v10915_v3 = vpop.f32.mrf.mxu0  ;;  %v5641_v42 = vadd.f32 %v10837_v25, %v5440_v2  ;;  %v5441_v25 = vadd.f32 %v10701_v48, %v10724_v1 }
 0x5b5   : > { %v10893_v15 = vpop.f32.mrf.mxu1 }
 0x5b6   : > { %11481 = vst [vmem:[#allocation72_spill] sm:$0xff] %v10893_v15  ;;  %v5433_v15 = vadd.f32 %v10659_v5, %v10684_v55  ;;  %v5843_v12 = vadd.f32 %v5716_v20, %v5631_v49  ;;  %v5436_v5 = vadd.f32 %v10669_v63, %v10694_v34  ;;  %v5434_v55 = vadd.f32 %v10676_v7, %v10699_v47 }
 0x5b7   : > { %v10897_v58 = vpop.f32.mrf.mxu1  ;;  %v5437_v7 = vadd.f32 %v10681_v10, %v10704_v46  ;;  %v5642_v1 = vadd.f32 %v10843_v6, %v5441_v25  ;;  %v5444_v6 = vadd.f32 %v10711_v51, %v10734_v53 }
 0x5b8   : > { %11483 = vst [vmem:[#allocation51_spill] sm:$0xff] %v10897_v58  ;;  %v5634_v58 = vadd.f32 %v7497_v44, %v5433_v15  ;;  %v10931_v15 = vpop.f32.mrf.mxu0  ;;  %v5637_v20 = vadd.f32 %v10825_v41, %v5436_v5  ;;  %v5635_v63 = vadd.f32 %v10827_v39, %v5434_v55  ;;  %v7646_v39 = vld [vmem:[%s7777_s15 + $0x10] sm:$0xff]  ;;  %v7647_v5 = vld [vmem:[%s7777_s15] sm:$0xff] }
 0x5b9   : > { %v10901_v54 = vpop.f32.mrf.mxu1 }
 0x5ba   : > { %v5846_v49 = vadd.f32 %v10823_v9, %v5634_v58  ;;  %v5435_v58 = vadd.f32 %v10686_v30, %v10709_v26  ;;  %v10945_v9 = vpop.f32.mrf.mxu0  ;;  %v5849_v30 = vadd.f32 %v10835_v16, %v5637_v20  ;;  %v7648_v20 = vld [vmem:[%s7777_s15 + $0x18] sm:$0xff] }
 0x5bb   : > { %v10907_v13 = vpop.f32.mrf.mxu1 }
 0x5bd   : > { %v10911_v40 = vpop.f32.mrf.mxu1 }
 0x5bf   : > { %v7564_v8 = vpop.f32.mrf.mxu1 }
 0x5c0   : > { %v6051_v38 = vadd.f32 %v7564_v8, %v5845_v45  ;;  %v5638_v45 = vadd.f32 %v10831_v0, %v5437_v7  ;;  %v5847_v0 = vadd.f32 %v10841_v23, %v5635_v63 }
 0x5c1   : > { %v5922_v24 = vpop.f32.mrf.mxu1 }
 0x5c2   : > { %v6090_v19 = vmul.f32 %v10920_v18, %v6051_v38  ;;  %v6049_v11 = vadd.f32 %v5922_v24, %v5843_v12  ;;  %v5636_v12 = vadd.f32 %v10833_v59, %v5435_v58  ;;  %v5438_v24 = vadd.f32 %v10696_v57, %v10719_v50 }
 0x5c3   : > { %v7565_v34 = vpop.f32.mrf.mxu1  ;;  %v5850_v16 = vadd.f32 %v10847_v17, %v5638_v45  ;;  %v5439_v57 = vadd.f32 %v10706_v22, %v10729_v31 }
 0x5c4   : > { %v6129_v47 = vadd.f32 %v10929_v37, %v6090_v19  ;;  %v6088_v44 = vmul.f32 %v10920_v18, %v6049_v11  ;;  %v6052_v4 = vadd.f32 %v7565_v34, %v5846_v49  ;;  %v10969_v49 = vpop.f32.mrf.mxu0  ;;  %v5639_v48 = vadd.f32 %v10839_v62, %v5438_v24 }
 0x5c5   : > { %v5925_v41 = vpop.f32.mrf.mxu1  ;;  %v5640_v62 = vadd.f32 %v10845_v27, %v5439_v57 }
 0x5c6   : > { %v6161_v10 = vadd.f32 %v7646_v39, %v6129_v47  ;;  %v6127_v46 = vadd.f32 %v10929_v37, %v6088_v44  ;;  %v6091_v8 = vmul.f32 %v10920_v18, %v6052_v4  ;;  %v6050_v38 = vadd.f32 %v5925_v41, %v5844_v36  ;;  %v7649_v4 = vld [vmem:[%s7777_s15 + $0x8] sm:$0xff]  ;;  %v10989_v41 = vpop.f32.mrf.mxu0 }
 0x5c7   : > { %v7568_v26 = vpop.f32.mrf.mxu1  ;;  %v5848_v47 = vadd.f32 %v10853_v21, %v5636_v12  ;;  %v5853_v21 = vadd.f32 %v10859_v29, %v5641_v42  ;;  %v7650_v12 = vld [vmem:[%s7777_s15 + $0x30] sm:$0xff] }
 0x5c8   : > { %v6193_v52 = vmax.f32 %v6161_v10, 0.0  ;;  %v6159_v55 = vadd.f32 %v7647_v5, %v6127_v46  ;;  %v6130_v59 = vadd.f32 %v10929_v37, %v6091_v8  ;;  %v6089_v14 = vmul.f32 %v10920_v18, %v6050_v38 }
 0x5c9   : > { %v6055_v19 = vadd.f32 %v7568_v26, %v5849_v30  ;;  %v5938_v11 = vpop.f32.mrf.mxu1  ;;  %v5442_v38 = vadd.f32 %v10716_v33, %v10739_v28  ;;  %v7651_v30 = vld [vmem:[%s7777_s15 + $0x20] sm:$0xff]  ;;  %v5645_v5 = vadd.f32 %v10849_v60, %v5444_v6  ;;  %v5851_v33 = vadd.f32 %v10865_v43, %v5639_v48  ;;  %v11484_v60 = vld [vmem:[#allocation11_spill] sm:$0xff] }
 0x5ca   : > { %6225 = vst.msk [vmem:[%s10958_s20 + $0x10] sm:$0xff] %vm474_vm1, %v6193_v52  ;;  %v6191_v23 = vmax.f32 %v6159_v55, 0.0  ;;  %v6162_v63 = vadd.f32 %v7648_v20, %v6130_v59  ;;  %v6128_v7 = vadd.f32 %v10929_v37, %v6089_v14  ;;  %v6053_v34 = vadd.f32 %v5938_v11, %v5847_v0  ;;  %v11009_v55 = vpop.f32.mrf.mxu0  ;;  %v7652_v14 = vld [vmem:[%s7777_s15 + $0x38] sm:$0xff] }
 0x5cb   : > { %v6094_v50 = vmul.f32 %v10920_v18, %v6055_v19  ;;  %v7569_v17 = vpop.f32.mrf.mxu1  ;;  %v5854_v28 = vadd.f32 %v10871_v61, %v5642_v1  ;;  %v5643_v11 = vadd.f32 %v10851_v35, %v5442_v38  ;;  %v5852_v61 = vadd.f32 %v10877_v56, %v5640_v62  ;;  %v11486_v35 = vld [vmem:[#allocation20_spill] sm:$0xff] }
 0x5cc   : > { %6223 = vst.msk [vmem:[%s10958_s20] sm:$0xff] %vm474_vm1, %v6191_v23  ;;  %v6194_v44 = vmax.f32 %v6162_v63, 0.0  ;;  %v6160_v36 = vadd.f32 %v7649_v4, %v6128_v7  ;;  %v6092_v45 = vmul.f32 %v10920_v18, %v6053_v34  ;;  %v6056_v58 = vadd.f32 %v7569_v17, %v5850_v16  ;;  %v11485_v16 = vld [vmem:[#allocation13_spill] sm:$0xff]  ;;  %v11030_v48 = vpop.f32.mrf.mxu0 }
 0x5cd   : > { %v6133_v22 = vadd.f32 %v10929_v37, %v6094_v50  ;;  %v5941_v31 = vpop.f32.mrf.mxu1  ;;  %v5445_v23 = vadd.f32 %v11485_v16, %v11484_v60  ;;  %v7653_v7 = vld [vmem:[%s7777_s15 + $0x28] sm:$0xff] }
 0x5ce   : > { %6226 = vst.msk [vmem:[%s10958_s20 + $0x18] sm:$0xff] %vm474_vm1, %v6194_v44  ;;  %v6192_v39 = vmax.f32 %v6160_v36, 0.0  ;;  %v6131_v10 = vadd.f32 %v10929_v37, %v6092_v45  ;;  %v6095_v46 = vmul.f32 %v10920_v18, %v6056_v58  ;;  %v6054_v8 = vadd.f32 %v5941_v31, %v5848_v47  ;;  %v11487_v50 = vld [vmem:[#allocation9_spill] sm:$0xff]  ;;  %v11488_v47 = vld [vmem:[#allocation22_spill] sm:$0xff]  ;;  %v11489_v44 = vld [vmem:[#allocation15_spill] sm:$0xff] }
 0x5cf   : > { %v6165_v29 = vadd.f32 %v7650_v12, %v6133_v22  ;;  %v7572_v2 = vpop.f32.mrf.mxu1  ;;  %v5443_v17 = vadd.f32 %v11487_v50, %v11486_v35  ;;  %v5448_v4 = vadd.f32 %v11489_v44, %v11488_v47  ;;  %v11490_v58 = vld [vmem:[#allocation69_spill] sm:$0xff]  ;;  %v7654_v22 = vld [vmem:[%s7777_s15 + $0x50] sm:$0xff]  ;;  %v11493_v12 = vld [vmem:[#allocation48_spill] sm:$0xff] }
 0x5d0   : > { %6224 = vst.msk [vmem:[%s10958_s20 + $0x8] sm:$0xff] %vm474_vm1, %v6192_v39  ;;  %v6163_v26 = vadd.f32 %v7651_v30, %v6131_v10  ;;  %v6134_v0 = vadd.f32 %v10929_v37, %v6095_v46  ;;  %v6093_v52 = vmul.f32 %v10920_v18, %v6054_v8  ;;  %v6059_v27 = vadd.f32 %v7572_v2, %v5853_v21  ;;  %v11491_v10 = vld [vmem:[#allocation40_spill] sm:$0xff]  ;;  %v7657_v50 = vld [vmem:[%s7777_s15 + $0x48] sm:$0xff] }
 0x5d1   : > { %v6197_v51 = vmax.f32 %v6165_v29, 0.0  ;;  %v5954_v53 = vpop.f32.mrf.mxu1  ;;  %v5857_v56 = vadd.f32 %v11490_v58, %v5645_v5  ;;  %v5646_v46 = vadd.f32 %v11491_v10, %v5445_v23  ;;  %v11492_v8 = vld [vmem:[#allocation56_spill] sm:$0xff]  ;;  %v5855_v29 = vadd.f32 %v11493_v12, %v5643_v11  ;;  %v7656_v11 = vld [vmem:[%s7777_s15 + $0x58] sm:$0xff]  ;;  %v11506_v12 = vld [vmem:[#allocation25_spill] sm:$0xff] }
 0x5d2   : > { %v6195_v59 = vmax.f32 %v6163_v26, 0.0  ;;  %v6166_v42 = vadd.f32 %v7652_v14, %v6134_v0  ;;  %v6132_v24 = vadd.f32 %v10929_v37, %v6093_v52  ;;  %v6098_v19 = vmul.f32 %v10920_v18, %v6059_v27  ;;  %v11494_v52 = vld [vmem:[#allocation58_spill] sm:$0xff]  ;;  %v11495_v5 = vld [vmem:[#allocation24_spill] sm:$0xff] }
 0x5d3   : > { %6229 = vst.msk [vmem:[%s10958_s20 + $0x30] sm:$0xff] %vm474_vm1, %v6197_v51  ;;  %v6057_v43 = vadd.f32 %v5954_v53, %v5851_v33  ;;  %v7573_v20 = vpop.f32.mrf.mxu1  ;;  %v5644_v62 = vadd.f32 %v11492_v8, %v5443_v17  ;;  %v5649_v27 = vadd.f32 %v11494_v52, %v5448_v4  ;;  %v11496_v51 = vld [vmem:[#allocation10_spill] sm:$0xff]  ;;  %v11497_v53 = vld [vmem:[#allocation19_spill] sm:$0xff]  ;;  %v7655_v14 = vld [vmem:[%s7777_s15 + $0x40] sm:$0xff] }
 0x5d4   : > { %6227 = vst.msk [vmem:[%s10958_s20 + $0x20] sm:$0xff] %vm474_vm1, %v6195_v59  ;;  %v6198_v63 = vmax.f32 %v6166_v42, 0.0  ;;  %v6164_v34 = vadd.f32 %v7653_v7, %v6132_v24  ;;  %v6137_v25 = vadd.f32 %v10929_v37, %v6098_v19  ;;  %v6060_v57 = vadd.f32 %v7573_v20, %v5854_v28  ;;  %v11498_v28 = vld [vmem:[#allocation17_spill] sm:$0xff]  ;;  %v11050_v19 = vpop.f32.mrf.mxu0  ;;  %v11499_v20 = vld [vmem:[#allocation60_spill] sm:$0xff]  ;;  %v11500_v7 = vld [vmem:[#allocation50_spill] sm:$0xff] }
 0x5d5   : > { %v6096_v36 = vmul.f32 %v10920_v18, %v6057_v43  ;;  %v5957_v45 = vpop.f32.mrf.mxu1  ;;  %v5446_v33 = vadd.f32 %v11496_v51, %v11495_v5  ;;  %v5449_v59 = vadd.f32 %v11498_v28, %v11497_v53  ;;  %v11501_v4 = vld [vmem:[#allocation41_spill] sm:$0xff]  ;;  %v11503_v58 = vld [vmem:[#allocation12_spill] sm:$0xff] }
 0x5d6   : > { %6230 = vst.msk [vmem:[%s10958_s20 + $0x38] sm:$0xff] %vm474_vm1, %v6198_v63  ;;  %v6196_v1 = vmax.f32 %v6164_v34, 0.0  ;;  %v6169_v31 = vadd.f32 %v7654_v22, %v6137_v25  ;;  %v6099_v21 = vmul.f32 %v10920_v18, %v6060_v57  ;;  %v6058_v39 = vadd.f32 %v5957_v45, %v5852_v61  ;;  %v11502_v45 = vld [vmem:[#allocation21_spill] sm:$0xff]  ;;  %v7659_v52 = vld [vmem:[%s7777_s15 + $0x60] sm:$0xff] }
 0x5d7   : > { %v6135_v6 = vadd.f32 %v10929_v37, %v6096_v36  ;;  %v7576_v38 = vpop.f32.mrf.mxu1  ;;  %v5647_v61 = vadd.f32 %v11499_v20, %v5446_v33  ;;  %v5858_v34 = vadd.f32 %v11500_v7, %v5646_v46  ;;  %v5856_v57 = vadd.f32 %v10905_v32, %v5644_v62  ;;  %v11504_v62 = vld [vmem:[#allocation23_spill] sm:$0xff]  ;;  %v11508_v33 = vld [vmem:[#allocation62_spill] sm:$0xff]  ;;  %v11509_v28 = vld [vmem:[#allocation64_spill] sm:$0xff] }
 0x5d8   : > { %6228 = vst.msk [vmem:[%s10958_s20 + $0x28] sm:$0xff] %vm474_vm1, %v6196_v1  ;;  %v6201_v2 = vmax.f32 %v6169_v31, 0.0  ;;  %v6138_v30 = vadd.f32 %v10929_v37, %v6099_v21  ;;  %v6097_v26 = vmul.f32 %v10920_v18, %v6058_v39  ;;  %v6063_v0 = vadd.f32 %v7576_v38, %v5857_v56  ;;  %v11069_v31 = vpop.f32.mrf.mxu0  ;;  %v7658_v39 = vld [vmem:[%s7777_s15 + $0x70] sm:$0xff] }
 0x5d9   : > { %v6167_v42 = vadd.f32 %v7655_v14, %v6135_v6  ;;  %v5970_v24 = vpop.f32.mrf.mxu1  ;;  %v5650_v36 = vadd.f32 %v11501_v4, %v5449_v59  ;;  %v5447_v56 = vadd.f32 %v11503_v58, %v11502_v45  ;;  %v5861_v32 = vadd.f32 %v10915_v3, %v5649_v27  ;;  %v11505_v6 = vld [vmem:[#allocation14_spill] sm:$0xff]  ;;  %v11515_v45 = vld [vmem:[#allocation45_spill] sm:$0xff] }
 0x5da   : > { %6233 = vst.msk [vmem:[%s10958_s20 + $0x50] sm:$0xff] %vm474_vm1, %v6201_v2  ;;  %v6170_v60 = vadd.f32 %v7656_v11, %v6138_v30  ;;  %v6136_v16 = vadd.f32 %v10929_v37, %v6097_v26  ;;  %v6102_v23 = vmul.f32 %v10920_v18, %v6063_v0  ;;  %v6061_v43 = vadd.f32 %v5970_v24, %v5855_v29  ;;  %v11507_v29 = vld [vmem:[#allocation16_spill] sm:$0xff]  ;;  %v11089_v24 = vpop.f32.mrf.mxu0 }
 0x5db   : > { %v6199_v63 = vmax.f32 %v6167_v42, 0.0  ;;  %v7577_v25 = vpop.f32.mrf.mxu1  ;;  %v5452_v38 = vadd.f32 %v11505_v6, %v11504_v62  ;;  %v5450_v2 = vadd.f32 %v11507_v29, %v11506_v12  ;;  %v5859_v26 = vadd.f32 %v10931_v15, %v5647_v61  ;;  %v11511_v61 = vld [vmem:[#allocation28_spill] sm:$0xff]  ;;  %v11516_v6 = vld [vmem:[#allocation66_spill] sm:$0xff]  ;;  %v11518_v29 = vld [vmem:[#allocation29_spill] sm:$0xff] }
 0x5dc   : > { %v6202_v35 = vmax.f32 %v6170_v60, 0.0  ;;  %v6168_v17 = vadd.f32 %v7657_v50, %v6136_v16  ;;  %v6141_v47 = vadd.f32 %v10929_v37, %v6102_v23  ;;  %v6100_v44 = vmul.f32 %v10920_v18, %v6061_v43  ;;  %v11510_v43 = vld [vmem:[#allocation43_spill] sm:$0xff]  ;;  %v11517_v12 = vld [vmem:[#allocation34_spill] sm:$0xff] }
 0x5dd   : > { %6231 = vst.msk [vmem:[%s10958_s20 + $0x40] sm:$0xff] %vm474_vm1, %v6199_v63  ;;  %v6064_v1 = vadd.f32 %v7577_v25, %v5858_v34  ;;  %v5973_v22 = vpop.f32.mrf.mxu1  ;;  %v5648_v53 = vadd.f32 %v11508_v33, %v5447_v56  ;;  %v5653_v59 = vadd.f32 %v11509_v28, %v5452_v38  ;;  %v5862_v15 = vadd.f32 %v10945_v9, %v5650_v36  ;;  %v11512_v63 = vld [vmem:[#allocation18_spill] sm:$0xff]  ;;  %v11514_v25 = vld [vmem:[#allocation27_spill] sm:$0xff] }
 0x5de   : > { %6234 = vst.msk [vmem:[%s10958_s20 + $0x58] sm:$0xff] %vm474_vm1, %v6202_v35  ;;  %v6200_v21 = vmax.f32 %v6168_v17, 0.0  ;;  %v6173_v10 = vadd.f32 %v7658_v39, %v6141_v47  ;;  %v6139_v46 = vadd.f32 %v10929_v37, %v6100_v44  ;;  %v6062_v8 = vadd.f32 %v5973_v22, %v5856_v57  ;;  %v11513_v34 = vld [vmem:[#allocation30_spill] sm:$0xff]  ;;  %v7660_v35 = vld [vmem:[%s7777_s15 + $0x78] sm:$0xff]  ;;  %v7661_v17 = vld [vmem:[%s7777_s15 + $0x68] sm:$0xff] }
 0x5df   : > { %v6103_v30 = vmul.f32 %v10920_v18, %v6064_v1  ;;  %v7580_v3 = vpop.f32.mrf.mxu1  ;;  %v5651_v20 = vadd.f32 %v11510_v43, %v5450_v2  ;;  %v5453_v7 = vadd.f32 %v11512_v63, %v11511_v61  ;;  %v5451_v57 = vadd.f32 %v11514_v25, %v11513_v34  ;;  %v11522_v28 = vld [vmem:[#allocation26_spill] sm:$0xff]  ;;  %v11524_v63 = vld [vmem:[#allocation71_spill] sm:$0xff] }
 0x5e0   : > { %6232 = vst.msk [vmem:[%s10958_s20 + $0x48] sm:$0xff] %vm474_vm1, %v6200_v21  ;;  %v6205_v0 = vmax.f32 %v6173_v10, 0.0  ;;  %v6171_v27 = vadd.f32 %v7659_v52, %v6139_v46  ;;  %v6101_v5 = vmul.f32 %v10920_v18, %v6062_v8  ;;  %v6067_v51 = vadd.f32 %v7580_v3, %v5861_v32  ;;  %v11109_v21 = vpop.f32.mrf.mxu0  ;;  %v7662_v10 = vld [vmem:[%s7777_s15 + $0x90] sm:$0xff] }
 0x5e1   : > { %v6142_v14 = vadd.f32 %v10929_v37, %v6103_v30  ;;  %v5986_v42 = vpop.f32.mrf.mxu1  ;;  %v5654_v58 = vadd.f32 %v11515_v45, %v5453_v7  ;;  %v5860_v1 = vadd.f32 %v10969_v49, %v5648_v53  ;;  %v5865_v32 = vadd.f32 %v10989_v41, %v5653_v59  ;;  %v11521_v53 = vld [vmem:[#allocation36_spill] sm:$0xff] }
 0x5e2   : > { %6237 = vst.msk [vmem:[%s10958_s20 + $0x70] sm:$0xff] %vm474_vm1, %v6205_v0  ;;  %v6203_v11 = vmax.f32 %v6171_v27, 0.0  ;;  %v6140_v60 = vadd.f32 %v10929_v37, %v6101_v5  ;;  %v6106_v16 = vmul.f32 %v10920_v18, %v6067_v51  ;;  %v6065_v23 = vadd.f32 %v5986_v42, %v5859_v26  ;;  %v7663_v26 = vld [vmem:[%s7777_s15 + $0x80] sm:$0xff]  ;;  %v11519_v5 = vld [vmem:[#allocation39_spill] sm:$0xff] }
 0x5e3   : > { %v6174_v9 = vadd.f32 %v7660_v35, %v6142_v14  ;;  %v7581_v50 = vpop.f32.mrf.mxu1  ;;  %v5652_v38 = vadd.f32 %v11516_v6, %v5451_v57  ;;  %v5456_v2 = vadd.f32 %v11518_v29, %v11517_v12  ;;  %v5863_v41 = vadd.f32 %v11009_v55, %v5651_v20  ;;  %v11520_v51 = vld [vmem:[#allocation31_spill] sm:$0xff]  ;;  %v11530_v6 = vld [vmem:[#allocation72_spill] sm:$0xff] }
 0x5e4   : > { %6235 = vst.msk [vmem:[%s10958_s20 + $0x60] sm:$0xff] %vm474_vm1, %v6203_v11  ;;  %v6172_v47 = vadd.f32 %v7661_v17, %v6140_v60  ;;  %v6145_v44 = vadd.f32 %v10929_v37, %v6106_v16  ;;  %v6104_v4 = vmul.f32 %v10920_v18, %v6065_v23  ;;  %v6068_v36 = vadd.f32 %v7581_v50, %v5862_v15  ;;  %v5815_v15 = vpop.f32.mrf.mxu0  ;;  %v7664_v60 = vld [vmem:[%s7777_s15 + $0x98] sm:$0xff] }
 0x5e5   : > { %v6206_v56 = vmax.f32 %v6174_v9, 0.0  ;;  %v5989_v22 = vpop.f32.mrf.mxu1  ;;  %v5454_v33 = vadd.f32 %v11520_v51, %v11519_v5  ;;  %v5457_v59 = vadd.f32 %v11522_v28, %v11521_v53  ;;  %v5866_v55 = vadd.f32 %v11030_v48, %v5654_v58  ;;  %v11523_v20 = vld [vmem:[#allocation47_spill] sm:$0xff]  ;;  %v11528_v58 = vld [vmem:[#allocation52_spill] sm:$0xff] }
 0x5e6   : > { %v6204_v39 = vmax.f32 %v6172_v47, 0.0  ;;  %v6177_v46 = vadd.f32 %v7662_v10, %v6145_v44  ;;  %v6143_v8 = vadd.f32 %v10929_v37, %v6104_v4  ;;  %v6107_v62 = vmul.f32 %v10920_v18, %v6068_v36  ;;  %v7558_v57 = vpop.f32.mrf.mxu0  ;;  %v11525_v47 = vld [vmem:[#allocation49_spill] sm:$0xff]  ;;  %v11532_v51 = vld [vmem:[#allocation44_spill] sm:$0xff] }
 0x5e7   : > { %6238 = vst.msk [vmem:[%s10958_s20 + $0x78] sm:$0xff] %vm474_vm1, %v6206_v56  ;;  %v6066_v49 = vadd.f32 %v5989_v22, %v5860_v1  ;;  %v7584_v30 = vpop.f32.mrf.mxu1  ;;  %v5657_v61 = vadd.f32 %v11523_v20, %v5456_v2  ;;  %v5655_v7 = vadd.f32 %v11524_v63, %v5454_v33  ;;  %v5864_v48 = vadd.f32 %v11050_v19, %v5652_v38  ;;  %v11526_v4 = vld [vmem:[#allocation37_spill] sm:$0xff]  ;;  %v11529_v56 = vld [vmem:[#allocation32_spill] sm:$0xff]  ;;  %v11533_v33 = vld [vmem:[#allocation35_spill] sm:$0xff] }
 0x5e8   : > { %6236 = vst.msk [vmem:[%s10958_s20 + $0x68] sm:$0xff] %vm474_vm1, %v6204_v39  ;;  %v6209_v3 = vmax.f32 %v6177_v46, 0.0  ;;  %v6175_v0 = vadd.f32 %v7663_v26, %v6143_v8  ;;  %v6146_v52 = vadd.f32 %v10929_v37, %v6107_v62  ;;  %v6071_v27 = vadd.f32 %v7584_v30, %v5865_v32  ;;  %v11527_v36 = vld [vmem:[#allocation33_spill] sm:$0xff]  ;;  %v7666_v39 = vld [vmem:[%s7777_s15 + $0xb0] sm:$0xff]  ;;  %v5828_v30 = vpop.f32.mrf.mxu0 }
 0x5e9   : > { %v6105_v14 = vmul.f32 %v10920_v18, %v6066_v49  ;;  %v6002_v42 = vpop.f32.mrf.mxu1  ;;  %v5658_v44 = vadd.f32 %v11525_v47, %v5457_v59  ;;  %v5455_v45 = vadd.f32 %v11527_v36, %v11526_v4  ;;  %v5460_v1 = vadd.f32 %v11529_v56, %v11528_v58  ;;  %v7665_v22 = vld [vmem:[%s7777_s15 + $0x88] sm:$0xff]  ;;  %v11537_v20 = vld [vmem:[#allocation54_spill] sm:$0xff] }
 0x5ea   : > { %6241 = vst.msk [vmem:[%s10958_s20 + $0x90] sm:$0xff] %vm474_vm1, %v6209_v3  ;;  %v6207_v11 = vmax.f32 %v6175_v0, 0.0  ;;  %v6178_v16 = vadd.f32 %v7664_v60, %v6146_v52  ;;  %v6110_v23 = vmul.f32 %v10920_v18, %v6071_v27  ;;  %v6069_v43 = vadd.f32 %v6002_v42, %v5863_v41  ;;  %v7667_v3 = vld [vmem:[%s7777_s15 + $0xa0] sm:$0xff]  ;;  %v11531_v27 = vld [vmem:[#allocation51_spill] sm:$0xff]  ;;  %v11534_v60 = vld [vmem:[#allocation38_spill] sm:$0xff] }
 0x5eb   : > { %v6144_v34 = vadd.f32 %v10929_v37, %v6105_v14  ;;  %v7585_v25 = vpop.f32.mrf.mxu1  ;;  %v5656_v38 = vadd.f32 %v11530_v6, %v5455_v45  ;;  %v5869_v29 = vadd.f32 %v11069_v31, %v5657_v61  ;;  %v5867_v49 = vadd.f32 %v11089_v24, %v5655_v7  ;;  %v7668_v14 = vld [vmem:[%s7777_s15 + $0xb8] sm:$0xff] }
 0x5ec   : > { %6239 = vst.msk [vmem:[%s10958_s20 + $0x80] sm:$0xff] %vm474_vm1, %v6207_v11  ;;  %v6210_v35 = vmax.f32 %v6178_v16, 0.0  ;;  %v6149_v9 = vadd.f32 %v10929_v37, %v6110_v23  ;;  %v6108_v50 = vmul.f32 %v10920_v18, %v6069_v43  ;;  %v6072_v17 = vadd.f32 %v7585_v25, %v5866_v55  ;;  %v11535_v16 = vld [vmem:[#allocation42_spill] sm:$0xff] }
 0x5ed   : > { %v6176_v19 = vadd.f32 %v7665_v22, %v6144_v34  ;;  %v6005_v32 = vpop.f32.mrf.mxu1  ;;  %v5661_v5 = vadd.f32 %v11531_v27, %v5460_v1  ;;  %v5458_v53 = vadd.f32 %v11533_v33, %v11532_v51  ;;  %v5870_v24 = vadd.f32 %v11109_v21, %v5658_v44  ;;  %v11536_v43 = vld [vmem:[#allocation46_spill] sm:$0xff]  ;;  %v7559_v21 = vpop.f32.mrf.mxu0 }
 0x5ee   : > { %6242 = vst.msk [vmem:[%s10958_s20 + $0x98] sm:$0xff] %vm474_vm1, %v6210_v35  ;;  %v6181_v10 = vadd.f32 %v7666_v39, %v6149_v9  ;;  %v6147_v46 = vadd.f32 %v10929_v37, %v6108_v50  ;;  %v6111_v8 = vmul.f32 %v10920_v18, %v6072_v17  ;;  %v6070_v62 = vadd.f32 %v6005_v32, %v5864_v48  ;;  %v7669_v48 = vld [vmem:[%s7777_s15 + $0xa8] sm:$0xff]  ;;  %v7670_v22 = vld [vmem:[%s7777_s15 + $0xd0] sm:$0xff] }
 0x5ef   : > { %v6208_v12 = vmax.f32 %v6176_v19, 0.0  ;;  %v7588_v2 = vpop.f32.mrf.mxu1  ;;  %v5461_v23 = vadd.f32 %v11535_v16, %v11534_v60  ;;  %v5459_v61 = vadd.f32 %v11537_v20, %v11536_v43  ;;  %v5868_v34 = vadd.f32 %v5815_v15, %v5656_v38  ;;  %v7675_v60 = vld [vmem:[%s7777_s15 + $0xe0] sm:$0xff] }
 0x5f0   : > { %v6213_v41 = vmax.f32 %v6181_v10, 0.0  ;;  %v6179_v26 = vadd.f32 %v7667_v3, %v6147_v46  ;;  %v6150_v0 = vadd.f32 %v10929_v37, %v6111_v8  ;;  %v6109_v52 = vmul.f32 %v10920_v18, %v6070_v62 }
 0x5f1   : > { %6240 = vst.msk [vmem:[%s10958_s20 + $0x88] sm:$0xff] %vm474_vm1, %v6208_v12  ;;  %v6075_v31 = vadd.f32 %v7588_v2, %v5869_v29  ;;  %v6018_v28 = vpop.f32.mrf.mxu1  ;;  %v5659_v17 = vadd.f32 %v10901_v54, %v5458_v53  ;;  %v5873_v47 = vadd.f32 %v7558_v57, %v5661_v5  ;;  %v5662_v44 = vadd.f32 %v10907_v13, %v5461_v23  ;;  %v5831_v57 = vpop.f32.mrf.mxu0  ;;  %v7671_v13 = vld [vmem:[%s7777_s15 + $0xc0] sm:$0xff]  ;;  %v7672_v12 = vld [vmem:[%s7777_s15 + $0xd8] sm:$0xff] }
 0x5f2   : > { %6245 = vst.msk [vmem:[%s10958_s20 + $0xb0] sm:$0xff] %vm474_vm1, %v6213_v41  ;;  %v6211_v59 = vmax.f32 %v6179_v26, 0.0  ;;  %v6182_v42 = vadd.f32 %v7668_v14, %v6150_v0  ;;  %v6148_v55 = vadd.f32 %v10929_v37, %v6109_v52  ;;  %v6073_v11 = vadd.f32 %v6018_v28, %v5867_v49  ;;  %v7673_v0 = vld [vmem:[%s7777_s15 + $0xc8] sm:$0xff]  ;;  %v7676_v23 = vld [vmem:[%s7777_s15 + $0xf8] sm:$0xff] }
 0x5f3   : > { %v6114_v63 = vmul.f32 %v10920_v18, %v6075_v31  ;;  %v7589_v7 = vpop.f32.mrf.mxu1  ;;  %v5660_v1 = vadd.f32 %v10911_v40, %v5459_v61  ;;  %v5871_v8 = vadd.f32 %v5828_v30, %v5659_v17  ;;  %v5874_v62 = vadd.f32 %v7559_v21, %v5662_v44  ;;  %v7674_v31 = vld [vmem:[%s7777_s15 + $0xf0] sm:$0xff] }
 0x5f4   : > { %6243 = vst.msk [vmem:[%s10958_s20 + $0xa0] sm:$0xff] %vm474_vm1, %v6211_v59  ;;  %v6214_v25 = vmax.f32 %v6182_v42, 0.0  ;;  %v6180_v35 = vadd.f32 %v7669_v48, %v6148_v55  ;;  %v6112_v9 = vmul.f32 %v10920_v18, %v6073_v11  ;;  %v6076_v50 = vadd.f32 %v7589_v7, %v5870_v24  ;;  %v7677_v7 = vld [vmem:[%s7777_s15 + $0xe8] sm:$0xff] }
 0x5f5   : > { %v6153_v4 = vadd.f32 %v10929_v37, %v6114_v63  ;;  %v6021_v15 = vpop.f32.mrf.mxu1  ;;  %v5872_v41 = vadd.f32 %v5831_v57, %v5660_v1 }
 0x5f6   : > { %6246 = vst.msk [vmem:[%s10958_s20 + $0xb8] sm:$0xff] %vm474_vm1, %v6214_v25  ;;  %v6212_v36 = vmax.f32 %v6180_v35, 0.0  ;;  %v6151_v45 = vadd.f32 %v10929_v37, %v6112_v9  ;;  %v6115_v58 = vmul.f32 %v10920_v18, %v6076_v50  ;;  %v6074_v56 = vadd.f32 %v6021_v15, %v5868_v34 }
 0x5f7   : > { %v6185_v54 = vadd.f32 %v7670_v22, %v6153_v4  ;;  %v7592_v19 = vpop.f32.mrf.mxu1 }
 0x5f8   : > { %6244 = vst.msk [vmem:[%s10958_s20 + $0xa8] sm:$0xff] %vm474_vm1, %v6212_v36  ;;  %v6183_v32 = vadd.f32 %v7671_v13, %v6151_v45  ;;  %v6154_v39 = vadd.f32 %v10929_v37, %v6115_v58  ;;  %v6113_v10 = vmul.f32 %v10920_v18, %v6074_v56  ;;  %v6079_v46 = vadd.f32 %v7592_v19, %v5873_v47 }
 0x5f9   : > { %v6217_v40 = vmax.f32 %v6185_v54, 0.0  ;;  %v6034_v6 = vpop.f32.mrf.mxu1 }
 0x5fa   : > { %v6215_v38 = vmax.f32 %v6183_v32, 0.0  ;;  %v6186_v29 = vadd.f32 %v7672_v12, %v6154_v39  ;;  %v6152_v2 = vadd.f32 %v10929_v37, %v6113_v10  ;;  %v6118_v49 = vmul.f32 %v10920_v18, %v6079_v46 }
 0x5fb   : > { %6249 = vst.msk [vmem:[%s10958_s20 + $0xd0] sm:$0xff] %vm474_vm1, %v6217_v40  ;;  %v6077_v3 = vadd.f32 %v6034_v6, %v5871_v8  ;;  %v7593_v26 = vpop.f32.mrf.mxu1 }
 0x5fc   : > { %6247 = vst.msk [vmem:[%s10958_s20 + $0xc0] sm:$0xff] %vm474_vm1, %v6215_v38  ;;  %v6218_v30 = vmax.f32 %v6186_v29, 0.0  ;;  %v6184_v52 = vadd.f32 %v7673_v0, %v6152_v2  ;;  %v6157_v27 = vadd.f32 %v10929_v37, %v6118_v49  ;;  %v6080_v5 = vadd.f32 %v7593_v26, %v5874_v62 }
 0x5fd   : > { %v6116_v51 = vmul.f32 %v10920_v18, %v6077_v3  ;;  %v6037_v33 = vpop.f32.mrf.mxu1 }
 0x5fe   : > { %6250 = vst.msk [vmem:[%s10958_s20 + $0xd8] sm:$0xff] %vm474_vm1, %v6218_v30  ;;  %v6216_v53 = vmax.f32 %v6184_v52, 0.0  ;;  %v6189_v28 = vadd.f32 %v7674_v31, %v6157_v27  ;;  %v6119_v24 = vmul.f32 %v10920_v18, %v6080_v5  ;;  %v6078_v59 = vadd.f32 %v6037_v33, %v5872_v41 }
 0x5ff   : > { %v6155_v14 = vadd.f32 %v10929_v37, %v6116_v51 }
 0x600   : > { %6248 = vst.msk [vmem:[%s10958_s20 + $0xc8] sm:$0xff] %vm474_vm1, %v6216_v53  ;;  %v6221_v42 = vmax.f32 %v6189_v28, 0.0  ;;  %v6158_v55 = vadd.f32 %v10929_v37, %v6119_v24  ;;  %v6117_v11 = vmul.f32 %v10920_v18, %v6078_v59 }
 0x601   : > { %v6187_v16 = vadd.f32 %v7675_v60, %v6155_v14 }
 0x602   : > { %6253 = vst.msk [vmem:[%s10958_s20 + $0xf0] sm:$0xff] %vm474_vm1, %v6221_v42  ;;  %v6190_v43 = vadd.f32 %v7676_v23, %v6158_v55  ;;  %v6156_v20 = vadd.f32 %v10929_v37, %v6117_v11 }
 0x603   : > { %v6219_v61 = vmax.f32 %v6187_v16, 0.0 }
 0x604   : > { %v6222_v63 = vmax.f32 %v6190_v43, 0.0  ;;  %v6188_v34 = vadd.f32 %v7677_v7, %v6156_v20 }
 0x605   : > { %6251 = vst.msk [vmem:[%s10958_s20 + $0xe0] sm:$0xff] %vm474_vm1, %v6219_v61 }
 0x606   : > { %6254 = vst.msk [vmem:[%s10958_s20 + $0xf8] sm:$0xff] %vm474_vm1, %v6222_v63  ;;  %v6220_v21 = vmax.f32 %v6188_v34, 0.0 }
 0x608   : > { %6252 = vst.msk [vmem:[%s10958_s20 + $0xe8] sm:$0xff] %vm474_vm1, %v6220_v21 }
 0x609 PF: > { %s23_s25 = sadd.s32 1, %s7684_s25  }
 0x60a   : > { %p20_p4 = scmp.ge.s32.totalorder %s23_s25, 4  }
 0x60c   :  { %22 = sbr.rel (!%p20_p4) target bundleno = 1 (0x1), region = 120 }

</bundles_post_ra>
